<compile_context>
chip_gen: v5e
topology: v5e:2x2
jax: 0.10.0
libtpu: 0.0.40
codegen_flags: <defaults>
</compile_context>

<pallas_src>
import functools
import math

import jax
import jax.numpy as jnp
from jax import lax
from jax.experimental import pallas as pl
from jax.experimental.pallas import tpu as pltpu


# ----------------------------------------------------------------------------
# Kernel
# ----------------------------------------------------------------------------
def _encoder_layer_kernel(R, T, H, dk,
                          x_ref,
                          wqkv_ref, bqkv_ref,
                          wo_ref, bo_ref,
                          g1_ref, bt1_ref,
                          w1_ref, b1_ref, w2_ref, b2_ref,
                          g2_ref, bt2_ref,
                          o_ref,
                          ctx_ref):
    # x_ref block: (M, D) with M = R * T rows (R node-sequences of length T).
    M, D = x_ref.shape
    x = x_ref[...]                                                     # (M, D) f32
    xb = x.astype(jnp.bfloat16)

    # --- Fused QKV projection: ONE bf16 MXU dot instead of three f32 dots ---
    qkv = (jnp.dot(xb, wqkv_ref[...], preferred_element_type=jnp.float32)
           + bqkv_ref[...])                                            # (M, 3D) f32

    # --- Rearrange heads into the batch dim: (H*R, T, dk) ---------------------
    # (Static lane slices + major-dim concat; only layout patterns known to lower.)
    def split_heads(col0):
        return jnp.concatenate(
            [qkv[:, col0 + h * dk: col0 + (h + 1) * dk].reshape(R, T, dk)
             for h in range(H)],
            axis=0)                                                    # (H*R, T, dk)

    qh = split_heads(0)
    kh = split_heads(D)
    vh = split_heads(2 * D)

    # --- All heads' attention as ONE batched einsum + ONE softmax ------------
    scale = 1.0 / math.sqrt(dk)
    s = jnp.einsum('btd,bsd->bts', qh, kh,
                   preferred_element_type=jnp.float32) * scale         # (H*R, T, T)
    s = s - jnp.max(s, axis=-1, keepdims=True)
    e = jnp.exp(s)
    # EUP approximate reciprocal instead of a VALU divide.
    p = e * pl.reciprocal(jnp.sum(e, axis=-1, keepdims=True), approx=True)

    ctx = jnp.einsum('bts,bsd->btd', p, vh,
                     preferred_element_type=jnp.float32)               # (H*R, T, dk)

    # --- Re-pack heads back onto lanes via VMEM scratch -> ONE output-proj dot
    for h in range(H):
        ctx_ref[:, h * dk:(h + 1) * dk] = ctx[h * R:(h + 1) * R].reshape(M, dk)
    ctx_full = ctx_ref[...]                                            # (M, D) f32
    attn = (jnp.dot(ctx_full.astype(jnp.bfloat16), wo_ref[...],
                    preferred_element_type=jnp.float32) + bo_ref[...])

    # --- Residual + LayerNorm 1 ----------------------------------------------
    y = x + attn
    mu = jnp.mean(y, axis=-1, keepdims=True)
    yc = y - mu
    var = jnp.mean(yc * yc, axis=-1, keepdims=True)
    y = yc * lax.rsqrt(var + 1e-5) * g1_ref[...] + bt1_ref[...]

    # --- Position-wise FFN (bf16 matmuls, f32 accumulate/elementwise) --------
    hid = (jnp.dot(y.astype(jnp.bfloat16), w1_ref[...],
                   preferred_element_type=jnp.float32) + b1_ref[...])
    hid = jnp.maximum(hid, 0.0)
    f = (jnp.dot(hid.astype(jnp.bfloat16), w2_ref[...],
                 preferred_element_type=jnp.float32) + b2_ref[...])

    # --- Residual + LayerNorm 2 ----------------------------------------------
    z = y + f
    mu2 = jnp.mean(z, axis=-1, keepdims=True)
    zc = z - mu2
    var2 = jnp.mean(zc * zc, axis=-1, keepdims=True)
    o_ref[...] = zc * lax.rsqrt(var2 + 1e-5) * g2_ref[...] + bt2_ref[...]


# ----------------------------------------------------------------------------
# Wrapper
# ----------------------------------------------------------------------------
def _tensorcores_per_chip():
    """1 on single-TC chips (v5e/v6e); 2 on megacore (v4/v5p) and v7x."""
    try:
        kind = jax.devices()[0].device_kind.lower()
    except Exception:
        return 1
    if ("lite" in kind) or ("v5e" in kind) or ("v6" in kind):
        return 1
    return 2


def _pick_num_blocks(BN, T):
    """2 grid blocks only when there are 2 cores to use; else a single step."""
    n = 2 if _tensorcores_per_chip() >= 2 else 1
    while n > 1 and (BN % n != 0 or ((BN // n) * T) % 8 != 0):
        n -= 1
    return n


def transformer_encoder_layer_4d(src, params, num_heads):
    """src: (B, N, T, d_model) float32 -> (B, N, T, d_model) float32."""
    B, N, T, D = src.shape
    H = num_heads
    assert D % H == 0
    dk = D // H
    BN = B * N

    n_blocks = _pick_num_blocks(BN, T)
    R = BN // n_blocks                    # node-sequences per grid step
    M = R * T                             # matmul rows per grid step
    grid = (n_blocks,)

    x2 = src.reshape(BN * T, D)

    # PyTorch Linear stores (out, in): transpose so the kernel does x @ W.
    # Matmul weights are pre-cast to bf16; biases / LN params stay f32 (1, D) rows.
    bf = lambda a: a.astype(jnp.bfloat16)
    row = lambda a: a.reshape(1, -1).astype(jnp.float32)

    wqkv = jnp.concatenate([params['wq'].T, params['wk'].T, params['wv'].T], axis=1)
    bqkv = jnp.concatenate([params['bq'], params['bk'], params['bv']])

    inputs = (
        x2,
        bf(wqkv), row(bqkv),
        bf(params['wo'].T), row(params['bo']),
        row(params['g1']), row(params['beta1']),
        bf(params['w1'].T), row(params['b1']),
        bf(params['w2'].T), row(params['b2']),
        row(params['g2']), row(params['beta2']),
    )

    def const_spec(a):
        rank = a.ndim
        return pl.BlockSpec(a.shape, lambda i, _r=rank: (0,) * _r)

    in_specs = [pl.BlockSpec((M, D), lambda i: (i, 0))]
    in_specs += [const_spec(a) for a in inputs[1:]]

    out = pl.pallas_call(
        functools.partial(_encoder_layer_kernel, R, T, H, dk),
        out_shape=jax.ShapeDtypeStruct((BN * T, D), jnp.float32),
        grid_spec=pltpu.PrefetchScalarGridSpec(
            num_scalar_prefetch=0,
            grid=grid,
            in_specs=in_specs,
            out_specs=pl.BlockSpec((M, D), lambda i: (i, 0)),
            scratch_shapes=[pltpu.VMEM((M, D), jnp.float32)],   # head re-pack buffer
        ),
        compiler_params=pltpu.CompilerParams(
            dimension_semantics=("parallel",),
            vmem_limit_bytes=32 * 1024 * 1024),
    )(*inputs)
    return out.reshape(B, N, T, D)


# ----------------------------------------------------------------------------
# Pure-JAX reference mirroring the PyTorch forward (eval mode, f32 HIGHEST)
# ----------------------------------------------------------------------------
_PREC = lax.Precision.HIGHEST


def _linear(x, w, b):
    return jnp.matmul(x, w.T, precision=_PREC) + b


def _layernorm(x, g, b, eps=1e-5):
    mu = jnp.mean(x, axis=-1, keepdims=True)
    xc = x - mu
    var = jnp.mean(xc * xc, axis=-1, keepdims=True)
    return xc * lax.rsqrt(var + eps) * g + b


def _reference(src, p, num_heads):
    B, N, T, D = src.shape
    H = num_heads
    dk = D // H

    q = _linear(src, p['wq'], p['bq'])
    k = _linear(src, p['wk'], p['bk'])
    v = _linear(src, p['wv'], p['bv'])

    def split(t):  # (B,N,T,D) -> (B,N,H,T,dk)
        return t.reshape(B, N, T, H, dk).transpose(0, 1, 3, 2, 4)

    q, k, v = split(q), split(k), split(v)
    scores = jnp.matmul(q, jnp.swapaxes(k, -1, -2), precision=_PREC) * (1.0 / math.sqrt(dk))
    probs = jax.nn.softmax(scores, axis=-1)
    ctx = jnp.matmul(probs, v, precision=_PREC)                 # (B,N,H,T,dk)
    ctx = ctx.transpose(0, 1, 3, 2, 4).reshape(B, N, T, D)
    attn = _linear(ctx, p['wo'], p['bo'])

    y = _layernorm(src + attn, p['g1'], p['beta1'])
    f = _linear(jax.nn.relu(_linear(y, p['w1'], p['b1'])), p['w2'], p['b2'])
    return _layernorm(y + f, p['g2'], p['beta2'])


# ----------------------------------------------------------------------------
if __name__ == "__main__":
    B, N, T = 2, 16, 8
    d_model, num_heads, d_ff = 32, 4, 64

    key = jax.random.PRNGKey(0)
    keys = jax.random.split(key, 18)

    def w(k, shape, s=0.1):
        return jax.random.normal(k, shape, dtype=jnp.float32) * s

    src = jax.random.normal(keys[0], (B, N, T, d_model), dtype=jnp.float32)

    params = dict(
        wq=w(keys[1], (d_model, d_model)), bq=w(keys[2], (d_model,)),
        wk=w(keys[3], (d_model, d_model)), bk=w(keys[4], (d_model,)),
        wv=w(keys[5], (d_model, d_model)), bv=w(keys[6], (d_model,)),
        wo=w(keys[7], (d_model, d_model)), bo=w(keys[8], (d_model,)),
        g1=1.0 + w(keys[9], (d_model,)), beta1=w(keys[10], (d_model,)),
        w1=w(keys[11], (d_ff, d_model)), b1=w(keys[12], (d_ff,)),
        w2=w(keys[13], (d_model, d_ff)), b2=w(keys[14], (d_model,)),
        g2=1.0 + w(keys[15], (d_model,)), beta2=w(keys[16], (d_model,)),
    )

    out = transformer_encoder_layer_4d(src, params, num_heads)
    out = jax.block_until_ready(out)

    ref = _reference(src, params, num_heads)
    assert out.shape == (B, N, T, d_model)
    # Tolerance relaxed intentionally: kernel matmuls use bf16 operands (f32 accum)
    # and an approximate-reciprocal softmax; reference is f32 at HIGHEST precision.
    max_err = float(jnp.max(jnp.abs(out - ref)))
    assert jnp.allclose(out, ref, atol=5e-2, rtol=5e-2), max_err

    print("KERNEL_OK")
</pallas_src>

<mosaic_0001>
module attributes {stable_mosaic.version = 11 : i64} {
  func.func @_encoder_layer_kernel(%arg0: i32, %arg1: memref<128x32xf32, #tpu.memory_space<vmem>>, %arg2: memref<32x96xbf16, #tpu.memory_space<vmem>>, %arg3: memref<1x96xf32, #tpu.memory_space<vmem>>, %arg4: memref<32x32xbf16, #tpu.memory_space<vmem>>, %arg5: memref<1x32xf32, #tpu.memory_space<vmem>>, %arg6: memref<1x32xf32, #tpu.memory_space<vmem>>, %arg7: memref<1x32xf32, #tpu.memory_space<vmem>>, %arg8: memref<32x64xbf16, #tpu.memory_space<vmem>>, %arg9: memref<1x64xf32, #tpu.memory_space<vmem>>, %arg10: memref<64x32xbf16, #tpu.memory_space<vmem>>, %arg11: memref<1x32xf32, #tpu.memory_space<vmem>>, %arg12: memref<1x32xf32, #tpu.memory_space<vmem>>, %arg13: memref<1x32xf32, #tpu.memory_space<vmem>>, %arg14: memref<128x32xf32, #tpu.memory_space<vmem>>, %arg15: memref<128x32xf32, #tpu.memory_space<vmem>>) attributes {dimension_semantics = [#tpu.dimension_semantics<parallel>], iteration_bounds = array<i64: 2>, scalar_prefetch = 0 : i64, scratch_operands = 1 : i64, tpu.core_type = #tpu.core_type<tc>, window_params = [{transform_indices = @transform_0, window_bounds = array<i64: 128, 32>}, {pipeline_mode = #tpu.pipeline_mode<synchronous>, transform_indices = @transform_1, window_bounds = array<i64: 32, 96>}, {pipeline_mode = #tpu.pipeline_mode<synchronous>, transform_indices = @transform_2, window_bounds = array<i64: 1, 96>}, {pipeline_mode = #tpu.pipeline_mode<synchronous>, transform_indices = @transform_3, window_bounds = array<i64: 32, 32>}, {pipeline_mode = #tpu.pipeline_mode<synchronous>, transform_indices = @transform_4, window_bounds = array<i64: 1, 32>}, {pipeline_mode = #tpu.pipeline_mode<synchronous>, transform_indices = @transform_5, window_bounds = array<i64: 1, 32>}, {pipeline_mode = #tpu.pipeline_mode<synchronous>, transform_indices = @transform_6, window_bounds = array<i64: 1, 32>}, {pipeline_mode = #tpu.pipeline_mode<synchronous>, transform_indices = @transform_7, window_bounds = array<i64: 32, 64>}, {pipeline_mode = #tpu.pipeline_mode<synchronous>, transform_indices = @transform_8, window_bounds = array<i64: 1, 64>}, {pipeline_mode = #tpu.pipeline_mode<synchronous>, transform_indices = @transform_9, window_bounds = array<i64: 64, 32>}, {pipeline_mode = #tpu.pipeline_mode<synchronous>, transform_indices = @transform_10, window_bounds = array<i64: 1, 32>}, {pipeline_mode = #tpu.pipeline_mode<synchronous>, transform_indices = @transform_11, window_bounds = array<i64: 1, 32>}, {pipeline_mode = #tpu.pipeline_mode<synchronous>, transform_indices = @transform_12, window_bounds = array<i64: 1, 32>}, {transform_indices = @transform_13, window_bounds = array<i64: 128, 32>}]} {
    %c0 = arith.constant 0 : index
    %c0_0 = arith.constant 0 : index
    %0 = vector.load %arg1[%c0, %c0_0] : memref<128x32xf32, #tpu.memory_space<vmem>>, vector<128x32xf32>
    %1 = arith.truncf %0 : vector<128x32xf32> to vector<128x32xbf16>
    %c0_1 = arith.constant 0 : index
    %c0_2 = arith.constant 0 : index
    %2 = vector.load %arg2[%c0_1, %c0_2] : memref<32x96xbf16, #tpu.memory_space<vmem>>, vector<32x96xbf16>
    %cst = arith.constant dense<0.000000e+00> : vector<128x96xf32>
    %3 = tpu.matmul %1, %2, %cst {dimension_numbers = #tpu.dot_dimension_numbers<[1], [0], [0], [1], [0, 0, 1, 1], [], []>} : vector<128x32xbf16>, vector<32x96xbf16>, vector<128x96xf32> -> vector<128x96xf32>
    %c0_3 = arith.constant 0 : index
    %c0_4 = arith.constant 0 : index
    %4 = vector.load %arg3[%c0_3, %c0_4] : memref<1x96xf32, #tpu.memory_space<vmem>>, vector<1x96xf32>
    %5 = vector.broadcast %4 : vector<1x96xf32> to vector<128x96xf32>
    %6 = arith.addf %3, %5 : vector<128x96xf32>
    %7 = vector.extract_strided_slice %6 {offsets = [0, 0], sizes = [128, 8], strides = [1, 1]} : vector<128x96xf32> to vector<128x8xf32>
    %8 = vector.shape_cast %7 : vector<128x8xf32> to vector<16x8x8xf32>
    %9 = vector.extract_strided_slice %6 {offsets = [0, 8], sizes = [128, 8], strides = [1, 1]} : vector<128x96xf32> to vector<128x8xf32>
    %10 = vector.shape_cast %9 : vector<128x8xf32> to vector<16x8x8xf32>
    %11 = vector.extract_strided_slice %6 {offsets = [0, 16], sizes = [128, 8], strides = [1, 1]} : vector<128x96xf32> to vector<128x8xf32>
    %12 = vector.shape_cast %11 : vector<128x8xf32> to vector<16x8x8xf32>
    %13 = vector.extract_strided_slice %6 {offsets = [0, 24], sizes = [128, 8], strides = [1, 1]} : vector<128x96xf32> to vector<128x8xf32>
    %14 = vector.shape_cast %13 : vector<128x8xf32> to vector<16x8x8xf32>
    %15 = tpu.concatenate %8, %10, %12, %14 in 0 : vector<16x8x8xf32>, vector<16x8x8xf32>, vector<16x8x8xf32>, vector<16x8x8xf32> -> vector<64x8x8xf32>
    %16 = vector.extract_strided_slice %6 {offsets = [0, 32], sizes = [128, 8], strides = [1, 1]} : vector<128x96xf32> to vector<128x8xf32>
    %17 = vector.shape_cast %16 : vector<128x8xf32> to vector<16x8x8xf32>
    %18 = vector.extract_strided_slice %6 {offsets = [0, 40], sizes = [128, 8], strides = [1, 1]} : vector<128x96xf32> to vector<128x8xf32>
    %19 = vector.shape_cast %18 : vector<128x8xf32> to vector<16x8x8xf32>
    %20 = vector.extract_strided_slice %6 {offsets = [0, 48], sizes = [128, 8], strides = [1, 1]} : vector<128x96xf32> to vector<128x8xf32>
    %21 = vector.shape_cast %20 : vector<128x8xf32> to vector<16x8x8xf32>
    %22 = vector.extract_strided_slice %6 {offsets = [0, 56], sizes = [128, 8], strides = [1, 1]} : vector<128x96xf32> to vector<128x8xf32>
    %23 = vector.shape_cast %22 : vector<128x8xf32> to vector<16x8x8xf32>
    %24 = tpu.concatenate %17, %19, %21, %23 in 0 : vector<16x8x8xf32>, vector<16x8x8xf32>, vector<16x8x8xf32>, vector<16x8x8xf32> -> vector<64x8x8xf32>
    %25 = vector.extract_strided_slice %6 {offsets = [0, 64], sizes = [128, 8], strides = [1, 1]} : vector<128x96xf32> to vector<128x8xf32>
    %26 = vector.shape_cast %25 : vector<128x8xf32> to vector<16x8x8xf32>
    %27 = vector.extract_strided_slice %6 {offsets = [0, 72], sizes = [128, 8], strides = [1, 1]} : vector<128x96xf32> to vector<128x8xf32>
    %28 = vector.shape_cast %27 : vector<128x8xf32> to vector<16x8x8xf32>
    %29 = vector.extract_strided_slice %6 {offsets = [0, 80], sizes = [128, 8], strides = [1, 1]} : vector<128x96xf32> to vector<128x8xf32>
    %30 = vector.shape_cast %29 : vector<128x8xf32> to vector<16x8x8xf32>
    %31 = vector.extract_strided_slice %6 {offsets = [0, 88], sizes = [128, 8], strides = [1, 1]} : vector<128x96xf32> to vector<128x8xf32>
    %32 = vector.shape_cast %31 : vector<128x8xf32> to vector<16x8x8xf32>
    %33 = tpu.concatenate %26, %28, %30, %32 in 0 : vector<16x8x8xf32>, vector<16x8x8xf32>, vector<16x8x8xf32>, vector<16x8x8xf32> -> vector<64x8x8xf32>
    "tpu.trace_start"() <{level = 10 : i32, message = "btd,bsd->bts"}> : () -> ()
    %cst_5 = arith.constant dense<0.000000e+00> : vector<64x8x8xf32>
    %34 = tpu.matmul %15, %24, %cst_5 {dimension_numbers = #tpu.dot_dimension_numbers<[2], [2], [1], [1], [0, 0, 0, 1, 1, 1], [0], [0]>} : vector<64x8x8xf32>, vector<64x8x8xf32>, vector<64x8x8xf32> -> vector<64x8x8xf32>
    "tpu.trace_stop"() : () -> ()
    %cst_6 = arith.constant 0.353553385 : f32
    %35 = vector.broadcast %cst_6 : f32 to vector<64x8x8xf32>
    %36 = arith.mulf %34, %35 : vector<64x8x8xf32>
    %cst_7 = arith.constant dense<0xFF800000> : vector<64x8xf32>
    %37 = vector.multi_reduction <maximumf>, %36, %cst_7 [2] : vector<64x8x8xf32> to vector<64x8xf32>
    %38 = vector.shape_cast %37 : vector<64x8xf32> to vector<64x8x1xf32>
    %39 = vector.broadcast %38 : vector<64x8x1xf32> to vector<64x8x8xf32>
    %40 = arith.subf %36, %39 : vector<64x8x8xf32>
    %41 = math.exp %40 : vector<64x8x8xf32>
    %cst_8 = arith.constant dense<0.000000e+00> : vector<64x8xf32>
    %42 = vector.multi_reduction <add>, %41, %cst_8 [2] : vector<64x8x8xf32> to vector<64x8xf32>
    %43 = vector.shape_cast %42 : vector<64x8xf32> to vector<64x8x1xf32>
    %44 = tpu.reciprocal %43 {approx = true} : vector<64x8x1xf32> -> vector<64x8x1xf32>
    %45 = vector.broadcast %44 : vector<64x8x1xf32> to vector<64x8x8xf32>
    %46 = arith.mulf %41, %45 : vector<64x8x8xf32>
    "tpu.trace_start"() <{level = 10 : i32, message = "bts,bsd->btd"}> : () -> ()
    %cst_9 = arith.constant dense<0.000000e+00> : vector<64x8x8xf32>
    %47 = tpu.matmul %46, %33, %cst_9 {dimension_numbers = #tpu.dot_dimension_numbers<[2], [1], [1], [2], [0, 0, 0, 1, 1, 2], [0], [0]>} : vector<64x8x8xf32>, vector<64x8x8xf32>, vector<64x8x8xf32> -> vector<64x8x8xf32>
    "tpu.trace_stop"() : () -> ()
    %48 = vector.extract_strided_slice %47 {offsets = [0, 0, 0], sizes = [16, 8, 8], strides = [1, 1, 1]} : vector<64x8x8xf32> to vector<16x8x8xf32>
    %49 = vector.shape_cast %48 : vector<16x8x8xf32> to vector<128x8xf32>
    %c0_10 = arith.constant 0 : index
    %c0_11 = arith.constant 0 : index
    %50 = vector.load %arg15[%c0_10, %c0_11] : memref<128x32xf32, #tpu.memory_space<vmem>>, vector<128x8xf32>
    tpu.vector_store %arg15[%c0_10, %c0_11], %49 {strides = array<i32>} : memref<128x32xf32, #tpu.memory_space<vmem>>, vector<128x8xf32>,
    %51 = vector.extract_strided_slice %47 {offsets = [16, 0, 0], sizes = [16, 8, 8], strides = [1, 1, 1]} : vector<64x8x8xf32> to vector<16x8x8xf32>
    %52 = vector.shape_cast %51 : vector<16x8x8xf32> to vector<128x8xf32>
    %c0_12 = arith.constant 0 : index
    %c8 = arith.constant 8 : index
    %53 = vector.load %arg15[%c0_12, %c8] : memref<128x32xf32, #tpu.memory_space<vmem>>, vector<128x8xf32>
    tpu.vector_store %arg15[%c0_12, %c8], %52 {strides = array<i32>} : memref<128x32xf32, #tpu.memory_space<vmem>>, vector<128x8xf32>,
    %54 = vector.extract_strided_slice %47 {offsets = [32, 0, 0], sizes = [16, 8, 8], strides = [1, 1, 1]} : vector<64x8x8xf32> to vector<16x8x8xf32>
    %55 = vector.shape_cast %54 : vector<16x8x8xf32> to vector<128x8xf32>
    %c0_13 = arith.constant 0 : index
    %c16 = arith.constant 16 : index
    %56 = vector.load %arg15[%c0_13, %c16] : memref<128x32xf32, #tpu.memory_space<vmem>>, vector<128x8xf32>
    tpu.vector_store %arg15[%c0_13, %c16], %55 {strides = array<i32>} : memref<128x32xf32, #tpu.memory_space<vmem>>, vector<128x8xf32>,
    %57 = vector.extract_strided_slice %47 {offsets = [48, 0, 0], sizes = [16, 8, 8], strides = [1, 1, 1]} : vector<64x8x8xf32> to vector<16x8x8xf32>
    %58 = vector.shape_cast %57 : vector<16x8x8xf32> to vector<128x8xf32>
    %c0_14 = arith.constant 0 : index
    %c24 = arith.constant 24 : index
    %59 = vector.load %arg15[%c0_14, %c24] : memref<128x32xf32, #tpu.memory_space<vmem>>, vector<128x8xf32>
    tpu.vector_store %arg15[%c0_14, %c24], %58 {strides = array<i32>} : memref<128x32xf32, #tpu.memory_space<vmem>>, vector<128x8xf32>,
    %c0_15 = arith.constant 0 : index
    %c0_16 = arith.constant 0 : index
    %60 = vector.load %arg15[%c0_15, %c0_16] : memref<128x32xf32, #tpu.memory_space<vmem>>, vector<128x32xf32>
    %61 = arith.truncf %60 : vector<128x32xf32> to vector<128x32xbf16>
    %c0_17 = arith.constant 0 : index
    %c0_18 = arith.constant 0 : index
    %62 = vector.load %arg4[%c0_17, %c0_18] : memref<32x32xbf16, #tpu.memory_space<vmem>>, vector<32x32xbf16>
    %cst_19 = arith.constant dense<0.000000e+00> : vector<128x32xf32>
    %63 = tpu.matmul %61, %62, %cst_19 {dimension_numbers = #tpu.dot_dimension_numbers<[1], [0], [0], [1], [0, 0, 1, 1], [], []>} : vector<128x32xbf16>, vector<32x32xbf16>, vector<128x32xf32> -> vector<128x32xf32>
    %c0_20 = arith.constant 0 : index
    %c0_21 = arith.constant 0 : index
    %64 = vector.load %arg5[%c0_20, %c0_21] : memref<1x32xf32, #tpu.memory_space<vmem>>, vector<1x32xf32>
    %65 = vector.broadcast %64 : vector<1x32xf32> to vector<128x32xf32>
    %66 = arith.addf %63, %65 : vector<128x32xf32>
    %67 = arith.addf %0, %66 : vector<128x32xf32>
    %cst_22 = arith.constant dense<0.000000e+00> : vector<128xf32>
    %68 = vector.multi_reduction <add>, %67, %cst_22 [1] : vector<128x32xf32> to vector<128xf32>
    %69 = vector.shape_cast %68 : vector<128xf32> to vector<128x1xf32>
    %cst_23 = arith.constant 3.200000e+01 : f32
    %70 = vector.broadcast %cst_23 : f32 to vector<128x1xf32>
    %71 = arith.divf %69, %70 : vector<128x1xf32>
    %72 = vector.broadcast %71 : vector<128x1xf32> to vector<128x32xf32>
    %73 = arith.subf %67, %72 : vector<128x32xf32>
    %74 = arith.mulf %73, %73 : vector<128x32xf32>
    %cst_24 = arith.constant dense<0.000000e+00> : vector<128xf32>
    %75 = vector.multi_reduction <add>, %74, %cst_24 [1] : vector<128x32xf32> to vector<128xf32>
    %76 = vector.shape_cast %75 : vector<128xf32> to vector<128x1xf32>
    %cst_25 = arith.constant 3.200000e+01 : f32
    %77 = vector.broadcast %cst_25 : f32 to vector<128x1xf32>
    %78 = arith.divf %76, %77 : vector<128x1xf32>
    %cst_26 = arith.constant 9.99999974E-6 : f32
    %79 = vector.broadcast %cst_26 : f32 to vector<128x1xf32>
    %80 = arith.addf %78, %79 : vector<128x1xf32>
    %81 = math.rsqrt %80 : vector<128x1xf32>
    %82 = vector.broadcast %81 : vector<128x1xf32> to vector<128x32xf32>
    %83 = arith.mulf %73, %82 : vector<128x32xf32>
    %c0_27 = arith.constant 0 : index
    %c0_28 = arith.constant 0 : index
    %84 = vector.load %arg6[%c0_27, %c0_28] : memref<1x32xf32, #tpu.memory_space<vmem>>, vector<1x32xf32>
    %85 = vector.broadcast %84 : vector<1x32xf32> to vector<128x32xf32>
    %86 = arith.mulf %83, %85 : vector<128x32xf32>
    %c0_29 = arith.constant 0 : index
    %c0_30 = arith.constant 0 : index
    %87 = vector.load %arg7[%c0_29, %c0_30] : memref<1x32xf32, #tpu.memory_space<vmem>>, vector<1x32xf32>
    %88 = vector.broadcast %87 : vector<1x32xf32> to vector<128x32xf32>
    %89 = arith.addf %86, %88 : vector<128x32xf32>
    %90 = arith.truncf %89 : vector<128x32xf32> to vector<128x32xbf16>
    %c0_31 = arith.constant 0 : index
    %c0_32 = arith.constant 0 : index
    %91 = vector.load %arg8[%c0_31, %c0_32] : memref<32x64xbf16, #tpu.memory_space<vmem>>, vector<32x64xbf16>
    %cst_33 = arith.constant dense<0.000000e+00> : vector<128x64xf32>
    %92 = tpu.matmul %90, %91, %cst_33 {dimension_numbers = #tpu.dot_dimension_numbers<[1], [0], [0], [1], [0, 0, 1, 1], [], []>} : vector<128x32xbf16>, vector<32x64xbf16>, vector<128x64xf32> -> vector<128x64xf32>
    %c0_34 = arith.constant 0 : index
    %c0_35 = arith.constant 0 : index
    %93 = vector.load %arg9[%c0_34, %c0_35] : memref<1x64xf32, #tpu.memory_space<vmem>>, vector<1x64xf32>
    %94 = vector.broadcast %93 : vector<1x64xf32> to vector<128x64xf32>
    %95 = arith.addf %92, %94 : vector<128x64xf32>
    %cst_36 = arith.constant 0.000000e+00 : f32
    %96 = vector.broadcast %cst_36 : f32 to vector<128x64xf32>
    %97 = arith.maximumf %95, %96 : vector<128x64xf32>
    %98 = arith.truncf %97 : vector<128x64xf32> to vector<128x64xbf16>
    %c0_37 = arith.constant 0 : index
    %c0_38 = arith.constant 0 : index
    %99 = vector.load %arg10[%c0_37, %c0_38] : memref<64x32xbf16, #tpu.memory_space<vmem>>, vector<64x32xbf16>
    %cst_39 = arith.constant dense<0.000000e+00> : vector<128x32xf32>
    %100 = tpu.matmul %98, %99, %cst_39 {dimension_numbers = #tpu.dot_dimension_numbers<[1], [0], [0], [1], [0, 0, 1, 1], [], []>} : vector<128x64xbf16>, vector<64x32xbf16>, vector<128x32xf32> -> vector<128x32xf32>
    %c0_40 = arith.constant 0 : index
    %c0_41 = arith.constant 0 : index
    %101 = vector.load %arg11[%c0_40, %c0_41] : memref<1x32xf32, #tpu.memory_space<vmem>>, vector<1x32xf32>
    %102 = vector.broadcast %101 : vector<1x32xf32> to vector<128x32xf32>
    %103 = arith.addf %100, %102 : vector<128x32xf32>
    %104 = arith.addf %89, %103 : vector<128x32xf32>
    %cst_42 = arith.constant dense<0.000000e+00> : vector<128xf32>
    %105 = vector.multi_reduction <add>, %104, %cst_42 [1] : vector<128x32xf32> to vector<128xf32>
    %106 = vector.shape_cast %105 : vector<128xf32> to vector<128x1xf32>
    %cst_43 = arith.constant 3.200000e+01 : f32
    %107 = vector.broadcast %cst_43 : f32 to vector<128x1xf32>
    %108 = arith.divf %106, %107 : vector<128x1xf32>
    %109 = vector.broadcast %108 : vector<128x1xf32> to vector<128x32xf32>
    %110 = arith.subf %104, %109 : vector<128x32xf32>
    %111 = arith.mulf %110, %110 : vector<128x32xf32>
    %cst_44 = arith.constant dense<0.000000e+00> : vector<128xf32>
    %112 = vector.multi_reduction <add>, %111, %cst_44 [1] : vector<128x32xf32> to vector<128xf32>
    %113 = vector.shape_cast %112 : vector<128xf32> to vector<128x1xf32>
    %cst_45 = arith.constant 3.200000e+01 : f32
    %114 = vector.broadcast %cst_45 : f32 to vector<128x1xf32>
    %115 = arith.divf %113, %114 : vector<128x1xf32>
    %cst_46 = arith.constant 9.99999974E-6 : f32
    %116 = vector.broadcast %cst_46 : f32 to vector<128x1xf32>
    %117 = arith.addf %115, %116 : vector<128x1xf32>
    %118 = math.rsqrt %117 : vector<128x1xf32>
    %119 = vector.broadcast %118 : vector<128x1xf32> to vector<128x32xf32>
    %120 = arith.mulf %110, %119 : vector<128x32xf32>
    %c0_47 = arith.constant 0 : index
    %c0_48 = arith.constant 0 : index
    %121 = vector.load %arg12[%c0_47, %c0_48] : memref<1x32xf32, #tpu.memory_space<vmem>>, vector<1x32xf32>
    %122 = vector.broadcast %121 : vector<1x32xf32> to vector<128x32xf32>
    %123 = arith.mulf %120, %122 : vector<128x32xf32>
    %c0_49 = arith.constant 0 : index
    %c0_50 = arith.constant 0 : index
    %124 = vector.load %arg13[%c0_49, %c0_50] : memref<1x32xf32, #tpu.memory_space<vmem>>, vector<1x32xf32>
    %125 = vector.broadcast %124 : vector<1x32xf32> to vector<128x32xf32>
    %126 = arith.addf %123, %125 : vector<128x32xf32>
    %c0_51 = arith.constant 0 : index
    %c0_52 = arith.constant 0 : index
    %127 = vector.load %arg14[%c0_51, %c0_52] : memref<128x32xf32, #tpu.memory_space<vmem>>, vector<128x32xf32>
    tpu.vector_store %arg14[%c0_51, %c0_52], %126 {strides = array<i32>} : memref<128x32xf32, #tpu.memory_space<vmem>>, vector<128x32xf32>,
    return
  }
  func.func @transform_0(%arg0: i32) -> (i32, i32) {
    %c0_i32 = arith.constant 0 : i32
    %c0_i32_0 = arith.constant 0 : i32
    return %arg0, %c0_i32 : i32, i32
  }
  func.func @transform_1(%arg0: i32) -> (i32, i32) {
    %c0_i32 = arith.constant 0 : i32
    %c0_i32_0 = arith.constant 0 : i32
    %c0_i32_1 = arith.constant 0 : i32
    return %c0_i32, %c0_i32_0 : i32, i32
  }
  func.func @transform_2(%arg0: i32) -> (i32, i32) {
    %c0_i32 = arith.constant 0 : i32
    %c0_i32_0 = arith.constant 0 : i32
    %c0_i32_1 = arith.constant 0 : i32
    return %c0_i32, %c0_i32_0 : i32, i32
  }
  func.func @transform_3(%arg0: i32) -> (i32, i32) {
    %c0_i32 = arith.constant 0 : i32
    %c0_i32_0 = arith.constant 0 : i32
    %c0_i32_1 = arith.constant 0 : i32
    return %c0_i32, %c0_i32_0 : i32, i32
  }
  func.func @transform_4(%arg0: i32) -> (i32, i32) {
    %c0_i32 = arith.constant 0 : i32
    %c0_i32_0 = arith.constant 0 : i32
    %c0_i32_1 = arith.constant 0 : i32
    return %c0_i32, %c0_i32_0 : i32, i32
  }
  func.func @transform_5(%arg0: i32) -> (i32, i32) {
    %c0_i32 = arith.constant 0 : i32
    %c0_i32_0 = arith.constant 0 : i32
    %c0_i32_1 = arith.constant 0 : i32
    return %c0_i32, %c0_i32_0 : i32, i32
  }
  func.func @transform_6(%arg0: i32) -> (i32, i32) {
    %c0_i32 = arith.constant 0 : i32
    %c0_i32_0 = arith.constant 0 : i32
    %c0_i32_1 = arith.constant 0 : i32
    return %c0_i32, %c0_i32_0 : i32, i32
  }
  func.func @transform_7(%arg0: i32) -> (i32, i32) {
    %c0_i32 = arith.constant 0 : i32
    %c0_i32_0 = arith.constant 0 : i32
    %c0_i32_1 = arith.constant 0 : i32
    return %c0_i32, %c0_i32_0 : i32, i32
  }
  func.func @transform_8(%arg0: i32) -> (i32, i32) {
    %c0_i32 = arith.constant 0 : i32
    %c0_i32_0 = arith.constant 0 : i32
    %c0_i32_1 = arith.constant 0 : i32
    return %c0_i32, %c0_i32_0 : i32, i32
  }
  func.func @transform_9(%arg0: i32) -> (i32, i32) {
    %c0_i32 = arith.constant 0 : i32
    %c0_i32_0 = arith.constant 0 : i32
    %c0_i32_1 = arith.constant 0 : i32
    return %c0_i32, %c0_i32_0 : i32, i32
  }
  func.func @transform_10(%arg0: i32) -> (i32, i32) {
    %c0_i32 = arith.constant 0 : i32
    %c0_i32_0 = arith.constant 0 : i32
    %c0_i32_1 = arith.constant 0 : i32
    return %c0_i32, %c0_i32_0 : i32, i32
  }
  func.func @transform_11(%arg0: i32) -> (i32, i32) {
    %c0_i32 = arith.constant 0 : i32
    %c0_i32_0 = arith.constant 0 : i32
    %c0_i32_1 = arith.constant 0 : i32
    return %c0_i32, %c0_i32_0 : i32, i32
  }
  func.func @transform_12(%arg0: i32) -> (i32, i32) {
    %c0_i32 = arith.constant 0 : i32
    %c0_i32_0 = arith.constant 0 : i32
    %c0_i32_1 = arith.constant 0 : i32
    return %c0_i32, %c0_i32_0 : i32, i32
  }
  func.func @transform_13(%arg0: i32) -> (i32, i32) {
    %c0_i32 = arith.constant 0 : i32
    %c0_i32_0 = arith.constant 0 : i32
    return %arg0, %c0_i32 : i32, i32
  }
}

</mosaic_0001>

<bundles_post_ra>
// kernel: tpu_custom_call.1
= control target key start
LH: loop header
LB: loop body
LE: loop exit
PB: predicated region body
PF: predicated region fallthrough
CT: control target
= control target key end

     0   :  { %s7176_s25 = smov 0   ;;  %s9948_s0 = inlined_call_operand.vmem [shape: f32[256,32], index: 0, kind: input, shape index: {}]   ;;  %s9949_s1 = inlined_call_operand.vmem [shape: bf16[32,96], index: 1, kind: input, shape index: {}]   ;;  %s9950_s2 = inlined_call_operand.vmem [shape: f32[1,96], index: 2, kind: input, shape index: {}]   ;;  %s9951_s3 = inlined_call_operand.vmem [shape: bf16[32,32], index: 3, kind: input, shape index: {}]   ;;  %s9952_s4 = inlined_call_operand.vmem [shape: f32[1,32], index: 4, kind: input, shape index: {}]   ;;  %s9953_s5 = inlined_call_operand.vmem [shape: f32[1,32], index: 5, kind: input, shape index: {}]   ;;  %s9954_s6 = inlined_call_operand.vmem [shape: f32[1,32], index: 6, kind: input, shape index: {}]   ;;  %s9955_s7 = inlined_call_operand.vmem [shape: bf16[32,64], index: 7, kind: input, shape index: {}]   ;;  %s9956_s8 = inlined_call_operand.vmem [shape: f32[1,64], index: 8, kind: input, shape index: {}]   ;;  %s9957_s9 = inlined_call_operand.vmem [shape: bf16[64,32], index: 9, kind: input, shape index: {}]   ;;  %s9958_s10 = inlined_call_operand.vmem [shape: f32[1,32], index: 10, kind: input, shape index: {}]   ;;  %s9959_s11 = inlined_call_operand.vmem [shape: f32[1,32], index: 11, kind: input, shape index: {}]   ;;  %s9960_s12 = inlined_call_operand.vmem [shape: f32[1,32], index: 12, kind: input, shape index: {}]   ;;  %s9961_s13 = inlined_call_operand.vmem [shape: f32[256,32], index: 13, kind: output, shape index: {}]  }
   0x1 LB: > { %s6278_s26 = sadd.s32 4294967295, %s7095_s25   ;;  %p6282_p0 = scmp.ge.s32.totalorder %s7095_s25, 1  ;;  %s7095_s25 = sphi %s7176_s25, %s23_s25  }
   0x2   : > { %p388_p1 = scmp.lt.s32.totalorder %s7095_s25, 3 }
   0x4   : > { %p389_p2 = pnand %p6282_p0, %p388_p1 }
   0x6   : > { %392 = sbr.rel (%p389_p2) target bundleno = 2866 (0xb32), region = 72 }
   0xb   : > { %v6554_v0 = vld [vmem:[%s9949_s1 + $0x8] sm:$0xff]  ;;  %s6283_s29 = sshll.u32 %s6278_s26, 4  ;;  %v6553_v1 = vld [vmem:[%s9949_s1] sm:$0xff]  ;;  %vm489_vm0 = vcmask 261120   ;;  %s7097_s21 = smov 96   ;;  %vm677_vm1 = vcmask 64512  }
   0xc   : > { %p433_p3 = scmp.lt.s32.totalorder %s6283_s29, 31  ;;  %520 = vmatpush.bf16.msra.mxu0 %v6554_v0  ;;  %v7227_v26 = vld [vmem:[%s9950_s2] ss:$0 sm:$0xff]  ;;  %s7098_s22 = smov 120   ;;  %vm4852_vm2 = vcmask 130112   ;;  %vm4933_vm3 = vcmask 195712  }
   0xd   : > { %s7099_s23 = smov 104   ;;  %s7100_s24 = smov 112   ;;  %vm5014_vm4 = vcmask 261312  }
   0xe   : > { %s10199_s29 = smov (!%p433_p3, %s6283_s29), 31  ;;  %s7101_s26 = smov 64  }
   0xf   : > { %s6284_s15 = sshll.u32 %s10199_s29, 3  ;;  %s7102_s27 = smov 16  }
  0x10   : > { %521 = vmatpush.bf16.msra.mxu0 %v6553_v1  ;;  %s7198_s18 = scalar_lea.vmem %s9948_s0, %s6284_s15  ;;  %s7103_s28 = smov 8  }
  0x11   : > { %v445_v2 = vld [vmem:[%s7198_s18] sm:$0xff]  ;;  %v446_v3 = vld [vmem:[%s7198_s18 + $0x8] sm:$0xff]  ;;  %v447_v5 = vld [vmem:[%s7198_s18 + $0x10] sm:$0xff]  ;;  %s7104_s30 = smov 24   ;;  %s9729_s20 = scalar_lea.vmem %s9961_s13, %s6284_s15 }
  0x12   : > { %v461_v4 = vpack.c.bf16 %v446_v3, %v445_v2  ;;  %v448_v6 = vld [vmem:[%s7198_s18 + $0x18] sm:$0xff]  ;;  %v449_v8 = vld [vmem:[%s7198_s18 + $0x20] sm:$0xff]  ;;  %v450_v9 = vld [vmem:[%s7198_s18 + $0x28] sm:$0xff] }
  0x13   : > { %v462_v7 = vpack.c.bf16 %v448_v6, %v447_v5  ;;  %v463_v10 = vpack.c.bf16 %v450_v9, %v449_v8  ;;  %v451_v11 = vld [vmem:[%s7198_s18 + $0x30] sm:$0xff]  ;;  %v452_v12 = vld [vmem:[%s7198_s18 + $0x38] sm:$0xff]  ;;  %v453_v14 = vld [vmem:[%s7198_s18 + $0x40] sm:$0xff] }
  0x14   : > { %6295 = vmatmul.msk.bf16.vlgmr.msra.gmra.mxu0 %vm489_vm0, %v461_v4  ;;  %v464_v13 = vpack.c.bf16 %v452_v12, %v451_v11  ;;  %v454_v15 = vld [vmem:[%s7198_s18 + $0x48] sm:$0xff]  ;;  %v455_v17 = vld [vmem:[%s7198_s18 + $0x50] sm:$0xff]  ;;  %v456_v18 = vld [vmem:[%s7198_s18 + $0x58] sm:$0xff] }
  0x15   : > { %v465_v16 = vpack.c.bf16 %v454_v15, %v453_v14  ;;  %v466_v19 = vpack.c.bf16 %v456_v18, %v455_v17  ;;  %v457_v20 = vld [vmem:[%s7198_s18 + $0x60] sm:$0xff]  ;;  %v458_v21 = vld [vmem:[%s7198_s18 + $0x68] sm:$0xff]  ;;  %v459_v23 = vld [vmem:[%s7198_s18 + $0x70] sm:$0xff] }
  0x16   : > { %v467_v22 = vpack.c.bf16 %v458_v21, %v457_v20  ;;  %v460_v24 = vld [vmem:[%s7198_s18 + $0x78] sm:$0xff] }
  0x17   : > { %v468_v25 = vpack.c.bf16 %v460_v24, %v459_v23 }
  0x24   : > { %6296 = vmatmul.msk.bf16.gmra.mxu0 %vm489_vm0, %v462_v7 }
  0x34   : > { %6297 = vmatmul.msk.bf16.gmra.mxu0 %vm489_vm0, %v463_v10 }
  0x44   : > { %6298 = vmatmul.msk.bf16.gmra.mxu0 %vm489_vm0, %v464_v13 }
  0x54   : > { %6299 = vmatmul.msk.bf16.gmra.mxu0 %vm489_vm0, %v465_v16 }
  0x64   : > { %6300 = vmatmul.msk.bf16.gmra.mxu0 %vm489_vm0, %v466_v19 }
  0x74   : > { %6301 = vmatmul.msk.bf16.gmra.mxu0 %vm489_vm0, %v467_v22 }
  0x84   : > { %6302 = vmatmul.msk.bf16.gmra.mxu0 %vm489_vm0, %v468_v25 }
  0x91   : > { %v523_v27 = vpop.f32.mrf.mxu0 }
  0x92   : > { %v7230_v28 = vadd.f32 %v7227_v26, %v523_v27 }
  0x94   : > { %675 = vrot.lane.b32.xlu2 %v7230_v28, %s7097_s21  ;;  %579 = vrot.lane.b32.xlu0 %v7230_v28, %s7098_s22 }
  0x99   : > { %v525_v29 = vpop.f32.mrf.mxu0 }
  0x9a   : > { %v7237_v30 = vadd.f32 %v7227_v26, %v525_v29 }
  0x9c   : > { %581 = vrot.lane.b32.xlu1 %v7237_v30, %s7098_s22  ;;  %643 = vrot.lane.b32.xlu2 %v7230_v28, %s7099_s23 }
  0x9d   : > { %611 = vrot.lane.b32.xlu0 %v7230_v28, %s7100_s24 }
  0xa1   : > { %v528_v31 = vpop.f32.mrf.mxu0 }
  0xa2   : > { %v7262_v36 = vadd.f32 %v7227_v26, %v528_v31 }
  0xa4   : > { %645 = vrot.lane.b32.xlu2 %v7237_v30, %s7099_s23 }
  0xa5   : > { %702 = vrot.lane.b32.xlu0 %v7237_v30, %s7097_s21 }
  0xa9   : > { %v530_v32 = vpop.f32.mrf.mxu0 }
  0xaa   : > { %v7250_v33 = vadd.f32 %v7227_v26, %v530_v32 }
  0xac   : > { %754 = vrot.lane.b32.xlu1 %v7250_v33, %s7097_s21  ;;  %585 = vrot.lane.b32.xlu2 %v7250_v33, %s7098_s22  ;;  %v6588_v48 = vpack.i.bf16 %v7250_v33, %v7262_v36 }
  0xad   : > { %613 = vrot.lane.b32.xlu0 %v7237_v30, %s7100_s24 }
  0xb1   : > { %v533_v34 = vpop.f32.mrf.mxu0 }
  0xb2   : > { %v7259_v35 = vadd.f32 %v7227_v26, %v533_v34 }
  0xb4   : > { %617 = vrot.lane.b32.xlu1 %v7250_v33, %s7100_s24  ;;  %587 = vrot.lane.b32.xlu2 %v7259_v35, %s7098_s22 }
  0xb5   : > { %728 = vrot.lane.b32.xlu0 %v7262_v36, %s7097_s21 }
  0xb9   : > { %v535_v37 = vpop.f32.mrf.mxu0 }
  0xba   : > { %v7277_v39 = vadd.f32 %v7227_v26, %v535_v37 }
  0xbc   : > { %619 = vrot.lane.b32.xlu1 %v7259_v35, %s7100_s24  ;;  %780 = vrot.lane.b32.xlu2 %v7259_v35, %s7097_s21 }
  0xbd   : > { %583 = vrot.lane.b32.xlu0 %v7262_v36, %s7098_s22 }
  0xc1   : > { %v538_v38 = vpop.f32.mrf.mxu0 }
  0xc2   : > { %v7280_v40 = vadd.f32 %v7227_v26, %v538_v38 }
  0xc4   : > { %806 = vrot.lane.b32.xlu1 %v7277_v39, %s7097_s21  ;;  %832 = vrot.lane.b32.xlu2 %v7280_v40, %s7097_s21  ;;  %v6593_v50 = vpack.i.bf16 %v7280_v40, %v7237_v30 }
  0xc5   : > { %615 = vrot.lane.b32.xlu0 %v7262_v36, %s7100_s24 }
  0xc9   : > { %v540_v41 = vpop.f32.mrf.mxu0 }
  0xca   : > { %v7289_v42 = vadd.f32 %v7227_v26, %v540_v41 }
  0xcc   : > { %653 = vrot.lane.b32.xlu1 %v7277_v39, %s7099_s23  ;;  %v6598_v43 = vpack.i.bf16 %v7289_v42, %v7230_v28 }
  0xcd   : > { %647 = vrot.lane.b32.xlu0 %v7262_v36, %s7099_s23 }
  0xce   : > { %6599 = vrot.lane.b32.xlu2 %v6598_v43, %s7101_s26 }
  0xd1   : > { %v543_v44 = vpop.f32.mrf.mxu0 }
  0xd2   : > { %v7299_v45 = vadd.f32 %v7227_v26, %v543_v44 }
  0xd4   : > { %10038 = vst [vmem:[#allocation3_spill] sm:$0xff] %v7299_v45  ;;  %623 = vrot.lane.b32.xlu1 %v7280_v40, %s7100_s24 }
  0xd5   : > { %649 = vrot.lane.b32.xlu0 %v7250_v33, %s7099_s23 }
  0xd6   : > { %884 = vrot.lane.b32.xlu2 %v7299_v45, %s7097_s21 }
  0xd9   : > { %v545_v46 = vpop.f32.mrf.mxu0 }
  0xda   : > { %v7308_v47 = vadd.f32 %v7227_v26, %v545_v46 }
  0xdc   : > { %655 = vrot.lane.b32.xlu1 %v7280_v40, %s7099_s23 }
  0xdd   : > { %6589 = vrot.lane.b32.xlu0 %v6588_v48, %s7101_s26 }
  0xde   : > { %629 = vrot.lane.b32.xlu2 %v7308_v47, %s7100_s24 }
  0xe1   : > { %v548_v49 = vpop.f32.mrf.mxu0 }
  0xe2   : > { %v7320_v51 = vadd.f32 %v7227_v26, %v548_v49 }
  0xe4   : > { %6594 = vrot.lane.b32.xlu1 %v6593_v50, %s7101_s26  ;;  %v6603_v9 = vpack.i.bf16 %v7320_v51, %v7277_v39 }
  0xe5   : > { %651 = vrot.lane.b32.xlu0 %v7259_v35, %s7099_s23 }
  0xe6   : > { %663 = vrot.lane.b32.xlu2 %v7320_v51, %s7099_s23 }
  0xe9   : > { %v550_v52 = vpop.f32.mrf.mxu0 }
  0xea   : > { %v7328_v53 = vadd.f32 %v7227_v26, %v550_v52 }
  0xec   : > { %858 = vrot.lane.b32.xlu1 %v7289_v42, %s7097_s21 }
  0xed   : > { %589 = vrot.lane.b32.xlu0 %v7277_v39, %s7098_s22 }
  0xee   : > { %962 = vrot.lane.b32.xlu2 %v7328_v53, %s7097_s21  ;;  %v676_v54 = vpop.permute.xlu2 %675 }
  0xef   : > { %6303 = vmatpush.xpose.msk.msrb.mxu0 %vm677_vm1, %v676_v54 }
  0xf1   : > { %v553_v57 = vpop.f32.mrf.mxu0 }
  0xf2   : > { %6304 = vmatmul.msk.f32.vlgmr.msrb.gmra.mxu0 %vm677_vm1, %v7230_v28  ;;  %v7356_v58 = vadd.f32 %v7227_v26, %v553_v57 }
  0xf4   : > { %593 = vrot.lane.b32.xlu1 %v7289_v42, %s7098_s22  ;;  %10041 = vst [vmem:[#allocation6_spill] sm:$0xff] %v7356_v58 }
  0xf5   : > { %621 = vrot.lane.b32.xlu0 %v7277_v39, %s7100_s24 }
  0xf6   : > { %601 = vrot.lane.b32.xlu2 %v7328_v53, %s7098_s22  ;;  %v7345_v55 = vpop.permute.xlu2 %643 }
  0xf7   : > { %10039 = vst [vmem:[#allocation4_spill] sm:$0xff] %v7345_v55 }
  0xf9   : > { %v555_v61 = vpop.f32.mrf.mxu0 }
  0xfa   : > { %v7369_v62 = vadd.f32 %v7227_v26, %v555_v61 }
  0xfc   : > { %625 = vrot.lane.b32.xlu1 %v7289_v42, %s7100_s24  ;;  %10044 = vst [vmem:[#allocation9_spill] sm:$0xff] %v7369_v62 }
  0xfd   : > { %591 = vrot.lane.b32.xlu0 %v7280_v40, %s7098_s22 }
  0xfe   : > { %665 = vrot.lane.b32.xlu2 %v7328_v53, %s7099_s23  ;;  %v7353_v56 = vpop.permute.xlu2 %645 }
  0xff   : > { %10040 = vst [vmem:[#allocation5_spill] sm:$0xff] %v7353_v56 }
 0x101   : > { %v558_v3 = vpop.f32.mrf.mxu0 }
 0x102   : > { %v7451_v20 = vadd.f32 %v7227_v26, %v558_v3 }
 0x104   : > { %595 = vrot.lane.b32.xlu1 %v7299_v45, %s7098_s22 }
 0x105   : > { %657 = vrot.lane.b32.xlu0 %v7289_v42, %s7099_s23 }
 0x106   : > { %635 = vrot.lane.b32.xlu2 %v7356_v58, %s7100_s24  ;;  %v7364_v59 = vpop.permute.xlu2 %585  ;;  %v7366_v60 = vpop.permute.xlu0 %579 }
 0x107   : > { %10042 = vst [vmem:[#allocation7_spill] sm:$0xff] %v7364_v59 }
 0x108   : > { %10043 = vst [vmem:[#allocation8_spill] sm:$0xff] %v7366_v60 }
 0x109   : > { %v560_v8 = vpop.f32.mrf.mxu0 }
 0x10a   : > { %v7410_v10 = vadd.f32 %v7227_v26, %v560_v8 }
 0x10c   : > { %627 = vrot.lane.b32.xlu1 %v7299_v45, %s7100_s24  ;;  %10049 = vst [vmem:[#allocation14_spill] sm:$0xff] %v7410_v10 }
 0x10d   : > { %597 = vrot.lane.b32.xlu0 %v7308_v47, %s7098_s22 }
 0x10e   : > { %1014 = vrot.lane.b32.xlu2 %v7369_v62, %s7097_s21  ;;  %v7377_v63 = vpop.permute.xlu2 %587  ;;  %v7385_v1 = vpop.permute.xlu1 %581 }
 0x10f   : > { %10045 = vst [vmem:[#allocation10_spill] sm:$0xff] %v7377_v63  ;;  %v7379_v0 = vpop.permute.xlu0 %611 }
 0x110   : > { %10046 = vst [vmem:[#allocation11_spill] sm:$0xff] %v7379_v0 }
 0x111   : > { %10047 = vst [vmem:[#allocation12_spill] sm:$0xff] %v7385_v1 }
 0x114   : > { %659 = vrot.lane.b32.xlu1 %v7299_v45, %s7099_s23 }
 0x115   : > { %910 = vrot.lane.b32.xlu0 %v7308_v47, %s7097_s21 }
 0x116   : > { %605 = vrot.lane.b32.xlu2 %v7369_v62, %s7098_s22  ;;  %v781_v2 = vpop.permute.xlu2 %780 }
 0x117   : > { %v703_v4 = vpop.permute.xlu0 %702 }
 0x118   : > { %6305 = vmatpush.xpose.msk.msra.mxu0 %vm677_vm1, %v703_v4 }
 0x11b   : > { %6306 = vmatmul.msk.f32.vlgmr.msra.gmra.mxu0 %vm677_vm1, %v7237_v30 }
 0x11c   : > { %936 = vrot.lane.b32.xlu1 %v7320_v51, %s7097_s21 }
 0x11d   : > { %661 = vrot.lane.b32.xlu0 %v7308_v47, %s7099_s23 }
 0x11e   : > { %v755_v5 = vpop.permute.xlu1 %754  ;;  %637 = vrot.lane.b32.xlu2 %v7369_v62, %s7100_s24  ;;  %v833_v6 = vpop.permute.xlu2 %832 }
 0x11f   : > { %v7398_v7 = vpop.permute.xlu0 %613  ;;  %6309 = vmatpush.xpose.msk.msrb.mxu0 %vm677_vm1, %v755_v5  ;;  %6315 = vmatpush.xpose.msk.msra.mxu1 %vm677_vm1, %v833_v6 }
 0x120   : > { %10048 = vst [vmem:[#allocation13_spill] sm:$0xff] %v7398_v7 }
 0x122   : > { %6316 = vmatmul.msk.f32.vlgmr.msra.gmra.mxu1 %vm677_vm1, %v7280_v40 }
 0x123   : > { %6311 = vmatpush.xpose.msk.msra.mxu0 %vm677_vm1, %v781_v2 }
 0x124   : > { %6310 = vmatmul.msk.f32.vlgmr.msrb.gmra.mxu0 %vm677_vm1, %v7250_v33  ;;  %599 = vrot.lane.b32.xlu1 %v7320_v51, %s7098_s22 }
 0x125   : > { %6604 = vrot.lane.b32.xlu0 %v6603_v9, %s7101_s26 }
 0x126   : > { %v7415_v11 = vpop.permute.xlu1 %617  ;;  %609 = vrot.lane.b32.xlu2 %v7410_v10, %s7098_s22 }
 0x127   : > { %10050 = vst [vmem:[#allocation15_spill] sm:$0xff] %v7415_v11  ;;  %v729_v12 = vpop.permute.xlu0 %728 }
 0x128   : > { %6307 = vmatpush.xpose.msk.msra.mxu3 %vm677_vm1, %v729_v12  ;;  %v7420_v13 = vpop.permute.xlu2 %6599 }
 0x12b   : > { %6308 = vmatmul.msk.f32.vlgmr.msra.gmra.mxu3 %vm677_vm1, %v7262_v36 }
 0x12c   : > { %6312 = vmatmul.msk.f32.vlgmr.msra.gmra.mxu0 %vm677_vm1, %v7259_v35  ;;  %631 = vrot.lane.b32.xlu1 %v7320_v51, %s7100_s24 }
 0x12d   : > { %667 = vrot.lane.b32.xlu0 %v7356_v58, %s7099_s23 }
 0x12e   : > { %v7430_v14 = vpop.permute.xlu1 %619  ;;  %1066 = vrot.lane.b32.xlu2 %v7410_v10, %s7097_s21 }
 0x12f   : > { %10051 = vst [vmem:[#allocation16_spill] sm:$0xff] %v7430_v14  ;;  %v7434_v15 = vpop.permute.xlu0 %583 }
 0x130   : > { %10052 = vst [vmem:[#allocation17_spill] sm:$0xff] %v7434_v15  ;;  %v885_v16 = vpop.permute.xlu2 %884 }
 0x134   : > { %633 = vrot.lane.b32.xlu1 %v7328_v53, %s7100_s24 }
 0x135   : > { %669 = vrot.lane.b32.xlu0 %v7369_v62, %s7099_s23 }
 0x136   : > { %v807_v17 = vpop.permute.xlu1 %806  ;;  %641 = vrot.lane.b32.xlu2 %v7410_v10, %s7100_s24 }
 0x137   : > { %v7442_v18 = vpop.permute.xlu0 %615  ;;  %6313 = vmatpush.xpose.msk.msrb.mxu3 %vm677_vm1, %v807_v17 }
 0x138   : > { %v7445_v19 = vpop.permute.xlu2 %629 }
 0x139   : > { %10053 = vst [vmem:[#allocation18_spill] sm:$0xff] %v7445_v19 }
 0x13a   : > { %6314 = vmatmul.msk.f32.vlgmr.msrb.gmra.mxu3 %vm677_vm1, %v7277_v39 }
 0x13b   : > { %6319 = vmatpush.xpose.msk.msra.mxu3 %vm677_vm1, %v885_v16 }
 0x13c   : > { %603 = vrot.lane.b32.xlu1 %v7356_v58, %s7098_s22 }
 0x13d   : > { %1040 = vrot.lane.b32.xlu0 %v7451_v20, %s7097_s21 }
 0x13e   : > { %v7457_v21 = vpop.permute.xlu1 %653  ;;  %1950 = vrot.lane.b32.xlu2 %v7353_v56, %s7097_s21 }
 0x13f   : > { %10054 = vst [vmem:[#allocation19_spill] sm:$0xff] %v7457_v21  ;;  %v7461_v22 = vpop.permute.xlu0 %647 }
 0x140   : > { %10055 = vst [vmem:[#allocation20_spill] sm:$0xff] %v7461_v22  ;;  %v7463_v23 = vpop.permute.xlu2 %663 }
 0x141   : > { %10056 = vst [vmem:[#allocation21_spill] sm:$0xff] %v7463_v23 }
 0x142   : > { %6320 = vmatmul.msk.f32.vlgmr.msra.gmra.mxu3 %vm677_vm1, %v7299_v45 }
 0x144   : > { %988 = vrot.lane.b32.xlu1 %v7356_v58, %s7097_s21 }
 0x145   : > { %607 = vrot.lane.b32.xlu0 %v7451_v20, %s7098_s22 }
 0x146   : > { %v7471_v24 = vpop.permute.xlu1 %623  ;;  %1144 = vrot.lane.b32.xlu2 %v7434_v15, %s7097_s21 }
 0x147   : > { %10057 = vst [vmem:[#allocation22_spill] sm:$0xff] %v7471_v24  ;;  %v7475_v25 = vpop.permute.xlu0 %649 }
 0x148   : > { %10058 = vst [vmem:[#allocation23_spill] sm:$0xff] %v7475_v25  ;;  %v963_v26 = vpop.permute.xlu2 %962 }
 0x149   : > { %6325 = vmatpush.xpose.msk.msrb.mxu3 %vm677_vm1, %v963_v26 }
 0x14c   : > { %639 = vrot.lane.b32.xlu1 %v7451_v20, %s7100_s24  ;;  %6326 = vmatmul.msk.f32.vlgmr.msrb.gmra.mxu3 %vm677_vm1, %v7328_v53 }
 0x14d   : > { %1092 = vrot.lane.b32.xlu0 %v7366_v60, %s7097_s21 }
 0x14e   : > { %v7484_v27 = vpop.permute.xlu1 %655  ;;  %1976 = vrot.lane.b32.xlu2 %v7461_v22, %s7097_s21 }
 0x14f   : > { %10059 = vst [vmem:[#allocation24_spill] sm:$0xff] %v7484_v27  ;;  %v7488_v28 = vpop.permute.xlu0 %6589 }
 0x150   : > { %v7490_v29 = vpop.permute.xlu2 %601 }
 0x154   : > { %671 = vrot.lane.b32.xlu1 %v7451_v20, %s7099_s23 }
 0x155   : > { %1508 = vrot.lane.b32.xlu0 %v7379_v0, %s7097_s21 }
 0x156   : > { %v7496_v30 = vpop.permute.xlu1 %6594  ;;  %1586 = vrot.lane.b32.xlu2 %v7415_v11, %s7097_s21 }
 0x157   : > { %10060 = vst [vmem:[#allocation25_spill] sm:$0xff] %v7496_v30  ;;  %v7500_v31 = vpop.permute.xlu0 %651 }
 0x158   : > { %10061 = vst [vmem:[#allocation26_spill] sm:$0xff] %v7500_v31  ;;  %v7502_v32 = vpop.permute.xlu2 %665 }
 0x159   : > { %10062 = vst [vmem:[#allocation27_spill] sm:$0xff] %v7502_v32 }
 0x15c   : > { %673 = vrot.lane.b32.xlu1 %v7410_v10, %s7099_s23 }
 0x15d   : > { %1924 = vrot.lane.b32.xlu0 %v7345_v55, %s7097_s21 }
 0x15e   : > { %v859_v33 = vpop.permute.xlu1 %858  ;;  %1196 = vrot.lane.b32.xlu2 %v7377_v63, %s7097_s21 }
 0x15f   : > { %v7510_v34 = vpop.permute.xlu0 %589  ;;  %6317 = vmatpush.xpose.msk.msra.mxu2 %vm677_vm1, %v859_v33 }
 0x160   : > { %10063 = vst [vmem:[#allocation28_spill] sm:$0xff] %v7510_v34  ;;  %v7513_v36 = vpop.permute.xlu2 %635 }
 0x161   : > { %10064 = vst [vmem:[#allocation29_spill] sm:$0xff] %v7513_v36 }
 0x162   : > { %6318 = vmatmul.msk.f32.vlgmr.msra.gmra.mxu2 %vm677_vm1, %v7289_v42 }
 0x164   : > { %1118 = vrot.lane.b32.xlu1 %v7385_v1, %s7097_s21 }
 0x165   : > { %2028 = vrot.lane.b32.xlu0 %v7500_v31, %s7097_s21 }
 0x166   : > { %v7521_v37 = vpop.permute.xlu1 %593  ;;  %2054 = vrot.lane.b32.xlu2 %v7457_v21, %s7097_s21 }
 0x167   : > { %10065 = vst [vmem:[#allocation30_spill] sm:$0xff] %v7521_v37  ;;  %v7525_v38 = vpop.permute.xlu0 %621 }
 0x168   : > { %10066 = vst [vmem:[#allocation31_spill] sm:$0xff] %v7525_v38  ;;  %v1015_v39 = vpop.permute.xlu2 %1014 }
 0x16c   : > { %1534 = vrot.lane.b32.xlu1 %v7398_v7, %s7097_s21 }
 0x16d   : > { %1222 = vrot.lane.b32.xlu0 %v7510_v34, %s7097_s21 }
 0x16e   : > { %v7531_v40 = vpop.permute.xlu1 %625  ;;  %1274 = vrot.lane.b32.xlu2 %v7521_v37, %s7097_s21 }
 0x16f   : > { %10067 = vst [vmem:[#allocation32_spill] sm:$0xff] %v7531_v40  ;;  %v7535_v41 = vpop.permute.xlu0 %591 }
 0x170   : > { %10068 = vst [vmem:[#allocation33_spill] sm:$0xff] %v7535_v41  ;;  %v7537_v42 = vpop.permute.xlu2 %605 }
 0x174   : > { %1560 = vrot.lane.b32.xlu1 %v7442_v18, %s7097_s21 }
 0x175   : > { %1638 = vrot.lane.b32.xlu0 %v7525_v38, %s7097_s21 }
 0x176   : > { %v7543_v43 = vpop.permute.xlu1 %595 }
 0x177   : > { %10069 = vst [vmem:[#allocation34_spill] sm:$0xff] %v7543_v43  ;;  %v7545_v44 = vpop.permute.xlu0 %657 }
 0x178   : > { %10070 = vst [vmem:[#allocation35_spill] sm:$0xff] %v7545_v44  ;;  %v7547_v46 = vpop.permute.xlu2 %637 }
 0x179   : > { %10071 = vst [vmem:[#allocation36_spill] sm:$0xff] %v7547_v46 }
 0x17c   : > { %1170 = vrot.lane.b32.xlu1 %v7364_v59, %s7097_s21 }
 0x17d   : > { %1690 = vrot.lane.b32.xlu0 %v7531_v40, %s7097_s21 }
 0x17e   : > { %v7553_v48 = vpop.permute.xlu1 %627 }
 0x17f   : > { %10072 = vst [vmem:[#allocation37_spill] sm:$0xff] %v7553_v48  ;;  %v7555_v49 = vpop.permute.xlu0 %597  ;;  %1716 = vrot.lane.b32.xlu2 %v7553_v48, %s7097_s21 }
 0x180   : > { %10073 = vst [vmem:[#allocation38_spill] sm:$0xff] %v7555_v49  ;;  %v7559_v50 = vpop.permute.xlu2 %609 }
 0x184   : > { %2002 = vrot.lane.b32.xlu1 %v7475_v25, %s7097_s21 }
 0x185   : > { %1300 = vrot.lane.b32.xlu0 %v7543_v43, %s7097_s21 }
 0x186   : > { %v7565_v52 = vpop.permute.xlu1 %659 }
 0x187   : > { %10074 = vst [vmem:[#allocation39_spill] sm:$0xff] %v7565_v52  ;;  %v911_v54 = vpop.permute.xlu0 %910  ;;  %2132 = vrot.lane.b32.xlu2 %v7565_v52, %s7097_s21  ;;  %v699_v52 = vpop.f32.mrf.mxu0 }
 0x188   : > { %6321 = vmatpush.xpose.msk.msrb.mxu1 %vm677_vm1, %v911_v54  ;;  %v1067_v57 = vpop.permute.xlu2 %1066 }
 0x18b   : > { %6322 = vmatmul.msk.f32.vlgmr.msrb.gmra.mxu1 %vm677_vm1, %v7308_v47 }
 0x18c   : > { %1612 = vrot.lane.b32.xlu1 %v7430_v14, %s7097_s21 }
 0x18d   : > { %1742 = vrot.lane.b32.xlu0 %v7445_v19, %s7097_s21 }
 0x18e   : > { %v937_v61 = vpop.permute.xlu1 %936 }
 0x18f   : > { %v7576_v2 = vpop.permute.xlu0 %661  ;;  %6323 = vmatpush.xpose.msk.msrb.mxu2 %vm677_vm1, %v937_v61  ;;  %1326 = vrot.lane.b32.xlu2 %v7555_v49, %s7097_s21 }
 0x190   : > { %10075 = vst [vmem:[#allocation40_spill] sm:$0xff] %v7576_v2  ;;  %v7582_v3 = vpop.permute.xlu2 %641 }
 0x191   : > { %10076 = vst [vmem:[#allocation41_spill] sm:$0xff] %v7582_v3 }
 0x192   : > { %6324 = vmatmul.msk.f32.vlgmr.msrb.gmra.mxu2 %vm677_vm1, %v7320_v51 }
 0x193   : > { %6329 = vmatpush.xpose.msk.msra.mxu2 %vm677_vm1, %v1015_v39 }
 0x194   : > { %1248 = vrot.lane.b32.xlu1 %v7535_v41, %s7097_s21 }
 0x196   : > { %v7588_v4 = vpop.permute.xlu1 %599 }
 0x197   : > { %10077 = vst [vmem:[#allocation42_spill] sm:$0xff] %v7588_v4  ;;  %v7590_v5 = vpop.permute.xlu0 %6604  ;;  %1352 = vrot.lane.b32.xlu0 %v7588_v4, %s7097_s21  ;;  %2158 = vrot.lane.b32.xlu2 %v7576_v2, %s7097_s21 }
 0x198   : > { %10078 = vst [vmem:[#allocation43_spill] sm:$0xff] %v7590_v5  ;;  %v7596_v6 = vpop.permute.xlu2 %1950  ;;  %v725_v5 = vpop.f32.mrf.mxu0 }
 0x199   : > { %v7716_v30 = vmul.f32 0.35355338, %v725_v5 }
 0x19a   : > { %6330 = vmatmul.msk.f32.vlgmr.msra.gmra.mxu2 %vm677_vm1, %v7369_v62 }
 0x19b   : > { %v2407_v5 = vsel %vm677_vm1, %v7716_v30, -inf }
 0x19c   : > { %1664 = vrot.lane.b32.xlu1 %v7471_v24, %s7097_s21 }
 0x19e   : > { %v7602_v51 = vpop.permute.xlu1 %631 }
 0x19f   : > { %10079 = vst [vmem:[#allocation44_spill] sm:$0xff] %v7602_v51  ;;  %v7604_v8 = vpop.permute.xlu0 %667  ;;  %2184 = vrot.lane.b32.xlu0 %v7463_v23, %s7097_s21  ;;  %2210 = vrot.lane.b32.xlu2 %v7502_v32, %s7097_s21 }
 0x1a0   : > { %10080 = vst [vmem:[#allocation45_spill] sm:$0xff] %v7604_v8  ;;  %v1145_v9 = vpop.permute.xlu2 %1144 }
 0x1a4   : > { %2080 = vrot.lane.b32.xlu1 %v7484_v27, %s7097_s21 }
 0x1a6   : > { %v7612_v12 = vpop.permute.xlu1 %633 }
 0x1a7   : > { %10081 = vst [vmem:[#allocation46_spill] sm:$0xff] %v7612_v12  ;;  %v7614_v16 = vpop.permute.xlu0 %669  ;;  %1378 = vrot.lane.b32.xlu0 %v7490_v29, %s7097_s21 }
 0x1a8   : > { %10082 = vst [vmem:[#allocation47_spill] sm:$0xff] %v7614_v16  ;;  %v7618_v17 = vpop.permute.xlu2 %1976 }
 0x1ac   : > { %2106 = vrot.lane.b32.xlu1 %v7545_v44, %s7097_s21 }
 0x1ae   : > { %v7622_v26 = vpop.permute.xlu1 %603  ;;  %v751_v23 = vpop.f32.mrf.mxu3 }
 0x1af   : > { %10083 = vst [vmem:[#allocation48_spill] sm:$0xff] %v7622_v26  ;;  %v1041_v33 = vpop.permute.xlu0 %1040  ;;  %1430 = vrot.lane.b32.xlu0 %v7537_v42, %s7097_s21  ;;  %1404 = vrot.lane.b32.xlu2 %v7622_v26, %s7097_s21 }
 0x1b0   : > { %6331 = vmatpush.xpose.msk.msra.mxu3 %vm677_vm1, %v1041_v33  ;;  %v7629_v39 = vpop.permute.xlu2 %1586 }
 0x1b3   : > { %6332 = vmatmul.msk.f32.vlgmr.msra.gmra.mxu3 %vm677_vm1, %v7451_v20 }
 0x1b4   : > { %1768 = vrot.lane.b32.xlu1 %v7602_v51, %s7097_s21 }
 0x1b6   : > { %v989_v54 = vpop.permute.xlu1 %988 }
 0x1b7   : > { %v7635_v61 = vpop.permute.xlu0 %607  ;;  %6327 = vmatpush.xpose.msk.msra.mxu1 %vm677_vm1, %v989_v54  ;;  %1820 = vrot.lane.b32.xlu2 %v7513_v36, %s7097_s21 }
 0x1b8   : > { %2262 = vrot.lane.b32.xlu0 %v7614_v16, %s7097_s21  ;;  %v1197_v33 = vpop.permute.xlu2 %1196 }
 0x1ba   : > { %6328 = vmatmul.msk.f32.vlgmr.msra.gmra.mxu1 %vm677_vm1, %v7356_v58 }
 0x1bb   : > { %6333 = vmatpush.xpose.msk.msrb.mxu1 %vm677_vm1, %v1067_v57 }
 0x1bc   : > { %1794 = vrot.lane.b32.xlu1 %v7612_v12, %s7097_s21 }
 0x1be   : > { %v7648_v62 = vpop.permute.xlu1 %639 }
 0x1bf   : > { %6339 = vmatpush.xpose.msk.msra.mxu1 %vm677_vm1, %v1145_v9  ;;  %10084 = vst [vmem:[#allocation49_spill] sm:$0xff] %v7648_v62  ;;  %v1093_v54 = vpop.permute.xlu0 %1092  ;;  %1872 = vrot.lane.b32.xlu2 %v7648_v62, %s7097_s21 }
 0x1c0   : > { %1456 = vrot.lane.b32.xlu0 %v7635_v61, %s7097_s21  ;;  %6335 = vmatpush.xpose.msk.msrb.mxu2 %vm677_vm1, %v1093_v54  ;;  %v7663_v9 = vpop.permute.xlu2 %2054 }
 0x1c2   : > { %6334 = vmatmul.msk.f32.vlgmr.msrb.gmra.mxu1 %vm677_vm1, %v7410_v10 }
 0x1c3   : > { %6336 = vmatmul.msk.f32.vlgmr.msrb.gmra.mxu2 %vm677_vm1, %v7366_v60 }
 0x1c4   : > { %2236 = vrot.lane.b32.xlu1 %v7604_v8, %s7097_s21 }
 0x1c6   : > { %v7661_v57 = vpop.permute.xlu1 %671 }
 0x1c7   : > { %10085 = vst [vmem:[#allocation50_spill] sm:$0xff] %v7661_v57  ;;  %v7665_v58 = vpop.permute.xlu0 %1508  ;;  %2288 = vrot.lane.b32.xlu2 %v7661_v57, %s7097_s21 }
 0x1c8   : > { %1898 = vrot.lane.b32.xlu0 %v7582_v3, %s7097_s21  ;;  %v1275_v10 = vpop.permute.xlu2 %1274 }
 0x1ca   : > { %6340 = vmatmul.msk.f32.vlgmr.msra.gmra.mxu1 %vm677_vm1, %v7434_v15 }
 0x1cc   : > { %1846 = vrot.lane.b32.xlu1 %v7547_v46, %s7097_s21 }
 0x1ce   : > { %v7675_v54 = vpop.permute.xlu1 %673 }
 0x1cf   : > { %10086 = vst [vmem:[#allocation51_spill] sm:$0xff] %v7675_v54  ;;  %v7677_v60 = vpop.permute.xlu0 %1924  ;;  %1482 = vrot.lane.b32.xlu2 %v7559_v50, %s7097_s21 }
 0x1d0   : > { %2314 = vrot.lane.b32.xlu0 %v7675_v54, %s7097_s21 }
 0x1d6   : > { %v1119_v45 = vpop.permute.xlu1 %1118 }
 0x1d7   : > { %v7683_v8 = vpop.permute.xlu0 %2028  ;;  %6337 = vmatpush.xpose.msk.msrb.mxu3 %vm677_vm1, %v1119_v45 }
 0x1d9   : > { %v7687_v15 = vpop.permute.xlu2 %1716 }
 0x1da   : > { %6338 = vmatmul.msk.f32.vlgmr.msrb.gmra.mxu3 %vm677_vm1, %v7385_v1 }
 0x1db   : > { %6343 = vmatpush.xpose.msk.msra.mxu3 %vm677_vm1, %v1197_v33 }
 0x1de   : > { %v7692_v57 = vpop.permute.xlu1 %1534 }
 0x1df   : > { %6349 = vmatpush.xpose.msk.msrb.mxu3 %vm677_vm1, %v1275_v10  ;;  %v1223_v16 = vpop.permute.xlu0 %1222  ;;  %v777_v10 = vpop.f32.mrf.mxu0 }
 0x1e0   : > { %6345 = vmatpush.xpose.msk.msrb.mxu1 %vm677_vm1, %v1223_v16 }
 0x1e1   : > { %v7697_v45 = vpop.permute.xlu2 %2132 }
 0x1e2   : > { %6344 = vmatmul.msk.f32.vlgmr.msra.gmra.mxu3 %vm677_vm1, %v7377_v63  ;;  %10087 = vst [vmem:[#allocation52_spill] sm:$0xff] %v7697_v45  ;;  %v7710_v63 = vmul.f32 0.35355338, %v751_v23 }
 0x1e3   : > { %6346 = vmatmul.msk.f32.vlgmr.msrb.gmra.mxu1 %vm677_vm1, %v7510_v34  ;;  %v7714_v34 = vmul.f32 0.35355338, %v699_v52 }
 0x1e4   : > { %10088 = vst [vmem:[#allocation53_spill] sm:$0xff] %v7710_v63 }
 0x1e5   : > { %v2404_v23 = vsel %vm677_vm1, %v7714_v34, -inf }
 0x1e6   : > { %v7701_v33 = vpop.permute.xlu1 %1560 }
 0x1e7   : > { %v7703_v31 = vpop.permute.xlu0 %1638  ;;  %v803_v45 = vpop.f32.mrf.mxu0 }
 0x1e8   : > { %v7726_v52 = vmul.f32 0.35355338, %v803_v45 }
 0x1e9   : > { %v1327_v1 = vpop.permute.xlu2 %1326 }
 0x1ea   : > { %6350 = vmatmul.msk.f32.vlgmr.msrb.gmra.mxu3 %vm677_vm1, %v7521_v37  ;;  %v2410_v37 = vsel %vm677_vm1, %v7710_v63, -inf  ;;  %10089 = vst [vmem:[#allocation54_spill] sm:$0xff] %v7726_v52 }
 0x1ee   : > { %v1171_v16 = vpop.permute.xlu1 %1170 }
 0x1ef   : > { %v7707_v2 = vpop.permute.xlu0 %1690  ;;  %6341 = vmatpush.xpose.msk.msra.mxu2 %vm677_vm1, %v1171_v16  ;;  %v829_v16 = vpop.f32.mrf.mxu3 }
 0x1f1   : > { %v7720_v27 = vpop.permute.xlu2 %2158 }
 0x1f2   : > { %6342 = vmatmul.msk.f32.vlgmr.msra.gmra.mxu2 %vm677_vm1, %v7364_v59 }
 0x1f6   : > { %v2003_v55 = vpop.permute.xlu1 %2002  ;;  %2411 = vmax.xlane.f32.xlu1 %v2410_v37  ;;  %v7732_v37 = vmul.f32 0.35355338, %v777_v10 }
 0x1f7   : > { %v1301_v21 = vpop.permute.xlu0 %1300  ;;  %6405 = vmatpush.xpose.msk.msrb.mxu0 %vm677_vm1, %v2003_v55  ;;  %v7736_v55 = vmul.f32 0.35355338, %v829_v16 }
 0x1f8   : > { %6351 = vmatpush.xpose.msk.msra.mxu1 %vm677_vm1, %v1301_v21  ;;  %2405 = vmax.xlane.f32.xlu2 %v2404_v23  ;;  %v2416_v21 = vsel %vm677_vm1, %v7726_v52, -inf  ;;  %v2413_v23 = vsel %vm677_vm1, %v7732_v37, -inf }
 0x1f9   : > { %10090 = vst [vmem:[#allocation55_spill] sm:$0xff] %v7736_v55  ;;  %v2419_v10 = vsel %vm677_vm1, %v7736_v55, -inf }
 0x1fa   : > { %2408 = vmax.xlane.f32.xlu0 %v2407_v5  ;;  %6406 = vmatmul.msk.f32.vlgmr.msrb.gmra.mxu0 %vm677_vm1, %v7475_v25  ;;  %v2211_v5 = vpop.permute.xlu2 %2210  ;;  %v881_v25 = vpop.f32.mrf.mxu2 }
 0x1fb   : > { %6352 = vmatmul.msk.f32.vlgmr.msra.gmra.mxu1 %vm677_vm1, %v7543_v43  ;;  %v7748_v16 = vmul.f32 0.35355338, %v881_v25 }
 0x1fd   : > { %10091 = vst [vmem:[#allocation56_spill] sm:$0xff] %v7748_v16  ;;  %v2425_v52 = vsel %vm677_vm1, %v7748_v16, -inf }
 0x1fe   : > { %v7740_v45 = vpop.permute.xlu1 %1612  ;;  %2417 = vmax.xlane.f32.xlu1 %v2416_v21 }
 0x1ff   : > { %v7744_v59 = vpop.permute.xlu0 %1742 }
 0x200   : > { %2414 = vmax.xlane.f32.xlu2 %v2413_v23 }
 0x202   : > { %2420 = vmax.xlane.f32.xlu0 %v2419_v10 }
 0x206   : > { %v1249_v43 = vpop.permute.xlu1 %1248 }
 0x207   : > { %6347 = vmatpush.xpose.msk.msrb.mxu2 %vm677_vm1, %v1249_v43  ;;  %v907_v43 = vpop.f32.mrf.mxu3 }
 0x209   : > { %v1405_v21 = vpop.permute.xlu2 %1404  ;;  %v1353_v23 = vpop.permute.xlu0 %1352 }
 0x20a   : > { %2426 = vmax.xlane.f32.xlu0 %v2425_v52  ;;  %6348 = vmatmul.msk.f32.vlgmr.msrb.gmra.mxu2 %vm677_vm1, %v7535_v41  ;;  %v6608_v41 = vpack.i.bf16 %v7328_v53, %v7259_v35 }
 0x20b   : > { %6353 = vmatpush.xpose.msk.msra.mxu2 %vm677_vm1, %v1327_v1  ;;  %6355 = vmatpush.xpose.msk.msra.mxu3 %vm677_vm1, %v1353_v23 }
 0x20e   : > { %6356 = vmatmul.msk.f32.vlgmr.msra.gmra.mxu3 %vm677_vm1, %v7588_v4  ;;  %v1665_v25 = vpop.permute.xlu1 %1664 }
 0x20f   : > { %6359 = vmatpush.xpose.msk.msrb.mxu2 %vm677_vm1, %v1405_v21  ;;  %v6613_v21 = vpack.i.bf16 %v7451_v20, %v7308_v47  ;;  %v985_v4 = vpop.f32.mrf.mxu3 }
 0x210   : > { %v7783_v35 = vmul.f32 0.35355338, %v985_v4  ;;  %v855_v4 = vpop.f32.mrf.mxu1 }
 0x211   : > { %v7760_v10 = vpop.permute.xlu2 %1820  ;;  %v7762_v1 = vpop.permute.xlu0 %2184 }
 0x212   : > { %6354 = vmatmul.msk.f32.vlgmr.msra.gmra.mxu2 %vm677_vm1, %v7555_v49  ;;  %v2437_v53 = vsel %vm677_vm1, %v7783_v35, -inf }
 0x215   : > { %v959_v52 = vpop.f32.mrf.mxu2 }
 0x216   : > { %v7768_v63 = vmul.f32 0.35355338, %v959_v52  ;;  %v7770_v23 = vpop.permute.xlu1 %2080 }
 0x217   : > { %6609 = vrot.lane.b32.xlu1 %v6608_v41, %s7101_s26 }
 0x218   : > { %6614 = vrot.lane.b32.xlu2 %v6613_v21, %s7101_s26  ;;  %v2434_v16 = vsel %vm677_vm1, %v7768_v63, -inf }
 0x219   : > { %v7778_v49 = vpop.permute.xlu2 %1872  ;;  %2435 = vmax.xlane.f32.xlu0 %v2434_v16  ;;  %v1379_v55 = vpop.permute.xlu0 %1378 }
 0x21a   : > { %6357 = vmatpush.xpose.msk.msrb.mxu1 %vm677_vm1, %v1379_v55  ;;  %6360 = vmatmul.msk.f32.vlgmr.msrb.gmra.mxu2 %vm677_vm1, %v7622_v26 }
 0x21d   : > { %6358 = vmatmul.msk.f32.vlgmr.msrb.gmra.mxu1 %vm677_vm1, %v7490_v29 }
 0x21e   : > { %v2107_v47 = vpop.permute.xlu1 %2106 }
 0x21f   : > { %6413 = vmatpush.xpose.msk.msra.mxu0 %vm677_vm1, %v2107_v47  ;;  %v7835_v47 = vmul.f32 0.35355338, %v855_v4 }
 0x221   : > { %v7791_v20 = vpop.permute.xlu2 %2288  ;;  %2438 = vmax.xlane.f32.xlu0 %v2437_v53  ;;  %v1431_v41 = vpop.permute.xlu0 %1430  ;;  %v7837_v53 = vmul.f32 0.35355338, %v907_v43 }
 0x222   : > { %6361 = vmatpush.xpose.msk.msrb.mxu3 %vm677_vm1, %v1431_v41  ;;  %6414 = vmatmul.msk.f32.vlgmr.msra.gmra.mxu0 %vm677_vm1, %v7545_v44  ;;  %v6592_v41 = vunpack.i.h.bf16 %v7488_v28 }
 0x223   : > { %6421 = vmatpush.xpose.msk.msrb.mxu0 %vm677_vm1, %v2211_v5  ;;  %v2428_v43 = vsel %vm677_vm1, %v7837_v53, -inf }
 0x225   : > { %6362 = vmatmul.msk.f32.vlgmr.msrb.gmra.mxu3 %vm677_vm1, %v7537_v42 }
 0x226   : > { %6367 = vmatpush.xpose.msk.msra.mxu3 %vm677_vm1, %v7665_v58  ;;  %v933_v58 = vpop.f32.mrf.mxu1 }
 0x229   : > { %v1483_v55 = vpop.permute.xlu2 %1482 }
 0x22a   : > { %6373 = vmatpush.xpose.msk.msrb.mxu3 %vm677_vm1, %v7629_v39  ;;  %v7802_v5 = vpop.permute.xlu0 %2262  ;;  %6365 = vmatpush.xpose.msk.msra.mxu2 %vm677_vm1, %v1483_v55  ;;  %v1769_v39 = vpop.permute.xlu1 %1768 }
 0x22b   : > { %6422 = vmatmul.msk.f32.vlgmr.msrb.gmra.mxu0 %vm677_vm1, %v7502_v32  ;;  %v10104_v32 = vld [vmem:[#allocation39_spill] sm:$0xff] }
 0x22d   : > { %6366 = vmatmul.msk.f32.vlgmr.msra.gmra.mxu2 %vm677_vm1, %v7559_v50  ;;  %6368 = vmatmul.msk.f32.vlgmr.msra.gmra.mxu3 %vm677_vm1, %v7379_v0 }
 0x22e   : > { %6371 = vmatpush.xpose.msk.msrb.mxu2 %vm677_vm1, %v7701_v33  ;;  %6379 = vmatpush.xpose.msk.msra.mxu3 %vm677_vm1, %v1665_v25 }
 0x232   : > { %6377 = vmatpush.xpose.msk.msra.mxu2 %vm677_vm1, %v7703_v31  ;;  %v1457_v16 = vpop.permute.xlu0 %1456  ;;  %v1795_v52 = vpop.permute.xlu1 %1794 }
 0x233   : > { %6363 = vmatpush.xpose.msk.msra.mxu1 %vm677_vm1, %v1457_v16 }
 0x235   : > { %6372 = vmatmul.msk.f32.vlgmr.msrb.gmra.mxu2 %vm677_vm1, %v7442_v18  ;;  %6374 = vmatmul.msk.f32.vlgmr.msrb.gmra.mxu3 %vm677_vm1, %v7415_v11 }
 0x236   : > { %v1063_v33 = vpop.f32.mrf.mxu3  ;;  %6364 = vmatmul.msk.f32.vlgmr.msra.gmra.mxu1 %vm677_vm1, %v7635_v61  ;;  %6383 = vmatpush.xpose.msk.msrb.mxu2 %vm677_vm1, %v7687_v15 }
 0x237   : > { %6369 = vmatpush.xpose.msk.msrb.mxu1 %vm677_vm1, %v7692_v57  ;;  %v7827_v31 = vmul.f32 0.35355338, %v1063_v33  ;;  %6385 = vmatpush.xpose.msk.msrb.mxu3 %vm677_vm1, %v7744_v59  ;;  %v1011_v57 = vpop.f32.mrf.mxu1 }
 0x238   : > { %v7864_v16 = vmul.f32 0.35355338, %v1011_v57 }
 0x239   : > { %v2446_v25 = vsel %vm677_vm1, %v7827_v31, -inf }
 0x23a   : > { %2447 = vmax.xlane.f32.xlu0 %v2446_v25  ;;  %v1899_v21 = vpop.permute.xlu0 %1898  ;;  %v7862_v55 = vpop.permute.xlu1 %2236  ;;  %v2440_v57 = vsel %vm677_vm1, %v7864_v16, -inf }
 0x23b   : > { %6375 = vmatpush.xpose.msk.msra.mxu1 %vm677_vm1, %v7740_v45  ;;  %v2422_v45 = vsel %vm677_vm1, %v7835_v47, -inf  ;;  %v1037_v25 = vpop.f32.mrf.mxu2 }
 0x23d   : > { %6378 = vmatmul.msk.f32.vlgmr.msra.gmra.mxu2 %vm677_vm1, %v7525_v38  ;;  %6380 = vmatmul.msk.f32.vlgmr.msra.gmra.mxu3 %vm677_vm1, %v7471_v24 }
 0x23e   : > { %6370 = vmatmul.msk.f32.vlgmr.msrb.gmra.mxu1 %vm677_vm1, %v7398_v7  ;;  %6389 = vmatpush.xpose.msk.msra.mxu2 %vm677_vm1, %v1795_v52 }
 0x23f   : > { %6381 = vmatpush.xpose.msk.msrb.mxu1 %vm677_vm1, %v7707_v2  ;;  %6391 = vmatpush.xpose.msk.msra.mxu3 %vm677_vm1, %v7760_v10  ;;  %v1089_v59 = vpop.f32.mrf.mxu1  ;;  %v7860_v10 = vmul.f32 0.35355338, %v933_v58  ;;  %v6602_v58 = vunpack.i.h.bf16 %v7420_v13 }
 0x240   : > { %v7850_v15 = vmul.f32 0.35355338, %v1089_v59 }
 0x241   : > { %2423 = vmax.xlane.f32.xlu2 %v2422_v45  ;;  %2429 = vmax.xlane.f32.xlu1 %v2428_v43  ;;  %v2431_v33 = vsel %vm677_vm1, %v7860_v10, -inf  ;;  %v10092_v43 = vld [vmem:[#allocation19_spill] sm:$0xff] }
 0x242   : > { %v2315_v4 = vpop.permute.xlu0 %2314  ;;  %v2449_v2 = vsel %vm677_vm1, %v7850_v15, -inf }
 0x243   : > { %6429 = vmatpush.xpose.msk.msra.mxu0 %vm677_vm1, %v2315_v4  ;;  %2450 = vmax.xlane.f32.xlu0 %v2449_v2 }
 0x245   : > { %6384 = vmatmul.msk.f32.vlgmr.msrb.gmra.mxu2 %vm677_vm1, %v7553_v48  ;;  %6386 = vmatmul.msk.f32.vlgmr.msrb.gmra.mxu3 %vm677_vm1, %v7445_v19 }
 0x246   : > { %6376 = vmatmul.msk.f32.vlgmr.msra.gmra.mxu1 %vm677_vm1, %v7430_v14  ;;  %6395 = vmatpush.xpose.msk.msrb.mxu2 %vm677_vm1, %v7778_v49  ;;  %v7883_v49 = vmul.f32 0.35355338, %v1037_v25 }
 0x247   : > { %3207 = vmatpush.msrb.mxu0 %v6592_v41  ;;  %6387 = vmatpush.xpose.msk.msra.mxu1 %vm677_vm1, %v1769_v39  ;;  %v1847_v39 = vpop.permute.xlu1 %1846  ;;  %v10093_v41 = vld [vmem:[#allocation24_spill] sm:$0xff] }
 0x248   : > { %6397 = vmatpush.xpose.msk.msrb.mxu3 %vm677_vm1, %v1899_v21  ;;  %6430 = vmatmul.msk.f32.vlgmr.msra.gmra.mxu0 %vm677_vm1, %v7675_v54  ;;  %v2443_v52 = vsel %vm677_vm1, %v7883_v49, -inf  ;;  %v1115_v21 = vpop.f32.mrf.mxu2 }
 0x249   : > { %3311 = vmatpush.msra.mxu0 %v6602_v58  ;;  %2432 = vmax.xlane.f32.xlu2 %v2431_v33  ;;  %v7898_v59 = vmul.f32 0.35355338, %v1115_v21  ;;  %v10096_v33 = vld [vmem:[#allocation25_spill] sm:$0xff]  ;;  %v10097_v21 = vld [vmem:[#allocation40_spill] sm:$0xff] }
 0x24a   : > { %2441 = vmax.xlane.f32.xlu1 %v2440_v57  ;;  %v6596_v57 = vunpack.i.l.bf16 %v10096_v33 }
 0x24d   : > { %6390 = vmatmul.msk.f32.vlgmr.msra.gmra.mxu2 %vm677_vm1, %v7612_v12  ;;  %6392 = vmatmul.msk.f32.vlgmr.msra.gmra.mxu3 %vm677_vm1, %v7513_v36 }
 0x24e   : > { %6382 = vmatmul.msk.f32.vlgmr.msrb.gmra.mxu1 %vm677_vm1, %v7531_v40  ;;  %6401 = vmatpush.xpose.msk.msra.mxu2 %vm677_vm1, %v7596_v6  ;;  %v2452_v6 = vsel %vm677_vm1, %v7898_v59, -inf }
 0x24f   : > { %6393 = vmatpush.xpose.msk.msrb.mxu1 %vm677_vm1, %v1847_v39  ;;  %6403 = vmatpush.xpose.msk.msra.mxu3 %vm677_vm1, %v7618_v17  ;;  %v6591_v39 = vunpack.i.l.bf16 %v7488_v28 }
 0x252   : > { %2444 = vmax.xlane.f32.xlu1 %v2443_v52 }
 0x255   : > { %6396 = vmatmul.msk.f32.vlgmr.msrb.gmra.mxu2 %vm677_vm1, %v7648_v62  ;;  %6398 = vmatmul.msk.f32.vlgmr.msrb.gmra.mxu3 %vm677_vm1, %v7582_v3 }
 0x256   : > { %6388 = vmatmul.msk.f32.vlgmr.msra.gmra.mxu1 %vm677_vm1, %v7602_v51  ;;  %6409 = vmatpush.xpose.msk.msrb.mxu2 %vm677_vm1, %v7663_v9  ;;  %v1167_v9 = vpop.f32.mrf.mxu1 }
 0x257   : > { %6399 = vmatpush.xpose.msk.msra.mxu1 %vm677_vm1, %v7677_v60  ;;  %6411 = vmatpush.xpose.msk.msrb.mxu3 %vm677_vm1, %v7770_v23 }
 0x25a   : > { %2453 = vmax.xlane.f32.xlu1 %v2452_v6  ;;  %v10098_v6 = vld [vmem:[#allocation21_spill] sm:$0xff] }
 0x25d   : > { %v1141_v17 = vpop.f32.mrf.mxu3  ;;  %6402 = vmatmul.msk.f32.vlgmr.msra.gmra.mxu2 %vm677_vm1, %v7353_v56  ;;  %6404 = vmatmul.msk.f32.vlgmr.msra.gmra.mxu3 %vm677_vm1, %v7461_v22 }
 0x25e   : > { %v7918_v45 = vmul.f32 0.35355338, %v1141_v17  ;;  %6394 = vmatmul.msk.f32.vlgmr.msrb.gmra.mxu1 %vm677_vm1, %v7547_v46  ;;  %6417 = vmatpush.xpose.msk.msra.mxu2 %vm677_vm1, %v7720_v27  ;;  %v10094_v27 = vld [vmem:[#allocation4_spill] sm:$0xff]  ;;  %v10099_v17 = vld [vmem:[#allocation26_spill] sm:$0xff] }
 0x25f   : > { %6407 = vmatpush.xpose.msk.msrb.mxu1 %vm677_vm1, %v7683_v8  ;;  %6419 = vmatpush.xpose.msk.msra.mxu3 %vm677_vm1, %v7762_v1  ;;  %v10095_v8 = vld [vmem:[#allocation52_spill] sm:$0xff] }
 0x260   : > { %v2455_v60 = vsel %vm677_vm1, %v7918_v45, -inf  ;;  %v1245_v2 = vpop.f32.mrf.mxu1 }
 0x261   : > { %v7949_v52 = vmul.f32 0.35355338, %v1245_v2  ;;  %v6597_v2 = vunpack.i.h.bf16 %v10096_v33 }
 0x262   : > { %2456 = vmax.xlane.f32.xlu1 %v2455_v60  ;;  %v10100_v60 = vld [vmem:[#allocation43_spill] sm:$0xff] }
 0x263   : > { %v2467_v28 = vsel %vm677_vm1, %v7949_v52, -inf }
 0x265   : > { %v1219_v23 = vpop.f32.mrf.mxu3  ;;  %6410 = vmatmul.msk.f32.vlgmr.msrb.gmra.mxu2 %vm677_vm1, %v10092_v43  ;;  %6412 = vmatmul.msk.f32.vlgmr.msrb.gmra.mxu3 %vm677_vm1, %v10093_v41 }
 0x266   : > { %v7934_v4 = vmul.f32 0.35355338, %v1219_v23  ;;  %6400 = vmatmul.msk.f32.vlgmr.msra.gmra.mxu1 %vm677_vm1, %v10094_v27  ;;  %6425 = vmatpush.xpose.msk.msrb.mxu2 %vm677_vm1, %v7802_v5  ;;  %v6606_v23 = vunpack.i.l.bf16 %v10100_v60 }
 0x267   : > { %6415 = vmatpush.xpose.msk.msra.mxu1 %vm677_vm1, %v10095_v8  ;;  %6427 = vmatpush.xpose.msk.msrb.mxu3 %vm677_vm1, %v7791_v20 }
 0x268   : > { %v2464_v1 = vsel %vm677_vm1, %v7934_v4, -inf }
 0x26a   : > { %2465 = vmax.xlane.f32.xlu1 %v2464_v1  ;;  %v6601_v1 = vunpack.i.l.bf16 %v7420_v13  ;;  %v2412_v13 = vpop.xlane.xlu1 %2411 }
 0x26b   : > { %v2406_v58 = vpop.xlane.xlu2 %2405 }
 0x26c   : > { %v2596_v25 = vsub.f32 %v7714_v34, %v2406_v58 }
 0x26d   : > { %v2409_v5 = vpop.xlane.xlu0 %2408  ;;  %6418 = vmatmul.msk.f32.vlgmr.msra.gmra.mxu2 %vm677_vm1, %v10097_v21  ;;  %6420 = vmatmul.msk.f32.vlgmr.msra.gmra.mxu3 %vm677_vm1, %v10098_v6 }
 0x26e   : > { %v2660_v20 = vmul.f32 1.442695, %v2596_v25  ;;  %6408 = vmatmul.msk.f32.vlgmr.msrb.gmra.mxu1 %vm677_vm1, %v10099_v17  ;;  %3155 = vmatpush.msra.mxu2 %v6596_v57  ;;  %v10101_v57 = vld [vmem:[#allocation47_spill] sm:$0xff] }
 0x26f   : > { %6423 = vmatpush.xpose.msk.msrb.mxu1 %vm677_vm1, %v7862_v55  ;;  %3181 = vmatpush.msra.mxu3 %v6591_v39  ;;  %v10102_v55 = vld [vmem:[#allocation50_spill] sm:$0xff]  ;;  %v2597_v39 = vsub.f32 %v7716_v30, %v2409_v5 }
 0x270   : > { %6751 = vpow2.f32 %v2660_v20 }
 0x272   : > { %2468 = vmax.xlane.f32.xlu1 %v2467_v28  ;;  %v10103_v28 = vld [vmem:[#allocation55_spill] sm:$0xff] }
 0x273   : > { %v2415_v34 = vpop.xlane.xlu2 %2414 }
 0x274   : > { %v2599_v8 = vsub.f32 %v7732_v37, %v2415_v34  ;;  %v2662_v34 = vmul.f32 1.442695, %v2597_v39 }
 0x275   : > { %v2421_v58 = vpop.xlane.xlu0 %2420  ;;  %6426 = vmatmul.msk.f32.vlgmr.msrb.gmra.mxu2 %vm677_vm1, %v10101_v57  ;;  %6428 = vmatmul.msk.f32.vlgmr.msrb.gmra.mxu3 %vm677_vm1, %v10102_v55  ;;  %v7977_v55 = vmul.f32 0.35355338, %v1167_v9  ;;  %v2418_v9 = vpop.xlane.xlu1 %2417 }
 0x276   : > { %v7969_v25 = vpop.eup %6751  ;;  %v2666_v20 = vmul.f32 1.442695, %v2599_v8  ;;  %v2601_v54 = vsub.f32 %v10103_v28, %v2421_v58  ;;  %6416 = vmatmul.msk.f32.vlgmr.msra.gmra.mxu1 %vm677_vm1, %v10104_v32  ;;  %3259 = vmatpush.msrb.mxu2 %v6606_v23  ;;  %v10105_v8 = vld [vmem:[#allocation56_spill] sm:$0xff]  ;;  %v10106_v23 = vld [vmem:[#allocation45_spill] sm:$0xff] }
 0x277   : > { %3129 = vmatpush.msra.mxu1 %v6601_v1  ;;  %3285 = vmatpush.msrb.mxu3 %v6597_v2  ;;  %v2788_v37 = vsel %vm677_vm1, %v7969_v25, 0.0  ;;  %v2458_v1 = vsel %vm677_vm1, %v7977_v55, -inf }
 0x278   : > { %6753 = vpow2.f32 %v2666_v20  ;;  %v2670_v33 = vmul.f32 1.442695, %v2601_v54  ;;  %2789 = vadd.xlane.f32.xlu2 %v2788_v37  ;;  %v10107_v37 = vld [vmem:[#allocation53_spill] sm:$0xff] }
 0x27a   : > { %6755 = vpow2.f32 %v2670_v33  ;;  %v2598_v33 = vsub.f32 %v10107_v37, %v2412_v13  ;;  %v10108_v13 = vld [vmem:[#allocation54_spill] sm:$0xff] }
 0x27b   : > { %6757 = vpow2.f32 %v2662_v34  ;;  %v2600_v37 = vsub.f32 %v10108_v13, %v2418_v9  ;;  %v8023_v13 = vpop.permute.xlu2 %6614 }
 0x27d   : > { %v2427_v30 = vpop.xlane.xlu0 %2426 }
 0x27e   : > { %v7979_v5 = vpop.eup %6753  ;;  %v2603_v58 = vsub.f32 %v10105_v8, %v2427_v30  ;;  %6424 = vmatmul.msk.f32.vlgmr.msrb.gmra.mxu1 %vm677_vm1, %v10106_v23  ;;  %v1193_v8 = vpop.f32.mrf.mxu2 }
 0x27f   : > { %v2797_v54 = vsel %vm677_vm1, %v7979_v5, 0.0 }
 0x280   : > { %v7988_v2 = vpop.eup %6755  ;;  %v2674_v39 = vmul.f32 1.442695, %v2603_v58  ;;  %2459 = vmax.xlane.f32.xlu2 %v2458_v1  ;;  %2798 = vadd.xlane.f32.xlu0 %v2797_v54  ;;  %v2664_v54 = vmul.f32 1.442695, %v2598_v33 }
 0x281   : > { %v2803_v20 = vsel %vm677_vm1, %v7988_v2, 0.0  ;;  %v7992_v28 = vpop.eup %6757 }
 0x282   : > { %6759 = vpow2.f32 %v2674_v39  ;;  %2804 = vadd.xlane.f32.xlu1 %v2803_v20  ;;  %v2791_v34 = vsel %vm677_vm1, %v7992_v28, 0.0  ;;  %v8004_v20 = vmul.f32 0.35355338, %v1193_v8 }
 0x283   : > { %6761 = vpow2.f32 %v2664_v54  ;;  %v1297_v54 = vpop.f32.mrf.mxu3 }
 0x284   : > { %v2461_v23 = vsel %vm677_vm1, %v8004_v20, -inf }
 0x288   : > { %v7997_v30 = vpop.eup %6759  ;;  %2792 = vadd.xlane.f32.xlu2 %v2791_v34  ;;  %v2668_v34 = vmul.f32 1.442695, %v2600_v37 }
 0x289   : > { %v7999_v58 = vpop.permute.xlu1 %6609  ;;  %v2809_v1 = vsel %vm677_vm1, %v7997_v30, 0.0  ;;  %v8009_v57 = vpop.eup %6761 }
 0x28a   : > { %v6611_v39 = vunpack.i.l.bf16 %v7999_v58  ;;  %2810 = vadd.xlane.f32.xlu0 %v2809_v1  ;;  %6763 = vpow2.f32 %v2668_v34  ;;  %v2794_v33 = vsel %vm677_vm1, %v8009_v57, 0.0  ;;  %v1323_v34 = vpop.f32.mrf.mxu1 }
 0x28b   : > { %v8027_v32 = vmul.f32 0.35355338, %v1323_v34 }
 0x28c   : > { %3233 = vmatpush.msrb.mxu1 %v6611_v39  ;;  %v8021_v39 = vmul.f32 0.35355338, %v1297_v54 }
 0x28d   : > { %v1271_v1 = vpop.f32.mrf.mxu2  ;;  %v2476_v54 = vsel %vm677_vm1, %v8027_v32, -inf }
 0x28e   : > { %v8017_v9 = vmul.f32 0.35355338, %v1271_v1  ;;  %v2473_v37 = vsel %vm677_vm1, %v8021_v39, -inf }
 0x290   : > { %2462 = vmax.xlane.f32.xlu2 %v2461_v23  ;;  %v8013_v6 = vpop.eup %6763  ;;  %v2470_v23 = vsel %vm677_vm1, %v8017_v9, -inf }
 0x291   : > { %v2800_v8 = vsel %vm677_vm1, %v8013_v6, 0.0 }
 0x295   : > { %v1349_v17 = vpop.f32.mrf.mxu2 }
 0x298   : > { %2795 = vadd.xlane.f32.xlu2 %v2794_v33  ;;  %v2436_v33 = vpop.xlane.xlu0 %2435 }
 0x299   : > { %v2606_v44 = vsub.f32 %v7768_v63, %v2436_v33 }
 0x29b   : > { %v2680_v43 = vmul.f32 1.442695, %v2606_v44  ;;  %v1375_v44 = vpop.f32.mrf.mxu3 }
 0x2a0   : > { %2801 = vadd.xlane.f32.xlu2 %v2800_v8  ;;  %v2439_v27 = vpop.xlane.xlu0 %2438 }
 0x2a1   : > { %v2607_v46 = vsub.f32 %v7783_v35, %v2439_v27 }
 0x2a8   : > { %2471 = vmax.xlane.f32.xlu2 %v2470_v23 }
 0x2ad   : > { %v2448_v33 = vpop.xlane.xlu0 %2447 }
 0x2b0   : > { %2474 = vmax.xlane.f32.xlu2 %v2473_v37  ;;  %v8034_v37 = vmul.f32 0.35355338, %v1349_v17 }
 0x2b4   : > { %v2424_v8 = vpop.xlane.xlu2 %2423  ;;  %v2430_v1 = vpop.xlane.xlu1 %2429 }
 0x2b5   : > { %v2602_v21 = vsub.f32 %v7835_v47, %v2424_v8  ;;  %v2604_v23 = vsub.f32 %v7837_v53, %v2430_v1  ;;  %v2479_v53 = vsel %vm677_vm1, %v8034_v37, -inf  ;;  %v1427_v8 = vpop.f32.mrf.mxu2 }
 0x2b6   : > { %v2451_v22 = vpop.xlane.xlu0 %2450 }
 0x2b7   : > { %v2672_v41 = vmul.f32 1.442695, %v2602_v21  ;;  %v2676_v34 = vmul.f32 1.442695, %v2604_v23  ;;  %v1401_v21 = vpop.f32.mrf.mxu1 }
 0x2b8   : > { %2477 = vmax.xlane.f32.xlu2 %v2476_v54  ;;  %v1453_v54 = vpop.f32.mrf.mxu3 }
 0x2b9   : > { %6765 = vpow2.f32 %v2672_v41 }
 0x2ba   : > { %6767 = vpow2.f32 %v2680_v43 }
 0x2bb   : > { %6769 = vpow2.f32 %v2676_v34 }
 0x2bc   : > { %v2433_v56 = vpop.xlane.xlu2 %2432 }
 0x2bd   : > { %v2605_v36 = vsub.f32 %v7860_v10, %v2433_v56  ;;  %v8047_v10 = vpop.xlane.xlu1 %2441 }
 0x2be   : > { %v2608_v26 = vsub.f32 %v7864_v16, %v8047_v10 }
 0x2bf   : > { %v8037_v47 = vpop.eup %6765  ;;  %v2678_v63 = vmul.f32 1.442695, %v2605_v36  ;;  %v1479_v34 = vpop.f32.mrf.mxu1 }
 0x2c0   : > { %2480 = vmax.xlane.f32.xlu2 %v2479_v53  ;;  %v2806_v41 = vsel %vm677_vm1, %v8037_v47, 0.0  ;;  %v8043_v17 = vpop.eup %6767  ;;  %v8059_v53 = vmul.f32 0.35355338, %v1375_v44  ;;  %v1505_v44 = vpop.f32.mrf.mxu2 }
 0x2c1   : > { %6771 = vpow2.f32 %v2678_v63  ;;  %2807 = vadd.xlane.f32.xlu1 %v2806_v41  ;;  %v8045_v56 = vpop.eup %6769  ;;  %v2818_v36 = vsel %vm677_vm1, %v8043_v17, 0.0  ;;  %v8057_v63 = vmul.f32 0.35355338, %v1427_v8  ;;  %v8061_v41 = vmul.f32 0.35355338, %v1479_v34  ;;  %v1531_v35 = vpop.f32.mrf.mxu3 }
 0x2c2   : > { %v2812_v1 = vsel %vm677_vm1, %v8045_v56, 0.0  ;;  %v2482_v8 = vsel %vm677_vm1, %v8059_v53, -inf  ;;  %v8071_v34 = vmul.f32 0.35355338, %v1453_v54 }
 0x2c3   : > { %v2488_v48 = vsel %vm677_vm1, %v8057_v63, -inf }
 0x2c4   : > { %v2491_v62 = vsel %vm677_vm1, %v8071_v34, -inf }
 0x2c5   : > { %v2445_v3 = vpop.xlane.xlu1 %2444 }
 0x2c7   : > { %v8049_v43 = vpop.eup %6771 }
 0x2c8   : > { %2819 = vadd.xlane.f32.xlu2 %v2818_v36  ;;  %v2815_v23 = vsel %vm677_vm1, %v8049_v43, 0.0  ;;  %v2611_v36 = vsub.f32 %v7850_v15, %v2451_v22  ;;  %v8073_v22 = vmul.f32 0.35355338, %v1401_v21  ;;  %v8075_v15 = vmul.f32 0.35355338, %v1505_v44 }
 0x2c9   : > { %2813 = vadd.xlane.f32.xlu1 %v2812_v1  ;;  %2816 = vadd.xlane.f32.xlu0 %v2815_v23  ;;  %v2494_v1 = vsel %vm677_vm1, %v8061_v41, -inf  ;;  %v2682_v23 = vmul.f32 1.442695, %v2607_v46  ;;  %v8085_v21 = vmul.f32 0.35355338, %v1531_v35  ;;  %v1609_v44 = vpop.f32.mrf.mxu3 }
 0x2ca   : > { %v2690_v27 = vmul.f32 1.442695, %v2611_v36  ;;  %v2485_v46 = vsel %vm677_vm1, %v8073_v22, -inf }
 0x2cb   : > { %6773 = vpow2.f32 %v2682_v23  ;;  %v2609_v23 = vsub.f32 %v7883_v49, %v2445_v3 }
 0x2cc   : > { %6775 = vpow2.f32 %v2690_v27  ;;  %v2500_v27 = vsel %vm677_vm1, %v8085_v21, -inf }
 0x2cd   : > { %v8083_v54 = vpop.xlane.xlu1 %2453  ;;  %v2686_v12 = vmul.f32 1.442695, %v2609_v23 }
 0x2cf   : > { %6777 = vpow2.f32 %v2686_v12 }
 0x2d0   : > { %2489 = vmax.xlane.f32.xlu2 %v2488_v48  ;;  %v1557_v48 = vpop.f32.mrf.mxu1 }
 0x2d1   : > { %2495 = vmax.xlane.f32.xlu1 %v2494_v1  ;;  %2483 = vmax.xlane.f32.xlu0 %v2482_v8  ;;  %v2497_v1 = vsel %vm677_vm1, %v8075_v15, -inf  ;;  %v8087_v36 = vpop.eup %6773  ;;  %v8099_v51 = vmul.f32 0.35355338, %v1557_v48 }
 0x2d2   : > { %v8089_v8 = vpop.eup %6775  ;;  %v2821_v19 = vsel %vm677_vm1, %v8087_v36, 0.0 }
 0x2d3   : > { %v2833_v35 = vsel %vm677_vm1, %v8089_v8, 0.0 }
 0x2d5   : > { %v8101_v3 = vpop.xlane.xlu1 %2456 }
 0x2d8   : > { %2492 = vmax.xlane.f32.xlu2 %v2491_v62  ;;  %v2610_v62 = vsub.f32 %v7827_v31, %v2448_v33  ;;  %v1687_v33 = vpop.f32.mrf.mxu3 }
 0x2d9   : > { %2498 = vmax.xlane.f32.xlu1 %v2497_v1  ;;  %2486 = vmax.xlane.f32.xlu0 %v2485_v46  ;;  %v1583_v1 = vpop.f32.mrf.mxu2  ;;  %v1635_v46 = vpop.f32.mrf.mxu1 }
 0x2da   : > { %v2688_v14 = vmul.f32 1.442695, %v2610_v62  ;;  %v8103_v31 = vmul.f32 0.35355338, %v1583_v1  ;;  %v8105_v49 = vmul.f32 0.35355338, %v1635_v46  ;;  %v8113_v62 = vpop.eup %6777 }
 0x2dc   : > { %6779 = vpow2.f32 %v2688_v14  ;;  %v2506_v48 = vsel %vm677_vm1, %v8103_v31, -inf }
 0x2dd   : > { %v8119_v1 = vpop.xlane.xlu1 %2465 }
 0x2e0   : > { %2501 = vmax.xlane.f32.xlu2 %v2500_v27  ;;  %v2503_v27 = vsel %vm677_vm1, %v8099_v51, -inf  ;;  %v1765_v38 = vpop.f32.mrf.mxu3 }
 0x2e1   : > { %2822 = vadd.xlane.f32.xlu0 %v2821_v19  ;;  %2834 = vadd.xlane.f32.xlu1 %v2833_v35  ;;  %v2512_v19 = vsel %vm677_vm1, %v8105_v49, -inf  ;;  %v8115_v35 = vmul.f32 0.35355338, %v1687_v33  ;;  %v1661_v12 = vpop.f32.mrf.mxu2  ;;  %v1713_v46 = vpop.f32.mrf.mxu1  ;;  %v8130_v24 = vmul.f32 0.35355338, %v1765_v38 }
 0x2e2   : > { %v8117_v14 = vpop.eup %6779  ;;  %v8132_v7 = vmul.f32 0.35355338, %v1713_v46  ;;  %v8146_v10 = vmul.f32 0.35355338, %v1661_v12 }
 0x2e3   : > { %v2527_v38 = vsel %vm677_vm1, %v8130_v24, -inf }
 0x2e8   : > { %2504 = vmax.xlane.f32.xlu2 %v2503_v27  ;;  %v2827_v27 = vsel %vm677_vm1, %v8113_v62, 0.0 }
 0x2e9   : > { %2513 = vmax.xlane.f32.xlu0 %v2512_v19  ;;  %2507 = vmax.xlane.f32.xlu1 %v2506_v48  ;;  %v2830_v19 = vsel %vm677_vm1, %v8117_v14, 0.0  ;;  %v2518_v48 = vsel %vm677_vm1, %v8115_v35, -inf  ;;  %v1791_v16 = vpop.f32.mrf.mxu1 }
 0x2ea   : > { %v8148_v46 = vmul.f32 0.35355338, %v1791_v16 }
 0x2eb   : > { %v2790_v23 = vpop.xlane.xlu2 %2789 }
 0x2ec   : > { %6781 = vrcp.f32 %v2790_v23  ;;  %v8127_v23 = vmul.f32 0.35355338, %v1609_v44  ;;  %v8138_v44 = vpop.xlane.xlu1 %2468 }
 0x2f0   : > { %2828 = vadd.xlane.f32.xlu2 %v2827_v27 }
 0x2f1   : > { %2831 = vadd.xlane.f32.xlu0 %v2830_v19  ;;  %2519 = vmax.xlane.f32.xlu1 %v2518_v48  ;;  %v1739_v48 = vpop.f32.mrf.mxu2 }
 0x2f2   : > { %v6782_v33 = vpop.eup %6781 }
 0x2f3   : > { %v3044_v40 = vmul.f32 %v6782_v33, %v7969_v25  ;;  %v2460_v0 = vpop.xlane.xlu2 %2459  ;;  %v2799_v11 = vpop.xlane.xlu0 %2798  ;;  %v2509_v25 = vsel %vm677_vm1, %v8127_v23, -inf }
 0x2f4   : > { %v2614_v27 = vsub.f32 %v7977_v55, %v2460_v0  ;;  %6783 = vrcp.f32 %v2799_v11  ;;  %v2521_v0 = vsel %vm677_vm1, %v8132_v7, -inf  ;;  %v2684_v55 = vmul.f32 1.442695, %v2608_v26 }
 0x2f5   : > { %6431 = vmatmul.msk.f32.vlgmr.msra.gmra.mxu1 %vm677_vm1, %v3044_v40  ;;  %v2613_v26 = vsub.f32 %v7918_v45, %v8101_v3 }
 0x2f6   : > { %v2696_v19 = vmul.f32 1.442695, %v2614_v27  ;;  %v6612_v27 = vunpack.i.h.bf16 %v7999_v58  ;;  %v2515_v58 = vsel %vm677_vm1, %v8146_v10, -inf }
 0x2f7   : > { %v2694_v45 = vmul.f32 1.442695, %v2613_v26 }
 0x2f8   : > { %6785 = vpow2.f32 %v2696_v19  ;;  %2510 = vmax.xlane.f32.xlu2 %v2509_v25 }
 0x2f9   : > { %2528 = vmax.xlane.f32.xlu0 %v2527_v38  ;;  %2522 = vmax.xlane.f32.xlu1 %v2521_v0  ;;  %v2805_v38 = vpop.xlane.xlu1 %2804  ;;  %v1817_v0 = vpop.f32.mrf.mxu2 }
 0x2fa   : > { %v6784_v11 = vpop.eup %6783 }
 0x2fb   : > { %v2793_v40 = vpop.xlane.xlu2 %2792  ;;  %v3047_v33 = vmul.f32 %v6784_v11, %v7979_v5  ;;  %v2530_v5 = vsel %vm677_vm1, %v8148_v46, -inf }
 0x2fc   : > { %6787 = vrcp.f32 %v2793_v40 }
 0x2fd   : > { %6789 = vpow2.f32 %v2684_v55  ;;  %v2811_v19 = vpop.xlane.xlu0 %2810  ;;  %6434 = vmatmul.msk.f32.vlgmr.msrb.gmra.mxu0 %vm677_vm1, %v3047_v33  ;;  %v6616_v33 = vunpack.i.l.bf16 %v8023_v13 }
 0x2fe   : > { %v8152_v25 = vpop.eup %6785  ;;  %6791 = vrcp.f32 %v2811_v19  ;;  %3415 = vmatpush.msrb.mxu0 %v6612_v27  ;;  %v8167_v27 = vmul.f32 0.35355338, %v1817_v0  ;;  %v8169_v19 = vpop.f32.mrf.mxu3 }
 0x2ff   : > { %v2842_v12 = vsel %vm677_vm1, %v8152_v25, 0.0  ;;  %6793 = vrcp.f32 %v2805_v38 }
 0x300   : > { %2843 = vadd.xlane.f32.xlu2 %v2842_v12  ;;  %10109 = vst [vmem:[#allocation52_spill] sm:$0xff] %v8167_v27  ;;  %6795 = vpow2.f32 %v2694_v45  ;;  %v2533_v38 = vsel %vm677_vm1, %v8167_v27, -inf }
 0x301   : > { %2531 = vmax.xlane.f32.xlu0 %v2530_v5  ;;  %2516 = vmax.xlane.f32.xlu1 %v2515_v58  ;;  %v8178_v5 = vmul.f32 0.35355338, %v1739_v48 }
 0x302   : > { %v6788_v55 = vpop.eup %6787 }
 0x303   : > { %v8163_v16 = vpop.eup %6789  ;;  %v3045_v3 = vmul.f32 %v6788_v55, %v7992_v28  ;;  %v2463_v11 = vpop.xlane.xlu2 %2462  ;;  %10110 = vst [vmem:[#allocation25_spill] sm:$0xff] %v8178_v5  ;;  %v2524_v45 = vsel %vm677_vm1, %v8178_v5, -inf }
 0x304   : > { %v6792_v40 = vpop.eup %6791  ;;  %v2824_v26 = vsel %vm677_vm1, %v8163_v16, 0.0 }
 0x305   : > { %v3051_v12 = vmul.f32 %v6792_v40, %v7997_v30  ;;  %6432 = vmatmul.msk.f32.vlgmr.msra.gmra.mxu2 %vm677_vm1, %v3045_v3  ;;  %v6794_v28 = vpop.eup %6793 }
 0x306   : > { %3363 = vmatpush.msra.mxu2 %v6616_v33  ;;  %v3049_v58 = vmul.f32 %v6794_v28, %v7988_v2  ;;  %v8181_v0 = vpop.eup %6795  ;;  %v1921_v55 = vpop.f32.mrf.mxu3 }
 0x307   : > { %6438 = vmatmul.msk.f32.vlgmr.msra.gmra.mxu0 %vm677_vm1, %v3051_v12  ;;  %v2839_v3 = vsel %vm677_vm1, %v8181_v0, 0.0  ;;  %v8188_v48 = vmul.f32 0.35355338, %v1921_v55  ;;  %v10112_v12 = vld [vmem:[#allocation3_spill] sm:$0xff] }
 0x308   : > { %2825 = vadd.xlane.f32.xlu2 %v2824_v26  ;;  %v10113_v26 = vld [vmem:[#allocation14_spill] sm:$0xff] }
 0x309   : > { %2534 = vmax.xlane.f32.xlu1 %v2533_v38  ;;  %10111 = vst [vmem:[#allocation43_spill] sm:$0xff] %v8188_v48  ;;  %v6618_v28 = vpack.i.bf16 %v10113_v26, %v10112_v12  ;;  %v6607_v38 = vunpack.i.h.bf16 %v10100_v60  ;;  %v10115_v12 = vld [vmem:[#allocation9_spill] sm:$0xff] }
 0x30a   : > { %v10116_v26 = vld [vmem:[#allocation17_spill] sm:$0xff] }
 0x30b   : > { %v2796_v30 = vpop.xlane.xlu2 %2795 }
 0x30c   : > { %6797 = vrcp.f32 %v2796_v30  ;;  %v2545_v30 = vsel %vm677_vm1, %v8188_v48, -inf }
 0x30d   : > { %6436 = vmatmul.msk.f32.vlgmr.msrb.gmra.mxu2 %vm677_vm1, %v3049_v58  ;;  %v2612_v58 = vsub.f32 %v7898_v59, %v8083_v54 }
 0x30e   : > { %v1999_v55 = vpop.f32.mrf.mxu3 }
 0x310   : > { %2525 = vmax.xlane.f32.xlu2 %v2524_v45  ;;  %v2692_v45 = vmul.f32 1.442695, %v2612_v58 }
 0x311   : > { %2840 = vadd.xlane.f32.xlu1 %v2839_v3  ;;  %v8200_v3 = vmul.f32 0.35355338, %v1999_v55 }
 0x312   : > { %v6798_v40 = vpop.eup %6797 }
 0x313   : > { %v3046_v2 = vmul.f32 %v6798_v40, %v8009_v57  ;;  %v2802_v33 = vpop.xlane.xlu2 %2801  ;;  %10114 = vst [vmem:[#allocation55_spill] sm:$0xff] %v8200_v3 }
 0x314   : > { %6799 = vrcp.f32 %v2802_v33 }
 0x315   : > { %6619 = vrot.lane.b32.xlu0 %v6618_v28, %s7101_s26  ;;  %6433 = vmatmul.msk.f32.vlgmr.msra.gmra.mxu3 %vm677_vm1, %v3046_v2  ;;  %6801 = vpow2.f32 %v2692_v45  ;;  %v2554_v2 = vsel %vm677_vm1, %v8200_v3, -inf  ;;  %v6623_v28 = vpack.i.bf16 %v10116_v26, %v10115_v12  ;;  %v6617_v26 = vunpack.i.h.bf16 %v8023_v13  ;;  %v1869_v13 = vpop.f32.mrf.mxu1 }
 0x316   : > { %3389 = vmatpush.msra.mxu3 %v6607_v38  ;;  %v2615_v38 = vsub.f32 %v8004_v20, %v2463_v11  ;;  %v10117_v11 = vld [vmem:[#allocation6_spill] sm:$0xff]  ;;  %v8356_v27 = vpop.f32.mrf.mxu3 }
 0x318   : > { %2546 = vmax.xlane.f32.xlu2 %v2545_v30  ;;  %v2698_v58 = vmul.f32 1.442695, %v2615_v38 }
 0x31a   : > { %v6800_v57 = vpop.eup %6799  ;;  %6803 = vpow2.f32 %v2698_v58 }
 0x31b   : > { %v3048_v60 = vmul.f32 %v6800_v57, %v8013_v6  ;;  %v2472_v40 = vpop.xlane.xlu2 %2471  ;;  %v8206_v54 = vpop.eup %6801 }
 0x31c   : > { %v2836_v33 = vsel %vm677_vm1, %v8206_v54, 0.0  ;;  %v2618_v20 = vsub.f32 %v8017_v9, %v2472_v40 }
 0x31d   : > { %6435 = vmatmul.msk.f32.vlgmr.msrb.gmra.mxu1 %vm677_vm1, %v3048_v60 }
 0x320   : > { %2555 = vmax.xlane.f32.xlu2 %v2554_v2  ;;  %v8218_v57 = vpop.eup %6803 }
 0x321   : > { %v2845_v58 = vsel %vm677_vm1, %v8218_v57, 0.0 }
 0x323   : > { %v2475_v59 = vpop.xlane.xlu2 %2474 }
 0x328   : > { %2837 = vadd.xlane.f32.xlu2 %v2836_v33 }
 0x32a   : > { %6624 = vrot.lane.b32.xlu1 %v6623_v28, %s7101_s26  ;;  %v10118_v28 = vld [vmem:[#allocation7_spill] sm:$0xff] }
 0x32b   : > { %v8213_v6 = vpop.xlane.xlu2 %2477  ;;  %v6628_v38 = vpack.i.bf16 %v10118_v28, %v10117_v11  ;;  %v2619_v28 = vsub.f32 %v8021_v39, %v2475_v59  ;;  %v2617_v39 = vsub.f32 %v7949_v52, %v8138_v44 }
 0x333   : > { %v8216_v30 = vpop.xlane.xlu2 %2480 }
 0x334   : > { %v2808_v55 = vpop.xlane.xlu1 %2807 }
 0x335   : > { %6805 = vrcp.f32 %v2808_v55  ;;  %v1895_v55 = vpop.f32.mrf.mxu2 }
 0x33b   : > { %v6806_v45 = vpop.eup %6805  ;;  %v2820_v60 = vpop.xlane.xlu2 %2819 }
 0x33c   : > { %v3050_v2 = vmul.f32 %v6806_v45, %v8037_v47  ;;  %6807 = vrcp.f32 %v2820_v60  ;;  %v8221_v33 = vpop.xlane.xlu1 %2813  ;;  %v2817_v12 = vpop.xlane.xlu0 %2816  ;;  %v2704_v47 = vmul.f32 1.442695, %v2618_v20  ;;  %v8231_v60 = vmul.f32 0.35355338, %v1895_v55 }
 0x33d   : > { %6809 = vrcp.f32 %v2817_v12  ;;  %v8248_v55 = vpop.f32.mrf.mxu1 }
 0x33e   : > { %6437 = vmatmul.msk.f32.vlgmr.msrb.gmra.mxu3 %vm677_vm1, %v3050_v2  ;;  %10119 = vst [vmem:[#allocation56_spill] sm:$0xff] %v8231_v60  ;;  %6811 = vpow2.f32 %v2704_v47  ;;  %v2542_v20 = vsel %vm677_vm1, %v8231_v60, -inf }
 0x33f   : > { %3493 = vmatpush.msrb.mxu3 %v6617_v26  ;;  %2846 = vadd.xlane.f32.xlu0 %v2845_v58 }
 0x340   : > { %6629 = vrot.lane.b32.xlu2 %v6628_v38, %s7101_s26 }
 0x342   : > { %v6808_v45 = vpop.eup %6807 }
 0x343   : > { %v3054_v9 = vmul.f32 %v6808_v45, %v8043_v17  ;;  %v8234_v40 = vpop.xlane.xlu2 %2489  ;;  %v6810_v12 = vpop.eup %6809  ;;  %v2706_v17 = vmul.f32 1.442695, %v2619_v28  ;;  %v8256_v45 = vmul.f32 0.35355338, %v1869_v13 }
 0x344   : > { %v8236_v11 = vpop.xlane.xlu1 %2495  ;;  %v2484_v2 = vpop.xlane.xlu0 %2483  ;;  %v3053_v26 = vmul.f32 %v6810_v12, %v8049_v43 }
 0x345   : > { %v8244_v38 = vpop.eup %6811  ;;  %6813 = vpow2.f32 %v2706_v17  ;;  %10120 = vst [vmem:[#allocation53_spill] sm:$0xff] %v8256_v45  ;;  %v2622_v44 = vsub.f32 %v8059_v53, %v2484_v2  ;;  %v8265_v17 = vpop.f32.mrf.mxu1 }
 0x346   : > { %6441 = vmatmul.msk.f32.vlgmr.msra.gmra.mxu3 %vm677_vm1, %v3054_v9  ;;  %6440 = vmatmul.msk.f32.vlgmr.msra.gmra.mxu2 %vm677_vm1, %v3053_v26  ;;  %v2854_v59 = vsel %vm677_vm1, %v8244_v38, 0.0  ;;  %v2702_v9 = vmul.f32 1.442695, %v2617_v39  ;;  %v2539_v26 = vsel %vm677_vm1, %v8256_v45, -inf }
 0x347   : > { %2543 = vmax.xlane.f32.xlu0 %v2542_v20  ;;  %v2025_v20 = vpop.f32.mrf.mxu0  ;;  %v2712_v48 = vmul.f32 1.442695, %v2622_v44 }
 0x348   : > { %6815 = vpow2.f32 %v2702_v9  ;;  %v8269_v39 = vmul.f32 0.35355338, %v2025_v20  ;;  %v1973_v9 = vpop.f32.mrf.mxu2 }
 0x34a   : > { %10121 = vst [vmem:[#allocation54_spill] sm:$0xff] %v8269_v39  ;;  %v2557_v53 = vsel %vm677_vm1, %v8269_v39, -inf }
 0x34b   : > { %v8246_v58 = vpop.xlane.xlu2 %2492  ;;  %v8258_v12 = vpop.eup %6813 }
 0x34c   : > { %v2487_v47 = vpop.xlane.xlu0 %2486  ;;  %v8252_v43 = vpop.xlane.xlu1 %2498  ;;  %v2857_v13 = vsel %vm677_vm1, %v8258_v12, 0.0 }
 0x34d   : > { %v2623_v3 = vsub.f32 %v8073_v22, %v2487_v47  ;;  %v8285_v22 = vmul.f32 0.35355338, %v1973_v9  ;;  %v2621_v47 = vsub.f32 %v8034_v37, %v8216_v30  ;;  %v8290_v39 = vpop.f32.mrf.mxu1  ;;  %v8303_v37 = vmul.f32 0.35355338, %v8169_v19 }
 0x34e   : > { %v8274_v45 = vpop.eup %6815  ;;  %10123 = vst [vmem:[#allocation14_spill] sm:$0xff] %v8290_v39 }
 0x34f   : > { %2855 = vadd.xlane.f32.xlu0 %v2854_v59  ;;  %v2851_v44 = vsel %vm677_vm1, %v8274_v45, 0.0  ;;  %10122 = vst [vmem:[#allocation3_spill] sm:$0xff] %v8285_v22  ;;  %v2551_v9 = vsel %vm677_vm1, %v8285_v22, -inf }
 0x350   : > { %10124 = vst [vmem:[#allocation9_spill] sm:$0xff] %v8303_v37  ;;  %v8321_v5 = vpop.f32.mrf.mxu2 }
 0x353   : > { %v8260_v28 = vpop.xlane.xlu2 %2501 }
 0x354   : > { %2540 = vmax.xlane.f32.xlu1 %v2539_v26  ;;  %v2823_v52 = vpop.xlane.xlu0 %2822  ;;  %v8271_v59 = vpop.xlane.xlu1 %2834 }
 0x355   : > { %6817 = vrcp.f32 %v2823_v52  ;;  %v8313_v22 = vpop.f32.mrf.mxu1 }
 0x356   : > { %6819 = vpow2.f32 %v2712_v48  ;;  %10126 = vst [vmem:[#allocation6_spill] sm:$0xff] %v8313_v22 }
 0x357   : > { %2858 = vadd.xlane.f32.xlu0 %v2857_v13  ;;  %v2714_v13 = vmul.f32 1.442695, %v2623_v3  ;;  %v2710_v3 = vmul.f32 1.442695, %v2621_v47  ;;  %v2536_v47 = vsel %vm677_vm1, %v8303_v37, -inf }
 0x359   : > { %6821 = vpow2.f32 %v2714_v13  ;;  %v2626_v13 = vsub.f32 %v8061_v41, %v8236_v11 }
 0x35b   : > { %v8276_v26 = vpop.xlane.xlu2 %2504  ;;  %v6818_v2 = vpop.eup %6817 }
 0x35c   : > { %2558 = vmax.xlane.f32.xlu1 %v2557_v53  ;;  %v8280_v52 = vpop.xlane.xlu0 %2513  ;;  %v3055_v20 = vmul.f32 %v6818_v2, %v8087_v36  ;;  %v8292_v53 = vpop.f32.mrf.mxu0 }
 0x35d   : > { %v8294_v48 = vpop.xlane.xlu1 %2507  ;;  %v8296_v36 = vpop.eup %6819 }
 0x35e   : > { %6442 = vmatmul.msk.f32.vlgmr.msrb.gmra.mxu0 %vm677_vm1, %v3055_v20  ;;  %v2866_v20 = vsel %vm677_vm1, %v8296_v36, 0.0 }
 0x35f   : > { %2852 = vadd.xlane.f32.xlu0 %v2851_v44  ;;  %v8309_v44 = vpop.eup %6821 }
 0x360   : > { %10125 = vst [vmem:[#allocation17_spill] sm:$0xff] %v8309_v44 }
 0x363   : > { %v8298_v2 = vpop.xlane.xlu2 %2828 }
 0x364   : > { %2552 = vmax.xlane.f32.xlu1 %v2551_v9  ;;  %v2832_v30 = vpop.xlane.xlu0 %2831  ;;  %v8315_v9 = vpop.f32.mrf.mxu0 }
 0x365   : > { %6823 = vrcp.f32 %v2832_v30  ;;  %10127 = vst [vmem:[#allocation7_spill] sm:$0xff] %v8315_v9  ;;  %v2720_v30 = vmul.f32 1.442695, %v2626_v13  ;;  %v8323_v41 = vpop.xlane.xlu1 %2519 }
 0x366   : > { %6825 = vpow2.f32 %v2710_v3  ;;  %v2869_v3 = vsel %vm677_vm1, %v8309_v44, 0.0 }
 0x367   : > { %2867 = vadd.xlane.f32.xlu0 %v2866_v20  ;;  %6827 = vpow2.f32 %v2720_v30  ;;  %v2627_v30 = vsub.f32 %v8075_v15, %v8252_v43  ;;  %v2625_v15 = vsub.f32 %v8071_v34, %v8246_v58 }
 0x368   : > { %6829 = vrcp.f32 %v8221_v33 }
 0x369   : > { %2537 = vmax.xlane.f32.xlu2 %v2536_v47  ;;  %v2718_v33 = vmul.f32 1.442695, %v2625_v15 }
 0x36b   : > { %v6824_v19 = vpop.eup %6823  ;;  %v8317_v39 = vpop.xlane.xlu2 %2510 }
 0x36c   : > { %v3058_v11 = vmul.f32 %v6824_v19, %v8117_v14  ;;  %2870 = vadd.xlane.f32.xlu1 %v2869_v3  ;;  %v8326_v20 = vpop.eup %6825  ;;  %v8331_v22 = vpop.f32.mrf.mxu0 }
 0x36d   : > { %10128 = vst [vmem:[#allocation57_spill] sm:$0xff] %v8326_v20  ;;  %v2863_v13 = vsel %vm677_vm1, %v8326_v20, 0.0  ;;  %v8336_v37 = vpop.eup %6827  ;;  %v8338_v14 = vpop.xlane.xlu0 %2528 }
 0x36e   : > { %6445 = vmatmul.msk.f32.vlgmr.msrb.gmra.mxu3 %vm677_vm1, %v3058_v11  ;;  %10129 = vst [vmem:[#allocation58_spill] sm:$0xff] %v8331_v22  ;;  %v8340_v19 = vpop.f32.mrf.mxu2  ;;  %v8342_v3 = vpop.xlane.xlu1 %2522  ;;  %v2878_v11 = vsel %vm677_vm1, %v8336_v37, 0.0  ;;  %v10133_v22 = vld [vmem:[#allocation33_spill] sm:$0xff] }
 0x36f   : > { %10130 = vst [vmem:[#allocation59_spill] sm:$0xff] %v8336_v37  ;;  %v6830_v34 = vpop.eup %6829 }
 0x370   : > { %10131 = vst [vmem:[#allocation60_spill] sm:$0xff] %v8340_v19  ;;  %v8354_v19 = vmul.f32 0.35355338, %v8248_v55 }
 0x371   : > { %2864 = vadd.xlane.f32.xlu2 %v2863_v13  ;;  %v10132_v13 = vld [vmem:[#allocation12_spill] sm:$0xff] }
 0x372   : > { %v3131_v47 = vpop.f32.mrf.mxu1  ;;  %v6633_v20 = vpack.i.bf16 %v10133_v22, %v10132_v13  ;;  %10134 = vst [vmem:[#allocation12_spill] sm:$0xff] %v8354_v19  ;;  %v2548_v55 = vsel %vm677_vm1, %v8354_v19, -inf }
 0x373   : > { %4772 = vst.msk [vmem:[#allocation2] sm:$0xff] %vm677_vm1, %v3131_v47  ;;  %v8334_v9 = vpop.xlane.xlu2 %2843  ;;  %v2722_v47 = vmul.f32 1.442695, %v2627_v30  ;;  %v10136_v30 = vld [vmem:[#allocation8_spill] sm:$0xff] }
 0x375   : > { %6831 = vpow2.f32 %v2722_v47  ;;  %v8362_v43 = vpop.xlane.xlu0 %2531 }
 0x376   : > { %v8364_v22 = vpop.f32.mrf.mxu2  ;;  %6833 = vrcp.f32 %v8271_v59 }
 0x377   : > { %10135 = vst [vmem:[#allocation33_spill] sm:$0xff] %v8364_v22  ;;  %v8379_v22 = vpop.f32.mrf.mxu3  ;;  %6835 = vpow2.f32 %v2718_v33  ;;  %v10140_v33 = vld [vmem:[#allocation28_spill] sm:$0xff] }
 0x379   : > { %2879 = vadd.xlane.f32.xlu2 %v2878_v11 }
 0x37a   : > { %v3209_v60 = vpop.f32.mrf.mxu0 }
 0x37b   : > { %v8350_v44 = vpop.xlane.xlu2 %2825  ;;  %6634 = vrot.lane.b32.xlu0 %v6633_v20, %s7101_s26  ;;  %4775 = vst.msk [vmem:[#allocation2 + $0x18] sm:$0xff] %vm677_vm1, %v3209_v60  ;;  %v8367_v20 = vpop.xlane.xlu1 %2516  ;;  %v10137_v60 = vld [vmem:[#allocation30_spill] sm:$0xff] }
 0x37c   : > { %v6638_v11 = vpack.i.bf16 %v10137_v60, %v10136_v30  ;;  %v8375_v47 = vpop.eup %6831  ;;  %10139 = vst [vmem:[#allocation30_spill] sm:$0xff] %v8379_v22 }
 0x37d   : > { %v6834_v59 = vpop.eup %6833  ;;  %v2881_v37 = vsel %vm677_vm1, %v8375_v47, 0.0 }
 0x381   : > { %2549 = vmax.xlane.f32.xlu2 %v2548_v55  ;;  %v2630_v55 = vsub.f32 %v8103_v31, %v8294_v48  ;;  %v10141_v31 = vld [vmem:[#allocation42_spill] sm:$0xff] }
 0x382   : > { %v6643_v48 = vpack.i.bf16 %v10141_v31, %v10140_v33  ;;  %v2620_v33 = vsub.f32 %v8027_v32, %v8213_v6  ;;  %v2629_v32 = vsub.f32 %v8099_v51, %v8276_v26 }
 0x383   : > { %v8373_v13 = vpop.xlane.xlu2 %2525  ;;  %v2728_v22 = vmul.f32 1.442695, %v2630_v55 }
 0x384   : > { %10138 = vst [vmem:[#allocation8_spill] sm:$0xff] %v8373_v13  ;;  %v3313_v58 = vpop.f32.mrf.mxu0  ;;  %v3052_v13 = vmul.f32 %v6830_v34, %v8045_v56  ;;  %v8396_v56 = vpop.eup %6835 }
 0x385   : > { %4779 = vst.msk [vmem:[#allocation2 + $0x38] sm:$0xff] %vm677_vm1, %v3313_v58  ;;  %6639 = vrot.lane.b32.xlu1 %v6638_v11, %s7101_s26  ;;  %v3059_v58 = vmul.f32 %v6834_v59, %v8089_v8  ;;  %v8388_v11 = vpop.xlane.xlu1 %2534  ;;  %6837 = vpow2.f32 %v2728_v22  ;;  %v8399_v8 = vpop.f32.mrf.mxu3  ;;  %v2875_v34 = vsel %vm677_vm1, %v8396_v56, 0.0  ;;  %v2616_v59 = vsub.f32 %v7934_v4, %v8119_v1 }
 0x386   : > { %6839 = vrcp.f32 %v8298_v2 }
 0x387   : > { %v6620_v19 = vpop.permute.xlu0 %6619  ;;  %6841 = vrcp.f32 %v8334_v9  ;;  %v2700_v22 = vmul.f32 1.442695, %v2616_v59 }
 0x388   : > { %v6622_v30 = vunpack.i.h.bf16 %v6620_v19  ;;  %v6621_v15 = vunpack.i.l.bf16 %v6620_v19  ;;  %v3157_v60 = vpop.f32.mrf.mxu2 }
 0x389   : > { %4773 = vst.msk [vmem:[#allocation2 + $0x8] sm:$0xff] %vm677_vm1, %v3157_v60  ;;  %2882 = vadd.xlane.f32.xlu2 %v2881_v37  ;;  %6843 = vpow2.f32 %v2700_v22  ;;  %v2708_v22 = vmul.f32 1.442695, %v2620_v33 }
 0x38a   : > { %3337 = vmatpush.msra.mxu1 %v6621_v15  ;;  %3519 = vmatpush.msra.mxu0 %v6622_v30  ;;  %v2631_v15 = vsub.f32 %v8127_v23, %v8317_v39  ;;  %v8425_v23 = vmul.f32 0.35355338, %v8265_v17  ;;  %6845 = vrcp.f32 %v8350_v44 }
 0x38b   : > { %v8392_v19 = vpop.xlane.xlu2 %2546  ;;  %6439 = vmatmul.msk.f32.vlgmr.msra.gmra.mxu1 %vm677_vm1, %v3052_v13  ;;  %6446 = vmatmul.msk.f32.vlgmr.msra.gmra.mxu0 %vm677_vm1, %v3059_v58  ;;  %v8411_v30 = vpop.eup %6837 }
 0x38c   : > { %v2890_v58 = vsel %vm677_vm1, %v8411_v30, 0.0  ;;  %v6840_v4 = vpop.eup %6839  ;;  %v2730_v31 = vmul.f32 1.442695, %v2631_v15  ;;  %v2560_v6 = vsel %vm677_vm1, %v8425_v23, -inf }
 0x38d   : > { %6644 = vrot.lane.b32.xlu1 %v6643_v48, %s7101_s26  ;;  %v8409_v55 = vpop.xlane.xlu1 %2840  ;;  %v6842_v2 = vpop.eup %6841 }
 0x38e   : > { %v3062_v59 = vmul.f32 %v6842_v2, %v8152_v25  ;;  %6847 = vpow2.f32 %v2730_v31  ;;  %v2726_v25 = vmul.f32 1.442695, %v2629_v32 }
 0x38f   : > { %v8436_v17 = vpop.eup %6843  ;;  %6849 = vpow2.f32 %v2708_v22 }
 0x390   : > { %v3261_v37 = vpop.f32.mrf.mxu2  ;;  %v2848_v51 = vsel %vm677_vm1, %v8436_v17, 0.0  ;;  %6851 = vpow2.f32 %v2726_v25  ;;  %v10143_v25 = vld [vmem:[#allocation38_spill] sm:$0xff] }
 0x391   : > { %4777 = vst.msk [vmem:[#allocation2 + $0x28] sm:$0xff] %vm677_vm1, %v3261_v37  ;;  %2876 = vadd.xlane.f32.xlu2 %v2875_v34  ;;  %v3057_v34 = vmul.f32 %v6840_v4, %v8113_v62  ;;  %v6846_v62 = vpop.eup %6845  ;;  %v2634_v4 = vsub.f32 %v8115_v35, %v8323_v41  ;;  %v8457_v35 = vmul.f32 0.35355338, %v8321_v5  ;;  %v10142_v5 = vld [vmem:[#allocation10_spill] sm:$0xff] }
 0x393   : > { %v8406_v13 = vpop.xlane.xlu2 %2555  ;;  %v2736_v33 = vmul.f32 1.442695, %v2634_v4 }
 0x394   : > { %v8440_v26 = vpop.eup %6847 }
 0x395   : > { %v8448_v2 = vpop.eup %6849  ;;  %6853 = vpow2.f32 %v2736_v33 }
 0x396   : > { %v2860_v31 = vsel %vm677_vm1, %v8448_v2, 0.0 }
 0x398   : > { %v3183_v60 = vpop.f32.mrf.mxu3 }
 0x399   : > { %4774 = vst.msk [vmem:[#allocation2 + $0x10] sm:$0xff] %vm677_vm1, %v3183_v60  ;;  %2891 = vadd.xlane.f32.xlu2 %v2890_v58  ;;  %v3056_v58 = vmul.f32 %v6846_v62, %v8163_v16  ;;  %v8452_v16 = vpop.eup %6851 }
 0x39a   : > { %v3235_v1 = vpop.f32.mrf.mxu1 }
 0x39b   : > { %4776 = vst.msk [vmem:[#allocation2 + $0x20] sm:$0xff] %vm677_vm1, %v3235_v1  ;;  %v8422_v9 = vpop.xlane.xlu2 %2837  ;;  %v2893_v1 = vsel %vm677_vm1, %v8440_v26, 0.0 }
 0x39c   : > { %v6625_v39 = vpop.permute.xlu1 %6624 }
 0x39d   : > { %v6627_v48 = vunpack.i.h.bf16 %v6625_v39  ;;  %v6626_v37 = vunpack.i.l.bf16 %v6625_v39  ;;  %v2887_v39 = vsel %vm677_vm1, %v8452_v16, 0.0 }
 0x39f   : > { %3467 = vmatpush.msrb.mxu2 %v6626_v37  ;;  %3597 = vmatpush.msra.mxu3 %v6627_v48  ;;  %v8459_v48 = vpop.eup %6853  ;;  %v2563_v37 = vsel %vm677_vm1, %v8457_v35, -inf }
 0x3a0   : > { %6444 = vmatmul.msk.f32.vlgmr.msrb.gmra.mxu2 %vm677_vm1, %v3057_v34  ;;  %6449 = vmatmul.msk.f32.vlgmr.msra.gmra.mxu3 %vm677_vm1, %v3062_v59  ;;  %v2902_v34 = vsel %vm677_vm1, %v8459_v48, 0.0 }
 0x3a1   : > { %2561 = vmax.xlane.f32.xlu2 %v2560_v6  ;;  %v6648_v6 = vpack.i.bf16 %v7490_v29, %v10142_v5 }
 0x3a3   : > { %v6630_v44 = vpop.permute.xlu2 %6629 }
 0x3a4   : > { %v6632_v15 = vunpack.i.h.bf16 %v6630_v44  ;;  %v6631_v60 = vunpack.i.l.bf16 %v6630_v44  ;;  %v6653_v44 = vpack.i.bf16 %v7635_v61, %v10143_v25 }
 0x3a5   : > { %2849 = vadd.xlane.f32.xlu0 %v2848_v51  ;;  %v10144_v51 = vld [vmem:[#allocation34_spill] sm:$0xff] }
 0x3a6   : > { %3441 = vmatpush.msrb.mxu1 %v6631_v60  ;;  %3623 = vmatpush.msrb.mxu0 %v6632_v15  ;;  %v6658_v29 = vpack.i.bf16 %v7559_v50, %v10144_v51  ;;  %v2624_v50 = vsub.f32 %v8057_v63, %v8234_v40 }
 0x3a7   : > { %6443 = vmatmul.msk.f32.vlgmr.msrb.gmra.mxu1 %vm677_vm1, %v3056_v58  ;;  %v6663_v58 = vpack.i.bf16 %v7442_v18, %v7537_v42 }
 0x3a8   : > { %v2716_v18 = vmul.f32 1.442695, %v2624_v50 }
 0x3a9   : > { %2894 = vadd.xlane.f32.xlu2 %v2893_v1 }
 0x3ad   : > { %2861 = vadd.xlane.f32.xlu0 %v2860_v31 }
 0x3b1   : > { %2888 = vadd.xlane.f32.xlu2 %v2887_v39 }
 0x3b2   : > { %v2847_v41 = vpop.xlane.xlu0 %2846 }
 0x3b3   : > { %6855 = vrcp.f32 %v2847_v41 }
 0x3b4   : > { %6857 = vrcp.f32 %v8409_v55 }
 0x3b7   : > { %2564 = vmax.xlane.f32.xlu1 %v2563_v37 }
 0x3b9   : > { %v6856_v59 = vpop.eup %6855  ;;  %2903 = vadd.xlane.f32.xlu2 %v2902_v34  ;;  %v2628_v34 = vsub.f32 %v8085_v21, %v8260_v28 }
 0x3ba   : > { %v3063_v22 = vmul.f32 %v6856_v59, %v8218_v57  ;;  %v8467_v32 = vpop.xlane.xlu0 %2543  ;;  %v2635_v59 = vsub.f32 %v8132_v7, %v8342_v3 }
 0x3bb   : > { %v2724_v5 = vmul.f32 1.442695, %v2628_v34 }
 0x3bc   : > { %6450 = vmatmul.msk.f32.vlgmr.msrb.gmra.mxu0 %vm677_vm1, %v3063_v22  ;;  %v6858_v22 = vpop.eup %6857  ;;  %v2738_v63 = vmul.f32 1.442695, %v2635_v59  ;;  %v8543_v59 = vmul.f32 0.35355338, %v8292_v53 }
 0x3bd   : > { %v3061_v21 = vmul.f32 %v6858_v22, %v8181_v0 }
 0x3c1   : > { %6649 = vrot.lane.b32.xlu0 %v6648_v6, %s7101_s26  ;;  %v3287_v62 = vpop.f32.mrf.mxu3 }
 0x3c2   : > { %4778 = vst.msk [vmem:[#allocation2 + $0x30] sm:$0xff] %vm677_vm1, %v3287_v62  ;;  %v2856_v15 = vpop.xlane.xlu0 %2855 }
 0x3c3   : > { %6859 = vrcp.f32 %v2856_v15  ;;  %v2638_v15 = vsub.f32 %v8148_v46, %v8362_v43 }
 0x3c4   : > { %6861 = vpow2.f32 %v2716_v18 }
 0x3c5   : > { %6863 = vpow2.f32 %v2724_v5  ;;  %v2744_v0 = vmul.f32 1.442695, %v2638_v15 }
 0x3c6   : > { %6865 = vpow2.f32 %v2738_v63  ;;  %v2569_v63 = vsel %vm677_vm1, %v8543_v59, -inf }
 0x3c7   : > { %v8483_v4 = vpop.xlane.xlu1 %2540  ;;  %6867 = vrcp.f32 %v8422_v9 }
 0x3c9   : > { %6654 = vrot.lane.b32.xlu0 %v6653_v44, %s7101_s26  ;;  %v3391_v60 = vpop.f32.mrf.mxu3  ;;  %v3365_v57 = vpop.f32.mrf.mxu2 }
 0x3ca   : > { %4782 = vst.msk [vmem:[#allocation2 + $0x50] sm:$0xff] %vm677_vm1, %v3391_v60  ;;  %v2859_v61 = vpop.xlane.xlu0 %2858  ;;  %v6860_v6 = vpop.eup %6859  ;;  %v8523_v60 = vmul.f32 0.35355338, %v8356_v27 }
 0x3cb   : > { %4781 = vst.msk [vmem:[#allocation2 + $0x48] sm:$0xff] %vm677_vm1, %v3365_v57  ;;  %v8504_v44 = vpop.eup %6861  ;;  %v3066_v7 = vmul.f32 %v6860_v6, %v8244_v38  ;;  %6869 = vrcp.f32 %v2859_v61 }
 0x3cc   : > { %v2872_v46 = vsel %vm677_vm1, %v8504_v44, 0.0  ;;  %v8520_v43 = vpop.eup %6863  ;;  %6871 = vpow2.f32 %v2744_v0  ;;  %v2566_v27 = vsel %vm677_vm1, %v8523_v60, -inf }
 0x3cd   : > { %v8525_v9 = vpop.eup %6865 }
 0x3ce   : > { %v6868_v57 = vpop.eup %6867  ;;  %v2905_v50 = vsel %vm677_vm1, %v8525_v9, 0.0 }
 0x3cf   : > { %v8486_v1 = vpop.xlane.xlu1 %2558  ;;  %v3060_v18 = vmul.f32 %v6868_v57, %v8206_v54 }
 0x3d0   : > { %6659 = vrot.lane.b32.xlu1 %v6658_v29, %s7101_s26 }
 0x3d1   : > { %6664 = vrot.lane.b32.xlu2 %v6663_v58, %s7101_s26  ;;  %v6870_v29 = vpop.eup %6869  ;;  %v2632_v58 = vsub.f32 %v8105_v49, %v8280_v52  ;;  %v2884_v49 = vsel %vm677_vm1, %v8520_v43, 0.0 }
 0x3d2   : > { %v2853_v33 = vpop.xlane.xlu0 %2852  ;;  %v3067_v34 = vmul.f32 %v6870_v29, %v8258_v12  ;;  %v10148_v29 = vld [vmem:[#allocation22_spill] sm:$0xff] }
 0x3d3   : > { %6873 = vrcp.f32 %v2853_v33  ;;  %v2732_v52 = vmul.f32 1.442695, %v2632_v58 }
 0x3d7   : > { %v8496_v42 = vpop.xlane.xlu1 %2552 }
 0x3da   : > { %v2868_v37 = vpop.xlane.xlu0 %2867 }
 0x3db   : > { %v3417_v31 = vpop.f32.mrf.mxu0  ;;  %6875 = vrcp.f32 %v2868_v37  ;;  %v8540_v37 = vpop.eup %6871 }
 0x3dc   : > { %v8488_v39 = vpop.xlane.xlu2 %2537  ;;  %4783 = vst.msk [vmem:[#allocation2 + $0x58] sm:$0xff] %vm677_vm1, %v3417_v31  ;;  %v6874_v54 = vpop.eup %6873  ;;  %6877 = vpow2.f32 %v2732_v52 }
 0x3df   : > { %v8510_v28 = vpop.xlane.xlu1 %2870 }
 0x3e0   : > { %6879 = vrcp.f32 %v8510_v28 }
 0x3e1   : > { %v6876_v12 = vpop.eup %6875 }
 0x3e2   : > { %v8554_v15 = vpop.eup %6877 }
 0x3e4   : > { %v8493_v41 = vpop.xlane.xlu2 %2864 }
 0x3ec   : > { %v8502_v40 = vpop.xlane.xlu2 %2879 }
 0x3ed   : > { %v6635_v62 = vpop.permute.xlu0 %6634 }
 0x3ee   : > { %v6637_v25 = vunpack.i.h.bf16 %v6635_v62  ;;  %v6636_v55 = vunpack.i.l.bf16 %v6635_v62  ;;  %v2914_v62 = vsel %vm677_vm1, %v8540_v37, 0.0 }
 0x3f0   : > { %3571 = vmatpush.msra.mxu2 %v6636_v55  ;;  %3701 = vmatpush.msrb.mxu3 %v6637_v25  ;;  %v3065_v25 = vmul.f32 %v6874_v54, %v8274_v45  ;;  %v3070_v55 = vmul.f32 %v6876_v12, %v8296_v36  ;;  %v2896_v45 = vsel %vm677_vm1, %v8554_v15, 0.0  ;;  %v2633_v54 = vsub.f32 %v8146_v10, %v8367_v20 }
 0x3f1   : > { %v3495_v3 = vpop.f32.mrf.mxu3  ;;  %6448 = vmatmul.msk.f32.vlgmr.msra.gmra.mxu2 %vm677_vm1, %v3061_v21  ;;  %6453 = vmatmul.msk.f32.vlgmr.msrb.gmra.mxu3 %vm677_vm1, %v3066_v7 }
 0x3f2   : > { %4786 = vst.msk [vmem:[#allocation2 + $0x70] sm:$0xff] %vm677_vm1, %v3495_v3  ;;  %v10145_v3 = vld [vmem:[#allocation48_spill] sm:$0xff] }
 0x3f3   : > { %2873 = vadd.xlane.f32.xlu0 %v2872_v46  ;;  %v10146_v46 = vld [vmem:[#allocation15_spill] sm:$0xff] }
 0x3f4   : > { %v8518_v38 = vpop.xlane.xlu2 %2549  ;;  %v6668_v0 = vpack.i.bf16 %v10146_v46, %v10145_v3 }
 0x3f7   : > { %v6640_v51 = vpop.permute.xlu1 %6639 }
 0x3f8   : > { %v6642_v61 = vunpack.i.h.bf16 %v6640_v51  ;;  %v6641_v31 = vunpack.i.l.bf16 %v6640_v51  ;;  %v10147_v51 = vld [vmem:[#allocation13_spill] sm:$0xff] }
 0x3f9   : > { %v6673_v58 = vpack.i.bf16 %v10148_v29, %v10147_v51  ;;  %v10154_v51 = vld [vmem:[#allocation8_spill] sm:$0xff]  ;;  %v10155_v29 = vld [vmem:[#allocation25_spill] sm:$0xff] }
 0x3fa   : > { %2906 = vadd.xlane.f32.xlu2 %v2905_v50  ;;  %2567 = vmax.xlane.f32.xlu1 %v2566_v27  ;;  %v10150_v50 = vld [vmem:[#allocation32_spill] sm:$0xff] }
 0x3fb   : > { %3545 = vmatpush.msra.mxu1 %v6641_v31  ;;  %3727 = vmatpush.msra.mxu0 %v6642_v61  ;;  %v10149_v31 = vld [vmem:[#allocation11_spill] sm:$0xff] }
 0x3fc   : > { %2885 = vadd.xlane.f32.xlu0 %v2884_v49  ;;  %6447 = vmatmul.msk.f32.vlgmr.msra.gmra.mxu1 %vm677_vm1, %v3060_v18  ;;  %v8538_v33 = vpop.xlane.xlu2 %2882  ;;  %v6678_v27 = vpack.i.bf16 %v10150_v50, %v10149_v31 }
 0x3fd   : > { %6454 = vmatmul.msk.f32.vlgmr.msra.gmra.mxu0 %vm677_vm1, %v3067_v34 }
 0x3ff   : > { %v6645_v22 = vpop.permute.xlu1 %6644 }
 0x400   : > { %v6647_v5 = vunpack.i.h.bf16 %v6645_v22  ;;  %v6646_v6 = vunpack.i.l.bf16 %v6645_v22  ;;  %v2734_v22 = vmul.f32 1.442695, %v2633_v54  ;;  %v10157_v54 = vld [vmem:[#allocation59_spill] sm:$0xff] }
 0x402   : > { %2570 = vmax.xlane.f32.xlu2 %v2569_v63  ;;  %2915 = vadd.xlane.f32.xlu1 %v2914_v62  ;;  %v10151_v63 = vld [vmem:[#allocation52_spill] sm:$0xff] }
 0x403   : > { %3675 = vmatpush.msrb.mxu2 %v6646_v6  ;;  %3805 = vmatpush.msra.mxu3 %v6647_v5  ;;  %v2637_v5 = vsub.f32 %v8130_v24, %v8338_v14  ;;  %v6880_v6 = vpop.eup %6879  ;;  %v2639_v62 = vsub.f32 %v10151_v63, %v8388_v11  ;;  %v10153_v11 = vld [vmem:[#allocation56_spill] sm:$0xff] }
 0x404   : > { %6452 = vmatmul.msk.f32.vlgmr.msrb.gmra.mxu2 %vm677_vm1, %v3065_v25  ;;  %6457 = vmatmul.msk.f32.vlgmr.msra.gmra.mxu3 %vm677_vm1, %v3070_v55  ;;  %v2877_v53 = vpop.xlane.xlu2 %2876 }
 0x405   : > { %v2742_v10 = vmul.f32 1.442695, %v2637_v5 }
 0x408   : > { %v3339_v21 = vpop.f32.mrf.mxu1  ;;  %v3521_v7 = vpop.f32.mrf.mxu0 }
 0x409   : > { %4780 = vst.msk [vmem:[#allocation2 + $0x40] sm:$0xff] %vm677_vm1, %v3339_v21 }
 0x40a   : > { %4787 = vst.msk [vmem:[#allocation2 + $0x78] sm:$0xff] %vm677_vm1, %v3521_v7  ;;  %2897 = vadd.xlane.f32.xlu2 %v2896_v45  ;;  %v2746_v7 = vmul.f32 1.442695, %v2639_v62  ;;  %v10152_v45 = vld [vmem:[#allocation17_spill] sm:$0xff] }
 0x40b   : > { %v3071_v3 = vmul.f32 %v6880_v6, %v10152_v45 }
 0x40c   : > { %v2892_v36 = vpop.xlane.xlu2 %2891 }
 0x410   : > { %6669 = vrot.lane.b32.xlu0 %v6668_v0, %s7101_s26 }
 0x414   : > { %v8563_v57 = vpop.xlane.xlu2 %2561 }
 0x418   : > { %v2850_v18 = vpop.xlane.xlu0 %2849 }
 0x419   : > { %6881 = vrcp.f32 %v2850_v18 }
 0x41a   : > { %6883 = vpow2.f32 %v2734_v22 }
 0x41b   : > { %6674 = vrot.lane.b32.xlu1 %v6673_v58, %s7101_s26  ;;  %6885 = vrcp.f32 %v8493_v41  ;;  %v2642_v41 = vsub.f32 %v10153_v11, %v8467_v32  ;;  %v2636_v58 = vsub.f32 %v10155_v29, %v10154_v51 }
 0x41c   : > { %v8568_v61 = vpop.xlane.xlu2 %2894  ;;  %6887 = vrcp.f32 %v8502_v40 }
 0x41d   : > { %6889 = vpow2.f32 %v2742_v10 }
 0x41e   : > { %6891 = vpow2.f32 %v2746_v7 }
 0x41f   : > { %v6882_v55 = vpop.eup %6881  ;;  %6893 = vrcp.f32 %v8538_v33 }
 0x420   : > { %v2862_v12 = vpop.xlane.xlu0 %2861  ;;  %v3064_v24 = vmul.f32 %v6882_v55, %v8436_v17  ;;  %v8590_v14 = vpop.eup %6883 }
 0x421   : > { %v6886_v40 = vpop.eup %6885  ;;  %v2899_v46 = vsel %vm677_vm1, %v8590_v14, 0.0  ;;  %6895 = vrcp.f32 %v2862_v12  ;;  %v2740_v12 = vmul.f32 1.442695, %v2636_v58 }
 0x422   : > { %6679 = vrot.lane.b32.xlu2 %v6678_v27, %s7101_s26  ;;  %v6888_v0 = vpop.eup %6887  ;;  %v2752_v27 = vmul.f32 1.442695, %v2642_v41  ;;  %6897 = vrcp.f32 %v2877_v53 }
 0x423   : > { %v3469_v34 = vpop.f32.mrf.mxu2  ;;  %v3074_v22 = vmul.f32 %v6888_v0, %v10157_v54  ;;  %6899 = vrcp.f32 %v2892_v36  ;;  %v8605_v5 = vpop.eup %6889  ;;  %v10158_v36 = vld [vmem:[#allocation53_spill] sm:$0xff]  ;;  %v10163_v54 = vld [vmem:[#allocation14_spill] sm:$0xff] }
 0x424   : > { %4785 = vst.msk [vmem:[#allocation2 + $0x68] sm:$0xff] %vm677_vm1, %v3469_v34  ;;  %v3443_v49 = vpop.f32.mrf.mxu1  ;;  %v8575_v52 = vpop.xlane.xlu2 %2888  ;;  %v10156_v34 = vld [vmem:[#allocation57_spill] sm:$0xff]  ;;  %6901 = vpow2.f32 %v2752_v27  ;;  %v2641_v55 = vsub.f32 %v10158_v36, %v8483_v4 }
 0x425   : > { %4784 = vst.msk [vmem:[#allocation2 + $0x60] sm:$0xff] %vm677_vm1, %v3443_v49  ;;  %v3069_v49 = vmul.f32 %v6886_v40, %v10156_v34  ;;  %v8607_v63 = vpop.eup %6891  ;;  %6903 = vpow2.f32 %v2740_v12  ;;  %v10162_v34 = vld [vmem:[#allocation44_spill] sm:$0xff]  ;;  %v10165_v12 = vld [vmem:[#allocation46_spill] sm:$0xff]  ;;  %v10167_v36 = vld [vmem:[#allocation49_spill] sm:$0xff] }
 0x426   : > { %v6894_v53 = vpop.eup %6893  ;;  %v2750_v11 = vmul.f32 1.442695, %v2641_v55 }
 0x427   : > { %v6896_v62 = vpop.eup %6895  ;;  %v3075_v41 = vmul.f32 %v6894_v53, %v8375_v47 }
 0x428   : > { %v6898_v10 = vpop.eup %6897  ;;  %6905 = vpow2.f32 %v2750_v11 }
 0x429   : > { %v3073_v4 = vmul.f32 %v6898_v10, %v8396_v56  ;;  %v10160_v56 = vld [vmem:[#allocation55_spill] sm:$0xff] }
 0x42a   : > { %v8599_v17 = vpop.xlane.xlu1 %2564 }
 0x42c   : > { %v8584_v25 = vpop.xlane.xlu2 %2903 }
 0x433   : > { %v6650_v21 = vpop.permute.xlu0 %6649 }
 0x434   : > { %v6652_v20 = vunpack.i.h.bf16 %v6650_v21  ;;  %v6651_v28 = vunpack.i.l.bf16 %v6650_v21  ;;  %v6665_v31 = vpop.permute.xlu2 %6664  ;;  %v2911_v21 = vsel %vm677_vm1, %v8605_v5, 0.0 }
 0x435   : > { %v6667_v33 = vunpack.i.h.bf16 %v6665_v31  ;;  %v6666_v6 = vunpack.i.l.bf16 %v6665_v31 }
 0x436   : > { %3649 = vmatpush.msrb.mxu1 %v6651_v28  ;;  %3831 = vmatpush.msrb.mxu0 %v6652_v20  ;;  %v6900_v28 = vpop.eup %6899 }
 0x437   : > { %6451 = vmatmul.msk.f32.vlgmr.msrb.gmra.mxu1 %vm677_vm1, %v3064_v24  ;;  %6458 = vmatmul.msk.f32.vlgmr.msrb.gmra.mxu0 %vm677_vm1, %v3071_v3  ;;  %v3068_v3 = vmul.f32 %v6896_v62, %v8448_v2  ;;  %v2917_v24 = vsel %vm677_vm1, %v8607_v63, 0.0  ;;  %v8620_v40 = vpop.eup %6901  ;;  %v3078_v51 = vmul.f32 %v6900_v28, %v8411_v30  ;;  %v2646_v2 = vsub.f32 %v10160_v56, %v8406_v13  ;;  %v10166_v62 = vld [vmem:[#allocation18_spill] sm:$0xff]  ;;  %v10168_v28 = vld [vmem:[#allocation43_spill] sm:$0xff] }
 0x438   : > { %v8630_v47 = vpop.eup %6903  ;;  %v2926_v29 = vsel %vm677_vm1, %v8620_v40, 0.0  ;;  %v6693_v55 = vpack.i.bf16 %v10167_v36, %v10166_v62 }
 0x439   : > { %v2908_v58 = vsel %vm677_vm1, %v8630_v47, 0.0  ;;  %v2760_v31 = vmul.f32 1.442695, %v2646_v2 }
 0x43a   : > { %2900 = vadd.xlane.f32.xlu0 %v2899_v46  ;;  %v10159_v46 = vld [vmem:[#allocation60_spill] sm:$0xff] }
 0x43b   : > { %v6655_v50 = vpop.permute.xlu0 %6654  ;;  %v8623_v0 = vmul.f32 0.35355338, %v10159_v46  ;;  %6907 = vpow2.f32 %v2760_v31  ;;  %v10171_v46 = vld [vmem:[#allocation54_spill] sm:$0xff] }
 0x43c   : > { %v6657_v32 = vunpack.i.h.bf16 %v6655_v50  ;;  %v6656_v18 = vunpack.i.l.bf16 %v6655_v50  ;;  %v8640_v50 = vpop.eup %6905  ;;  %6909 = vrcp.f32 %v8568_v61 }
 0x43d   : > { %v2575_v30 = vsel %vm677_vm1, %v8623_v0, -inf  ;;  %v2923_v13 = vsel %vm677_vm1, %v8640_v50, 0.0 }
 0x43e   : > { %3779 = vmatpush.msra.mxu2 %v6656_v18  ;;  %3909 = vmatpush.msrb.mxu3 %v6657_v32  ;;  %v10161_v18 = vld [vmem:[#allocation31_spill] sm:$0xff] }
 0x43f   : > { %6456 = vmatmul.msk.f32.vlgmr.msra.gmra.mxu2 %vm677_vm1, %v3069_v49  ;;  %6461 = vmatmul.msk.f32.vlgmr.msrb.gmra.mxu3 %vm677_vm1, %v3074_v22  ;;  %v6683_v49 = vpack.i.bf16 %v10162_v34, %v10161_v18  ;;  %v8651_v22 = vmul.f32 0.35355338, %v10163_v54  ;;  %v10173_v54 = vld [vmem:[#allocation9_spill] sm:$0xff] }
 0x440   : > { %3883 = vmatpush.msrb.mxu2 %v6666_v6  ;;  %4013 = vmatpush.msra.mxu3 %v6667_v33  ;;  %v10164_v6 = vld [vmem:[#allocation16_spill] sm:$0xff] }
 0x441   : > { %v8644_v27 = vpop.eup %6907  ;;  %v2572_v33 = vsel %vm677_vm1, %v8651_v22, -inf  ;;  %v6688_v53 = vpack.i.bf16 %v10165_v12, %v10164_v6 }
 0x442   : > { %2912 = vadd.xlane.f32.xlu0 %v2911_v21  ;;  %v6660_v20 = vpop.permute.xlu1 %6659  ;;  %v2938_v32 = vsel %vm677_vm1, %v8644_v27, 0.0  ;;  %v6910_v2 = vpop.eup %6909 }
 0x443   : > { %v6662_v7 = vunpack.i.h.bf16 %v6660_v20  ;;  %v6661_v45 = vunpack.i.l.bf16 %v6660_v20 }
 0x445   : > { %2918 = vadd.xlane.f32.xlu1 %v2917_v24  ;;  %3753 = vmatpush.msra.mxu1 %v6661_v45  ;;  %v10169_v45 = vld [vmem:[#allocation37_spill] sm:$0xff] }
 0x446   : > { %3935 = vmatpush.msra.mxu0 %v6662_v7  ;;  %6455 = vmatmul.msk.f32.vlgmr.msra.gmra.mxu1 %vm677_vm1, %v3068_v3  ;;  %v2643_v7 = vsub.f32 %v10168_v28, %v8392_v19  ;;  %v10170_v3 = vld [vmem:[#allocation41_spill] sm:$0xff] }
 0x447   : > { %6462 = vmatmul.msk.f32.vlgmr.msra.gmra.mxu0 %vm677_vm1, %v3075_v41  ;;  %6460 = vmatmul.msk.f32.vlgmr.msrb.gmra.mxu2 %vm677_vm1, %v3073_v4  ;;  %v6698_v24 = vpack.i.bf16 %v10170_v3, %v10169_v45 }
 0x448   : > { %6465 = vmatmul.msk.f32.vlgmr.msra.gmra.mxu3 %vm677_vm1, %v3078_v51  ;;  %v2754_v11 = vmul.f32 1.442695, %v2643_v7  ;;  %v2647_v51 = vsub.f32 %v10171_v46, %v8486_v1  ;;  %v10172_v1 = vld [vmem:[#allocation3_spill] sm:$0xff]  ;;  %v10175_v46 = vld [vmem:[#allocation36_spill] sm:$0xff] }
 0x449   : > { %v2645_v18 = vsub.f32 %v10172_v1, %v8496_v42 }
 0x44a   : > { %2927 = vadd.xlane.f32.xlu0 %v2926_v29  ;;  %v2762_v29 = vmul.f32 1.442695, %v2647_v51  ;;  %v10176_v51 = vld [vmem:[#allocation20_spill] sm:$0xff] }
 0x44b   : > { %2576 = vmax.xlane.f32.xlu2 %v2575_v30 }
 0x44d   : > { %2909 = vadd.xlane.f32.xlu1 %v2908_v58 }
 0x453   : > { %2924 = vadd.xlane.f32.xlu2 %v2923_v13  ;;  %v3079_v13 = vmul.f32 %v6910_v2, %v8440_v26  ;;  %v6703_v2 = vpack.i.bf16 %v10176_v51, %v10175_v46 }
 0x45b   : > { %2939 = vadd.xlane.f32.xlu2 %v2938_v32 }
 0x45e   : > { %6684 = vrot.lane.b32.xlu0 %v6683_v49, %s7101_s26 }
 0x463   : > { %2573 = vmax.xlane.f32.xlu2 %v2572_v33  ;;  %v2640_v33 = vsub.f32 %v10173_v54, %v8488_v39 }
 0x465   : > { %v2748_v39 = vmul.f32 1.442695, %v2640_v33 }
 0x466   : > { %6689 = vrot.lane.b32.xlu1 %v6688_v53, %s7101_s26  ;;  %v2874_v10 = vpop.xlane.xlu0 %2873  ;;  %v2758_v53 = vmul.f32 1.442695, %v2645_v18 }
 0x467   : > { %6911 = vrcp.f32 %v2874_v10 }
 0x468   : > { %6913 = vpow2.f32 %v2754_v11 }
 0x46d   : > { %v2907_v21 = vpop.xlane.xlu2 %2906  ;;  %v8669_v4 = vpop.xlane.xlu1 %2567 }
 0x46e   : > { %6694 = vrot.lane.b32.xlu1 %v6693_v55, %s7101_s26  ;;  %v6912_v19 = vpop.eup %6911  ;;  %6915 = vrcp.f32 %v2907_v21 }
 0x46f   : > { %v2886_v41 = vpop.xlane.xlu0 %2885  ;;  %v8676_v31 = vpop.eup %6913  ;;  %v3072_v32 = vmul.f32 %v6912_v19, %v8504_v44  ;;  %v10177_v19 = vld [vmem:[#allocation29_spill] sm:$0xff] }
 0x470   : > { %6917 = vrcp.f32 %v2886_v41  ;;  %v2929_v26 = vsel %vm677_vm1, %v8676_v31, 0.0 }
 0x471   : > { %6919 = vpow2.f32 %v2762_v29  ;;  %v10178_v29 = vld [vmem:[#allocation23_spill] sm:$0xff] }
 0x472   : > { %6921 = vrcp.f32 %v8575_v52 }
 0x473   : > { %6923 = vrcp.f32 %v8584_v25 }
 0x474   : > { %v6916_v42 = vpop.eup %6915  ;;  %6925 = vpow2.f32 %v2758_v53 }
 0x475   : > { %v8662_v20 = vpop.xlane.xlu2 %2570  ;;  %v2916_v34 = vpop.xlane.xlu1 %2915  ;;  %v3083_v36 = vmul.f32 %v6916_v42, %v8525_v9  ;;  %6927 = vpow2.f32 %v2748_v39 }
 0x476   : > { %v6918_v44 = vpop.eup %6917  ;;  %6929 = vrcp.f32 %v2916_v34 }
 0x477   : > { %v8690_v62 = vpop.eup %6919  ;;  %v3076_v55 = vmul.f32 %v6918_v44, %v8520_v43 }
 0x478   : > { %v6922_v52 = vpop.eup %6921  ;;  %v2941_v45 = vsel %vm677_vm1, %v8690_v62, 0.0 }
 0x479   : > { %v6924_v21 = vpop.eup %6923  ;;  %v3077_v7 = vmul.f32 %v6922_v52, %v8452_v16 }
 0x47a   : > { %v3082_v3 = vmul.f32 %v6924_v21, %v8459_v48  ;;  %v8702_v43 = vpop.eup %6925  ;;  %v10174_v48 = vld [vmem:[#allocation30_spill] sm:$0xff] }
 0x47b   : > { %6699 = vrot.lane.b32.xlu2 %v6698_v24, %s7101_s26  ;;  %v8704_v9 = vpop.eup %6927  ;;  %v2935_v24 = vsel %vm677_vm1, %v8702_v43, 0.0  ;;  %v8711_v11 = vmul.f32 0.35355338, %v10174_v48 }
 0x47c   : > { %v2920_v16 = vsel %vm677_vm1, %v8704_v9, 0.0  ;;  %v6930_v53 = vpop.eup %6929 }
 0x47d   : > { %v8674_v56 = vpop.xlane.xlu2 %2897  ;;  %v2578_v41 = vsel %vm677_vm1, %v8711_v11, -inf }
 0x482   : > { %v6670_v30 = vpop.permute.xlu0 %6669 }
 0x483   : > { %v6672_v58 = vunpack.i.h.bf16 %v6670_v30  ;;  %v6671_v61 = vunpack.i.l.bf16 %v6670_v30  ;;  %v6708_v30 = vpack.i.bf16 %v10178_v29, %v10177_v19 }
 0x485   : > { %3857 = vmatpush.msrb.mxu1 %v6671_v61  ;;  %4039 = vmatpush.msrb.mxu0 %v6672_v58  ;;  %v6680_v49 = vpop.permute.xlu2 %6679  ;;  %v10179_v61 = vld [vmem:[#allocation5_spill] sm:$0xff] }
 0x486   : > { %v6682_v6 = vunpack.i.h.bf16 %v6680_v49  ;;  %v6681_v12 = vunpack.i.l.bf16 %v6680_v49  ;;  %6459 = vmatmul.msk.f32.vlgmr.msrb.gmra.mxu1 %vm677_vm1, %v3072_v32  ;;  %6466 = vmatmul.msk.f32.vlgmr.msrb.gmra.mxu0 %vm677_vm1, %v3079_v13  ;;  %v10180_v13 = vld [vmem:[#allocation4_spill] sm:$0xff] }
 0x487   : > { %v6713_v32 = vpack.i.bf16 %v10180_v13, %v10179_v61  ;;  %v10181_v49 = vld [vmem:[#allocation12_spill] sm:$0xff]  ;;  %v10183_v61 = vld [vmem:[#allocation33_spill] sm:$0xff] }
 0x488   : > { %2930 = vadd.xlane.f32.xlu0 %v2929_v26  ;;  %3961 = vmatpush.msra.mxu1 %v6681_v12  ;;  %v2644_v54 = vsub.f32 %v10181_v49, %v8518_v38  ;;  %v2649_v26 = vsub.f32 %v8457_v35, %v8599_v17  ;;  %v3086_v17 = vmul.f32 %v6930_v53, %v8540_v37  ;;  %v8767_v13 = vmul.f32 0.35355338, %v10183_v61 }
 0x489   : > { %4143 = vmatpush.msra.mxu0 %v6682_v6 }
 0x48a   : > { %v2756_v12 = vmul.f32 1.442695, %v2644_v54  ;;  %v2766_v44 = vmul.f32 1.442695, %v2649_v26 }
 0x48d   : > { %v6675_v25 = vpop.permute.xlu1 %6674 }
 0x48e   : > { %v6677_v10 = vunpack.i.h.bf16 %v6675_v25  ;;  %v6676_v28 = vunpack.i.l.bf16 %v6675_v25  ;;  %6463 = vmatmul.msk.f32.vlgmr.msra.gmra.mxu1 %vm677_vm1, %v3076_v55  ;;  %6470 = vmatmul.msk.f32.vlgmr.msra.gmra.mxu0 %vm677_vm1, %v3083_v36  ;;  %v2650_v36 = vsub.f32 %v8523_v60, %v8669_v4  ;;  %v2648_v60 = vsub.f32 %v8425_v23, %v8563_v57 }
 0x48f   : > { %v2651_v57 = vsub.f32 %v8543_v59, %v8662_v20 }
 0x490   : > { %2942 = vadd.xlane.f32.xlu0 %v2941_v45  ;;  %3987 = vmatpush.msra.mxu2 %v6676_v28 }
 0x491   : > { %4117 = vmatpush.msrb.mxu3 %v6677_v10  ;;  %6464 = vmatmul.msk.f32.vlgmr.msra.gmra.mxu2 %vm677_vm1, %v3077_v7  ;;  %v2768_v10 = vmul.f32 1.442695, %v2650_v36  ;;  %v10182_v7 = vld [vmem:[#allocation7_spill] sm:$0xff]  ;;  %v2770_v59 = vmul.f32 1.442695, %v2651_v57 }
 0x492   : > { %6469 = vmatmul.msk.f32.vlgmr.msrb.gmra.mxu3 %vm677_vm1, %v3082_v3  ;;  %v8752_v45 = vmul.f32 0.35355338, %v10182_v7  ;;  %v2764_v3 = vmul.f32 1.442695, %v2648_v60  ;;  %v10186_v60 = vld [vmem:[#allocation24_spill] sm:$0xff] }
 0x498   : > { %2936 = vadd.xlane.f32.xlu0 %v2935_v24  ;;  %2921 = vadd.xlane.f32.xlu1 %v2920_v16 }
 0x4a4   : > { %2579 = vmax.xlane.f32.xlu2 %v2578_v41 }
 0x4ac   : > { %6704 = vrot.lane.b32.xlu0 %v6703_v2, %s7101_s26 }
 0x4ad   : > { %v2901_v58 = vpop.xlane.xlu0 %2900 }
 0x4ae   : > { %6931 = vrcp.f32 %v2901_v58 }
 0x4af   : > { %6933 = vpow2.f32 %v2756_v12 }
 0x4b0   : > { %6935 = vpow2.f32 %v2766_v44 }
 0x4b1   : > { %6709 = vrot.lane.b32.xlu1 %v6708_v30, %s7101_s26  ;;  %6937 = vrcp.f32 %v8674_v56 }
 0x4b4   : > { %v6932_v52 = vpop.eup %6931 }
 0x4b5   : > { %v2913_v1 = vpop.xlane.xlu0 %2912  ;;  %v8737_v35 = vpop.eup %6933  ;;  %v3081_v34 = vmul.f32 %v6932_v52, %v8590_v14 }
 0x4b6   : > { %v2932_v4 = vsel %vm677_vm1, %v8737_v35, 0.0  ;;  %v8747_v56 = vpop.eup %6935 }
 0x4b7   : > { %v6938_v14 = vpop.eup %6937  ;;  %v2947_v41 = vsel %vm677_vm1, %v8747_v56, 0.0 }
 0x4b8   : > { %v2919_v33 = vpop.xlane.xlu1 %2918  ;;  %v3080_v48 = vmul.f32 %v6938_v14, %v8554_v15  ;;  %v2581_v15 = vsel %vm677_vm1, %v8752_v45, -inf }
 0x4b9   : > { %6939 = vrcp.f32 %v2919_v33 }
 0x4ba   : > { %6941 = vpow2.f32 %v2768_v10 }
 0x4bb   : > { %6943 = vrcp.f32 %v2913_v1 }
 0x4bc   : > { %6714 = vrot.lane.b32.xlu2 %v6713_v32, %s7101_s26 }
 0x4bd   : > { %v2928_v42 = vpop.xlane.xlu0 %2927 }
 0x4be   : > { %v8724_v18 = vpop.xlane.xlu2 %2576 }
 0x4bf   : > { %v6940_v28 = vpop.eup %6939 }
 0x4c0   : > { %v2910_v38 = vpop.xlane.xlu1 %2909  ;;  %v3087_v46 = vmul.f32 %v6940_v28, %v8607_v63  ;;  %v8761_v51 = vpop.eup %6941 }
 0x4c1   : > { %6945 = vrcp.f32 %v2910_v38  ;;  %v6944_v20 = vpop.eup %6943  ;;  %v2950_v33 = vsel %vm677_vm1, %v8761_v51, 0.0 }
 0x4c2   : > { %6947 = vrcp.f32 %v2928_v42  ;;  %v3085_v12 = vmul.f32 %v6944_v20, %v8605_v5  ;;  %v2653_v42 = vsub.f32 %v8623_v0, %v8724_v18  ;;  %v8788_v0 = vmul.f32 0.35355338, %v8399_v8 }
 0x4c3   : > { %6949 = vpow2.f32 %v2764_v3 }
 0x4c4   : > { %6951 = vpow2.f32 %v2770_v59  ;;  %v2774_v44 = vmul.f32 1.442695, %v2653_v42  ;;  %v2590_v52 = vsel %vm677_vm1, %v8788_v0, -inf  ;;  %v10191_v42 = vld [vmem:[#allocation39_spill] sm:$0xff] }
 0x4c6   : > { %v8728_v6 = vpop.xlane.xlu2 %2924  ;;  %6953 = vpow2.f32 %v2774_v44 }
 0x4c7   : > { %v6946_v19 = vpop.eup %6945 }
 0x4c8   : > { %v6948_v30 = vpop.eup %6947  ;;  %v3084_v54 = vmul.f32 %v6946_v19, %v8630_v47  ;;  %v2587_v47 = vsel %vm677_vm1, %v8767_v13, -inf }
 0x4c9   : > { %v8769_v49 = vpop.eup %6949  ;;  %v3090_v26 = vmul.f32 %v6948_v30, %v8620_v40 }
 0x4ca   : > { %v2944_v5 = vsel %vm677_vm1, %v8769_v49, 0.0  ;;  %v8785_v40 = vpop.eup %6951 }
 0x4cb   : > { %v2953_v18 = vsel %vm677_vm1, %v8785_v40, 0.0 }
 0x4cc   : > { %v8796_v38 = vpop.eup %6953 }
 0x4cd   : > { %v2959_v8 = vsel %vm677_vm1, %v8796_v38, 0.0 }
 0x4ce   : > { %v8732_v39 = vpop.xlane.xlu2 %2939 }
 0x4d0   : > { %v6685_v55 = vpop.permute.xlu0 %6684 }
 0x4d1   : > { %v6687_v21 = vunpack.i.h.bf16 %v6685_v55  ;;  %v6686_v25 = vunpack.i.l.bf16 %v6685_v55  ;;  %v10184_v55 = vld [vmem:[#allocation19_spill] sm:$0xff] }
 0x4d3   : > { %4091 = vmatpush.msrb.mxu2 %v6686_v25  ;;  %4221 = vmatpush.msra.mxu3 %v6687_v21  ;;  %v10185_v21 = vld [vmem:[#allocation26_spill] sm:$0xff] }
 0x4d4   : > { %6468 = vmatmul.msk.f32.vlgmr.msrb.gmra.mxu2 %vm677_vm1, %v3081_v34  ;;  %6473 = vmatmul.msk.f32.vlgmr.msra.gmra.mxu3 %vm677_vm1, %v3086_v17  ;;  %v6718_v25 = vpack.i.bf16 %v10185_v21, %v10184_v55 }
 0x4d6   : > { %2933 = vadd.xlane.f32.xlu0 %v2932_v4  ;;  %v8749_v37 = vpop.xlane.xlu2 %2573  ;;  %v10187_v4 = vld [vmem:[#allocation35_spill] sm:$0xff] }
 0x4d7   : > { %v2652_v53 = vsub.f32 %v8651_v22, %v8749_v37  ;;  %v6723_v37 = vpack.i.bf16 %v10187_v4, %v10186_v60 }
 0x4d8   : > { %v6690_v23 = vpop.permute.xlu1 %6689 }
 0x4d9   : > { %v6692_v24 = vunpack.i.h.bf16 %v6690_v23  ;;  %v6691_v16 = vunpack.i.l.bf16 %v6690_v23  ;;  %v2772_v36 = vmul.f32 1.442695, %v2652_v53 }
 0x4db   : > { %2948 = vadd.xlane.f32.xlu1 %v2947_v41  ;;  %4065 = vmatpush.msrb.mxu1 %v6691_v16  ;;  %6955 = vpow2.f32 %v2772_v36  ;;  %v10188_v41 = vld [vmem:[#allocation6_spill] sm:$0xff] }
 0x4dc   : > { %4247 = vmatpush.msrb.mxu0 %v6692_v24  ;;  %6467 = vmatmul.msk.f32.vlgmr.msrb.gmra.mxu1 %vm677_vm1, %v3080_v48 }
 0x4dd   : > { %6474 = vmatmul.msk.f32.vlgmr.msrb.gmra.mxu0 %vm677_vm1, %v3087_v46  ;;  %v8816_v46 = vmul.f32 0.35355338, %v10188_v41 }
 0x4de   : > { %2582 = vmax.xlane.f32.xlu0 %v2581_v15  ;;  %v6700_v2 = vpop.permute.xlu2 %6699 }
 0x4df   : > { %v6702_v29 = vunpack.i.h.bf16 %v6700_v2  ;;  %v6701_v63 = vunpack.i.l.bf16 %v6700_v2  ;;  %v2584_v30 = vsel %vm677_vm1, %v8816_v46, -inf }
 0x4e0   : > { %v6695_v58 = vpop.permute.xlu1 %6694 }
 0x4e1   : > { %v6697_v32 = vunpack.i.h.bf16 %v6695_v58  ;;  %v6696_v1 = vunpack.i.l.bf16 %v6695_v58  ;;  %4169 = vmatpush.msra.mxu1 %v6701_v63  ;;  %4351 = vmatpush.msra.mxu0 %v6702_v29  ;;  %v8802_v17 = vpop.eup %6955 }
 0x4e2   : > { %v2956_v34 = vsel %vm677_vm1, %v8802_v17, 0.0 }
 0x4e3   : > { %2951 = vadd.xlane.f32.xlu1 %v2950_v33  ;;  %4195 = vmatpush.msra.mxu2 %v6696_v1 }
 0x4e4   : > { %4325 = vmatpush.msrb.mxu3 %v6697_v32  ;;  %6471 = vmatmul.msk.f32.vlgmr.msra.gmra.mxu1 %vm677_vm1, %v3084_v54 }
 0x4e5   : > { %6472 = vmatmul.msk.f32.vlgmr.msra.gmra.mxu2 %vm677_vm1, %v3085_v12  ;;  %6477 = vmatmul.msk.f32.vlgmr.msrb.gmra.mxu3 %vm677_vm1, %v3090_v26  ;;  %v10189_v12 = vld [vmem:[#allocation58_spill] sm:$0xff] }
 0x4e6   : > { %2588 = vmax.xlane.f32.xlu2 %v2587_v47  ;;  %2945 = vadd.xlane.f32.xlu0 %v2944_v5  ;;  %v8834_v26 = vmul.f32 0.35355338, %v10189_v12 }
 0x4eb   : > { %2954 = vadd.xlane.f32.xlu1 %v2953_v18 }
 0x4ee   : > { %2591 = vmax.xlane.f32.xlu2 %v2590_v52 }
 0x4f6   : > { %2960 = vadd.xlane.f32.xlu2 %v2959_v8 }
 0x4fa   : > { %6719 = vrot.lane.b32.xlu0 %v6718_v25, %s7101_s26 }
 0x4fb   : > { %v2931_v22 = vpop.xlane.xlu0 %2930 }
 0x4fc   : > { %6957 = vrcp.f32 %v2931_v22 }
 0x4fd   : > { %6959 = vrcp.f32 %v8728_v6 }
 0x4fe   : > { %2957 = vadd.xlane.f32.xlu2 %v2956_v34  ;;  %6961 = vrcp.f32 %v8732_v39 }
 0x502   : > { %v6958_v10 = vpop.eup %6957 }
 0x503   : > { %v3091_v14 = vmul.f32 %v6958_v10, %v8676_v31  ;;  %v2943_v28 = vpop.xlane.xlu0 %2942  ;;  %v6960_v16 = vpop.eup %6959 }
 0x504   : > { %6724 = vrot.lane.b32.xlu1 %v6723_v37, %s7101_s26  ;;  %6963 = vrcp.f32 %v2943_v28  ;;  %v6962_v31 = vpop.eup %6961  ;;  %v3089_v39 = vmul.f32 %v6960_v16, %v8640_v50 }
 0x505   : > { %6478 = vmatmul.msk.f32.vlgmr.msra.gmra.mxu0 %vm677_vm1, %v3091_v14  ;;  %v3094_v2 = vmul.f32 %v6962_v31, %v8644_v27 }
 0x50a   : > { %v6964_v20 = vpop.eup %6963 }
 0x50b   : > { %v2937_v7 = vpop.xlane.xlu0 %2936  ;;  %v2922_v23 = vpop.xlane.xlu1 %2921  ;;  %v3095_v32 = vmul.f32 %v6964_v20, %v8690_v62  ;;  %v2593_v62 = vsel %vm677_vm1, %v8834_v26, -inf }
 0x50c   : > { %6965 = vrcp.f32 %v2922_v23  ;;  %v8866_v20 = vpop.f32.mrf.mxu0 }
 0x512   : > { %v6966_v19 = vpop.eup %6965 }
 0x513   : > { %v3088_v1 = vmul.f32 %v6966_v19, %v8704_v9  ;;  %v10190_v9 = vld [vmem:[#allocation40_spill] sm:$0xff] }
 0x514   : > { %v6728_v47 = vpack.i.bf16 %v10191_v42, %v10190_v9 }
 0x517   : > { %v2580_v3 = vpop.xlane.xlu2 %2579 }
 0x518   : > { %v2654_v57 = vsub.f32 %v8711_v11, %v2580_v3 }
 0x51a   : > { %v2776_v24 = vmul.f32 1.442695, %v2654_v57  ;;  %v10192_v57 = vld [vmem:[#allocation21_spill] sm:$0xff] }
 0x51c   : > { %6967 = vpow2.f32 %v2776_v24  ;;  %v10193_v24 = vld [vmem:[#allocation27_spill] sm:$0xff] }
 0x51d   : > { %6969 = vrcp.f32 %v2937_v7  ;;  %v6733_v16 = vpack.i.bf16 %v10193_v24, %v10192_v57  ;;  %v10197_v57 = vld [vmem:[#allocation50_spill] sm:$0xff] }
 0x51e   : > { %v6705_v48 = vpop.permute.xlu0 %6704 }
 0x51f   : > { %v6707_v59 = vunpack.i.h.bf16 %v6705_v48  ;;  %v6706_v6 = vunpack.i.l.bf16 %v6705_v48  ;;  %v6715_v15 = vpop.permute.xlu2 %6714 }
 0x520   : > { %v6716_v11 = vunpack.i.l.bf16 %v6715_v15  ;;  %v6717_v54 = vunpack.i.h.bf16 %v6715_v15 }
 0x521   : > { %4299 = vmatpush.msrb.mxu2 %v6706_v6  ;;  %4429 = vmatpush.msra.mxu3 %v6707_v59 }
 0x522   : > { %v8820_v29 = vpop.eup %6967  ;;  %6476 = vmatmul.msk.f32.vlgmr.msrb.gmra.mxu2 %vm677_vm1, %v3089_v39  ;;  %6481 = vmatmul.msk.f32.vlgmr.msra.gmra.mxu3 %vm677_vm1, %v3094_v2  ;;  %v8868_v2 = vpop.f32.mrf.mxu3 }
 0x523   : > { %4403 = vmatpush.msra.mxu2 %v6716_v11  ;;  %v6710_v63 = vpop.permute.xlu1 %6709  ;;  %v2962_v50 = vsel %vm677_vm1, %v8820_v29, 0.0  ;;  %v6970_v61 = vpop.eup %6969 }
 0x524   : > { %v6712_v58 = vunpack.i.h.bf16 %v6710_v63  ;;  %v6711_v27 = vunpack.i.l.bf16 %v6710_v63  ;;  %2585 = vmax.xlane.f32.xlu0 %v2584_v30  ;;  %2963 = vadd.xlane.f32.xlu2 %v2962_v50  ;;  %v3093_v33 = vmul.f32 %v6970_v61, %v8702_v43  ;;  %v8870_v11 = vpop.f32.mrf.mxu2 }
 0x526   : > { %4273 = vmatpush.msrb.mxu1 %v6711_v27  ;;  %4455 = vmatpush.msrb.mxu0 %v6712_v58 }
 0x527   : > { %6475 = vmatmul.msk.f32.vlgmr.msrb.gmra.mxu1 %vm677_vm1, %v3088_v1  ;;  %6482 = vmatmul.msk.f32.vlgmr.msrb.gmra.mxu0 %vm677_vm1, %v3095_v32  ;;  %v8883_v1 = vpop.f32.mrf.mxu1 }
 0x528   : > { %4377 = vmatpush.msra.mxu1 %v6717_v54 }
 0x52a   : > { %6480 = vmatmul.msk.f32.vlgmr.msra.gmra.mxu2 %vm677_vm1, %v3093_v33  ;;  %v3703_v58 = vpop.f32.mrf.mxu3 }
 0x52c   : > { %v8877_v27 = vpop.f32.mrf.mxu2 }
 0x52e   : > { %2594 = vmax.xlane.f32.xlu1 %v2593_v62 }
 0x532   : > { %v8890_v62 = vpop.f32.mrf.mxu3 }
 0x534   : > { %v8892_v9 = vpop.f32.mrf.mxu2 }
 0x538   : > { %6729 = vrot.lane.b32.xlu0 %v6728_v47, %s7101_s26 }
 0x549   : > { %v2934_v5 = vpop.xlane.xlu0 %2933 }
 0x54a   : > { %6971 = vrcp.f32 %v2934_v5 }
 0x54e   : > { %v2949_v36 = vpop.xlane.xlu1 %2948 }
 0x550   : > { %v6972_v44 = vpop.eup %6971 }
 0x551   : > { %v3092_v43 = vmul.f32 %v6972_v44, %v8737_v35  ;;  %v2583_v18 = vpop.xlane.xlu0 %2582 }
 0x552   : > { %v2655_v53 = vsub.f32 %v8752_v45, %v2583_v18 }
 0x553   : > { %6479 = vmatmul.msk.f32.vlgmr.msra.gmra.mxu1 %vm677_vm1, %v3092_v43  ;;  %v8896_v43 = vpop.f32.mrf.mxu1 }
 0x554   : > { %v2778_v52 = vmul.f32 1.442695, %v2655_v53 }
 0x556   : > { %6973 = vpow2.f32 %v2778_v52  ;;  %v2952_v35 = vpop.xlane.xlu1 %2951 }
 0x559   : > { %v2589_v8 = vpop.xlane.xlu2 %2588  ;;  %v2946_v34 = vpop.xlane.xlu0 %2945 }
 0x55a   : > { %v2657_v55 = vsub.f32 %v8767_v13, %v2589_v8 }
 0x55c   : > { %v8846_v21 = vpop.eup %6973  ;;  %v2782_v25 = vmul.f32 1.442695, %v2657_v55 }
 0x55d   : > { %v2965_v22 = vsel %vm677_vm1, %v8846_v21, 0.0 }
 0x55e   : > { %6975 = vpow2.f32 %v2782_v25  ;;  %2966 = vadd.xlane.f32.xlu2 %v2965_v22  ;;  %v2955_v4 = vpop.xlane.xlu1 %2954  ;;  %v8906_v22 = vpop.f32.mrf.mxu2 }
 0x55f   : > { %6977 = vrcp.f32 %v2949_v36  ;;  %v8900_v36 = vpop.f32.mrf.mxu3 }
 0x560   : > { %6979 = vrcp.f32 %v2946_v34  ;;  %v3755_v34 = vpop.f32.mrf.mxu1 }
 0x561   : > { %6981 = vrcp.f32 %v2952_v35  ;;  %v2592_v6 = vpop.xlane.xlu2 %2591 }
 0x562   : > { %6983 = vrcp.f32 %v2955_v4  ;;  %v2658_v15 = vsub.f32 %v8788_v0, %v2592_v6  ;;  %v10195_v4 = vld [vmem:[#allocation45_spill] sm:$0xff] }
 0x564   : > { %v8850_v10 = vpop.eup %6975  ;;  %v2784_v39 = vmul.f32 1.442695, %v2658_v15 }
 0x565   : > { %v2971_v45 = vsel %vm677_vm1, %v8850_v10, 0.0  ;;  %v6978_v60 = vpop.eup %6977 }
 0x566   : > { %2972 = vadd.xlane.f32.xlu0 %v2971_v45  ;;  %v6980_v13 = vpop.eup %6979  ;;  %v3097_v7 = vmul.f32 %v6978_v60, %v8747_v56  ;;  %6985 = vpow2.f32 %v2784_v39  ;;  %v8910_v60 = vpop.f32.mrf.mxu2 }
 0x567   : > { %v3096_v3 = vmul.f32 %v6980_v13, %v8769_v49  ;;  %v6982_v23 = vpop.eup %6981  ;;  %v4015_v45 = vpop.f32.mrf.mxu3  ;;  %v10194_v13 = vld [vmem:[#allocation47_spill] sm:$0xff] }
 0x568   : > { %v6984_v31 = vpop.eup %6983  ;;  %v3098_v59 = vmul.f32 %v6982_v23, %v8761_v51 }
 0x569   : > { %v3099_v49 = vmul.f32 %v6984_v31, %v8785_v40  ;;  %v2961_v51 = vpop.xlane.xlu2 %2960  ;;  %v8872_v40 = vpop.f32.mrf.mxu0 }
 0x56c   : > { %v6720_v37 = vpop.permute.xlu0 %6719  ;;  %v8875_v50 = vpop.eup %6985 }
 0x56d   : > { %v6722_v14 = vunpack.i.h.bf16 %v6720_v37  ;;  %v6721_v28 = vunpack.i.l.bf16 %v6720_v37  ;;  %v2974_v0 = vsel %vm677_vm1, %v8875_v50, 0.0  ;;  %v6738_v37 = vpack.i.bf16 %v10195_v4, %v10194_v13 }
 0x56f   : > { %4481 = vmatpush.msrb.mxu1 %v6722_v14  ;;  %4507 = vmatpush.msrb.mxu2 %v6721_v28  ;;  %v4093_v14 = vpop.f32.mrf.mxu2  ;;  %v4119_v23 = vpop.f32.mrf.mxu3 }
 0x570   : > { %6483 = vmatmul.msk.f32.vlgmr.msrb.gmra.mxu1 %vm677_vm1, %v3096_v3  ;;  %6484 = vmatmul.msk.f32.vlgmr.msrb.gmra.mxu2 %vm677_vm1, %v3097_v7  ;;  %v10196_v3 = vld [vmem:[#allocation51_spill] sm:$0xff] }
 0x571   : > { %v8881_v61 = vpop.f32.mrf.mxu0  ;;  %v2958_v32 = vpop.xlane.xlu2 %2957 }
 0x576   : > { %6734 = vrot.lane.b32.xlu2 %v6733_v16, %s7101_s26  ;;  %v6725_v48 = vpop.permute.xlu1 %6724 }
 0x577   : > { %v6727_v41 = vunpack.i.h.bf16 %v6725_v48  ;;  %v6726_v56 = vunpack.i.l.bf16 %v6725_v48  ;;  %v8925_v48 = vpop.f32.mrf.mxu3  ;;  %v4197_v39 = vpop.f32.mrf.mxu2 }
 0x579   : > { %4533 = vmatpush.msrb.mxu3 %v6726_v56  ;;  %4559 = vmatpush.msra.mxu0 %v6727_v41  ;;  %v8894_v5 = vpop.f32.mrf.mxu0 }
 0x57a   : > { %6485 = vmatmul.msk.f32.vlgmr.msrb.gmra.mxu3 %vm677_vm1, %v3098_v59  ;;  %6486 = vmatmul.msk.f32.vlgmr.msra.gmra.mxu0 %vm677_vm1, %v3099_v49 }
 0x57f   : > { %v8931_v49 = vpop.f32.mrf.mxu3 }
 0x581   : > { %v4041_v35 = vpop.f32.mrf.mxu0 }
 0x597   : > { %v2586_v19 = vpop.xlane.xlu0 %2585  ;;  %v2964_v24 = vpop.xlane.xlu2 %2963 }
 0x598   : > { %v2656_v63 = vsub.f32 %v8816_v46, %v2586_v19 }
 0x59a   : > { %v2780_v30 = vmul.f32 1.442695, %v2656_v63 }
 0x59c   : > { %6987 = vpow2.f32 %v2780_v30 }
 0x59d   : > { %6989 = vrcp.f32 %v2961_v51 }
 0x59e   : > { %6991 = vrcp.f32 %v2958_v32 }
 0x59f   : > { %2975 = vadd.xlane.f32.xlu2 %v2974_v0 }
 0x5a1   : > { %v2595_v54 = vpop.xlane.xlu1 %2594 }
 0x5a2   : > { %v8885_v33 = vpop.eup %6987  ;;  %v2659_v46 = vsub.f32 %v8834_v26, %v2595_v54 }
 0x5a3   : > { %v2968_v12 = vsel %vm677_vm1, %v8885_v33, 0.0  ;;  %v6990_v47 = vpop.eup %6989 }
 0x5a4   : > { %v2786_v42 = vmul.f32 1.442695, %v2659_v46  ;;  %2969 = vadd.xlane.f32.xlu1 %v2968_v12  ;;  %v6992_v44 = vpop.eup %6991  ;;  %v3101_v8 = vmul.f32 %v6990_v47, %v8796_v38  ;;  %v3859_v38 = vpop.f32.mrf.mxu1 }
 0x5a5   : > { %v3100_v55 = vmul.f32 %v6992_v44, %v8802_v17  ;;  %v4145_v17 = vpop.f32.mrf.mxu0  ;;  %v4301_v0 = vpop.f32.mrf.mxu2 }
 0x5a6   : > { %6993 = vpow2.f32 %v2786_v42 }
 0x5a7   : > { %6995 = vrcp.f32 %v2964_v24 }
 0x5aa   : > { %v6730_v18 = vpop.permute.xlu0 %6729 }
 0x5ab   : > { %v6732_v53 = vunpack.i.h.bf16 %v6730_v18  ;;  %v6731_v26 = vunpack.i.l.bf16 %v6730_v18 }
 0x5ac   : > { %v8898_v52 = vpop.eup %6993  ;;  %v8917_v7 = vpop.f32.mrf.mxu1 }
 0x5ad   : > { %4585 = vmatpush.msra.mxu1 %v6732_v53  ;;  %4611 = vmatpush.msra.mxu2 %v6731_v26  ;;  %v2977_v25 = vsel %vm677_vm1, %v8898_v52, 0.0  ;;  %v4249_v28 = vpop.f32.mrf.mxu0  ;;  %v6996_v6 = vpop.eup %6995 }
 0x5ae   : > { %6487 = vmatmul.msk.f32.vlgmr.msra.gmra.mxu1 %vm677_vm1, %v3100_v55  ;;  %6488 = vmatmul.msk.f32.vlgmr.msra.gmra.mxu2 %vm677_vm1, %v3101_v8  ;;  %v3102_v63 = vmul.f32 %v6996_v6, %v8820_v29 }
 0x5af   : > { %2978 = vadd.xlane.f32.xlu0 %v2977_v25 }
 0x5b4   : > { %v4067_v31 = vpop.f32.mrf.mxu1 }
 0x5b5   : > { %v4353_v16 = vpop.f32.mrf.mxu0 }
 0x5b7   : > { %4889 = vrot.lane.b32.xlu2 %v4015_v45, %s7102_s27  ;;  %v6556_v45 = vld [vmem:[%s9951_s3 + $0x8] sm:$0xff] }
 0x5bc   : > { %v4171_v59 = vpop.f32.mrf.mxu1 }
 0x5bd   : > { %6739 = vrot.lane.b32.xlu1 %v6738_v37, %s7101_s26  ;;  %v4457_v56 = vpop.f32.mrf.mxu0 }
 0x5bf   : > { %4895 = vrot.lane.b32.xlu2 %v4093_v14, %s7102_s27 }
 0x5c3   : > { %4746 = vrot.lane.b32.xlu0 %v10196_v3, %s7101_s26 }
 0x5c5   : > { %4720 = vrot.lane.b32.xlu1 %v10197_v57, %s7101_s26 }
 0x5c7   : > { %4816 = vrot.lane.b32.xlu2 %v3703_v58, %s7103_s28  ;;  %v8940_v58 = vpop.f32.mrf.mxu1 }
 0x5cb   : > { %4891 = vrot.lane.b32.xlu0 %v4041_v35, %s7102_s27 }
 0x5cd   : > { %4808 = vrot.lane.b32.xlu1 %v8868_v2, %s7103_s28 }
 0x5cf   : > { %4899 = vrot.lane.b32.xlu2 %v4145_v17, %s7102_s27 }
 0x5d0   : > { %v8946_v29 = vpop.f32.mrf.mxu1 }
 0x5d1   : > { %v2967_v41 = vpop.xlane.xlu2 %2966 }
 0x5d2   : > { %6997 = vrcp.f32 %v2967_v41 }
 0x5d3   : > { %4972 = vrot.lane.b32.xlu0 %v4457_v56, %s7104_s30 }
 0x5d5   : > { %4810 = vrot.lane.b32.xlu1 %v8866_v20, %s7103_s28  ;;  %v4431_v20 = vpop.f32.mrf.mxu3 }
 0x5d7   : > { %4820 = vrot.lane.b32.xlu2 %v3755_v34, %s7103_s28 }
 0x5d8   : > { %v6998_v15 = vpop.eup %6997 }
 0x5d9   : > { %v6735_v2 = vpop.permute.xlu2 %6734  ;;  %v3103_v30 = vmul.f32 %v6998_v15, %v8846_v21  ;;  %v8952_v21 = vpop.f32.mrf.mxu2 }
 0x5da   : > { %v6737_v51 = vunpack.i.h.bf16 %v6735_v2  ;;  %v6736_v19 = vunpack.i.l.bf16 %v6735_v2 }
 0x5db   : > { %4814 = vrot.lane.b32.xlu0 %v8877_v27, %s7103_s28 }
 0x5dc   : > { %4637 = vmatpush.msra.mxu3 %v6736_v19  ;;  %4663 = vmatpush.msrb.mxu0 %v6737_v51 }
 0x5dd   : > { %6489 = vmatmul.msk.f32.vlgmr.msra.gmra.mxu3 %vm677_vm1, %v3102_v63  ;;  %6490 = vmatmul.msk.f32.vlgmr.msrb.gmra.mxu0 %vm677_vm1, %v3103_v30 }
 0x5de   : > { %4970 = vrot.lane.b32.xlu1 %v4431_v20, %s7104_s30 }
 0x5df   : > { %4903 = vrot.lane.b32.xlu2 %v4197_v39, %s7102_s27 }
 0x5e6   : > { %4812 = vrot.lane.b32.xlu1 %v8896_v43, %s7103_s28 }
 0x5e7   : > { %4824 = vrot.lane.b32.xlu2 %v8890_v62, %s7103_s28  ;;  %v2973_v62 = vpop.xlane.xlu0 %2972 }
 0x5ed   : > { %v4483_v27 = vpop.f32.mrf.mxu1 }
 0x5ee   : > { %4893 = vrot.lane.b32.xlu1 %v4067_v31, %s7102_s27  ;;  %4974 = vrot.lane.b32.xlu0 %v4483_v27, %s7104_s30 }
 0x5ef   : > { %4907 = vrot.lane.b32.xlu2 %v4249_v28, %s7102_s27 }
 0x5f3   : > { %v4509_v32 = vpop.f32.mrf.mxu2 }
 0x5f6   : > { %4976 = vrot.lane.b32.xlu1 %v4509_v32, %s7104_s30  ;;  %4818 = vrot.lane.b32.xlu0 %v8872_v40, %s7103_s28 }
 0x5f7   : > { %4828 = vrot.lane.b32.xlu2 %v3859_v38, %s7103_s28  ;;  %v4561_v46 = vpop.f32.mrf.mxu0  ;;  %v6555_v38 = vld [vmem:[%s9951_s3] sm:$0xff] }
 0x5fd   : > { %v4535_v54 = vpop.f32.mrf.mxu3 }
 0x5fe   : > { %4897 = vrot.lane.b32.xlu1 %v4119_v23, %s7102_s27  ;;  %4978 = vrot.lane.b32.xlu0 %v4535_v54, %s7104_s30 }
 0x5ff   : > { %4911 = vrot.lane.b32.xlu2 %v4301_v0, %s7102_s27 }
 0x606   : > { %4980 = vrot.lane.b32.xlu1 %v4561_v46, %s7104_s30  ;;  %4822 = vrot.lane.b32.xlu0 %v8892_v9, %s7103_s28 }
 0x607   : > { %4804 = vrot.lane.b32.xlu2 %v8883_v1, %s7103_s28 }
 0x60e   : > { %4901 = vrot.lane.b32.xlu1 %v4171_v59, %s7102_s27 }
 0x60f   : > { %4887 = vrot.lane.b32.xlu2 %v8910_v60, %s7102_s27 }
 0x612   : > { %v2976_v40 = vpop.xlane.xlu2 %2975 }
 0x617   : > { %4832 = vrot.lane.b32.xlu2 %v8900_v36, %s7103_s28  ;;  %v2970_v47 = vpop.xlane.xlu1 %2969 }
 0x618   : > { %6999 = vrcp.f32 %v2970_v47 }
 0x619   : > { %7001 = vrcp.f32 %v2973_v62 }
 0x61a   : > { %v4890_v12 = vpop.permute.xlu2 %4889 }
 0x61e   : > { %v7000_v43 = vpop.eup %6999 }
 0x61f   : > { %4915 = vrot.lane.b32.xlu2 %v4353_v16, %s7102_s27  ;;  %v7002_v18 = vpop.eup %7001  ;;  %v3104_v8 = vmul.f32 %v7000_v43, %v8885_v33 }
 0x620   : > { %v3105_v35 = vmul.f32 %v7002_v18, %v8850_v10 }
 0x622   : > { %v4896_v42 = vpop.permute.xlu2 %4895  ;;  %v2979_v9 = vpop.xlane.xlu0 %2978 }
 0x623   : > { %7003 = vrcp.f32 %v2979_v9 }
 0x624   : > { %7005 = vrcp.f32 %v2976_v40 }
 0x629   : > { %v7004_v25 = vpop.eup %7003 }
 0x62a   : > { %v4817_v1 = vpop.permute.xlu2 %4816  ;;  %v7006_v60 = vpop.eup %7005  ;;  %v3107_v10 = vmul.f32 %v7004_v25, %v8898_v52 }
 0x62b   : > { %4859 = vst.msk [vmem:[#allocation2 + $0x30] sm:$0xff] %vm4852_vm2, %v4817_v1  ;;  %v4587_v44 = vpop.f32.mrf.mxu1  ;;  %v3106_v17 = vmul.f32 %v7006_v60, %v8875_v50 }
 0x62c   : > { %4982 = vrot.lane.b32.xlu0 %v4587_v44, %s7104_s30 }
 0x62f   : > { %v6740_v53 = vpop.permute.xlu1 %6739 }
 0x630   : > { %v6742_v26 = vunpack.i.h.bf16 %v6740_v53  ;;  %v6741_v36 = vunpack.i.l.bf16 %v6740_v53 }
 0x631   : > { %v4613_v55 = vpop.f32.mrf.mxu2 }
 0x632   : > { %4689 = vmatpush.msrb.mxu1 %v6742_v26  ;;  %4715 = vmatpush.msrb.mxu2 %v6741_v36  ;;  %v8979_v34 = vpop.permute.xlu2 %4899 }
 0x633   : > { %4984 = vrot.lane.b32.xlu1 %v4613_v55, %s7104_s30  ;;  %6491 = vmatmul.msk.f32.vlgmr.msrb.gmra.mxu1 %vm677_vm1, %v3104_v8  ;;  %v7073_v55 = vld [vmem:[%s7198_s18 + $0x10] sm:$0xff] }
 0x634   : > { %6492 = vmatmul.msk.f32.vlgmr.msrb.gmra.mxu2 %vm677_vm1, %v3105_v35  ;;  %4826 = vrot.lane.b32.xlu0 %v8881_v61, %s7103_s28 }
 0x635   : > { %v4747_v33 = vpop.permute.xlu0 %4746  ;;  %6563 = vmatpush.bf16.msra.mxu1 %v6556_v45 }
 0x636   : > { %4767 = vmatpush.msra.mxu0 %v4747_v33 }
 0x637   : > { %v4721_v13 = vpop.permute.xlu1 %4720  ;;  %6494 = vmatmul.msk.f32.vlgmr.msra.gmra.mxu0 %vm677_vm1, %v3107_v10 }
 0x638   : > { %4741 = vmatpush.msrb.mxu3 %v4721_v13  ;;  %5105 = vmatpush.bf16.msrb.mxu0 %v6556_v45  ;;  %v7074_v13 = vld [vmem:[%s7198_s18 + $0x18] sm:$0xff] }
 0x639   : > { %6493 = vmatmul.msk.f32.vlgmr.msrb.gmra.mxu3 %vm677_vm1, %v3106_v17  ;;  %6564 = vmatpush.bf16.msra.mxu1 %v6555_v38 }
 0x63a   : > { %v4821_v61 = vpop.permute.xlu2 %4820 }
 0x63b   : > { %4861 = vst.msk [vmem:[#allocation2 + $0x40] sm:$0xff] %vm4852_vm2, %v4821_v61  ;;  %4905 = vrot.lane.b32.xlu1 %v8925_v48, %s7102_s27 }
 0x63c   : > { %5106 = vmatpush.bf16.msrb.mxu0 %v6555_v38 }
 0x63d   : > { %v4892_v52 = vpop.permute.xlu0 %4891 }
 0x63f   : > { %v4809_v4 = vpop.permute.xlu1 %4808 }
 0x640   : > { %4855 = vst.msk [vmem:[#allocation2 + $0x10] sm:$0xff] %vm4852_vm2, %v4809_v4 }
 0x641   : > { %4936 = vst.msk [vmem:[#allocation2 + $0x10] sm:$0xff] %vm4933_vm3, %v4890_v12 }
 0x642   : > { %v4904_v50 = vpop.permute.xlu2 %4903 }
 0x645   : > { %v4973_v37 = vpop.permute.xlu0 %4972 }
 0x647   : > { %v4811_v14 = vpop.permute.xlu1 %4810 }
 0x648   : > { %4856 = vst.msk [vmem:[#allocation2 + $0x18] sm:$0xff] %vm4852_vm2, %v4811_v14  ;;  %v7075_v14 = vld [vmem:[%s7198_s18 + $0x28] sm:$0xff] }
 0x649   : > { %4937 = vst.msk [vmem:[#allocation2 + $0x18] sm:$0xff] %vm4933_vm3, %v4892_v52 }
 0x64a   : > { %5018 = vst.msk [vmem:[#allocation2 + $0x18] sm:$0xff] %vm5014_vm4, %v4973_v37  ;;  %v4825_v28 = vpop.permute.xlu2 %4824 }
 0x64b   : > { %4863 = vst.msk [vmem:[#allocation2 + $0x50] sm:$0xff] %vm4852_vm2, %v4825_v28 }
 0x64d   : > { %v4815_v3 = vpop.permute.xlu0 %4814 }
 0x64e   : > { %4858 = vst.msk [vmem:[#allocation2 + $0x28] sm:$0xff] %vm4852_vm2, %v4815_v3  ;;  %v7076_v3 = vld [vmem:[%s7198_s18 + $0x20] sm:$0xff] }
 0x64f   : > { %4939 = vst.msk [vmem:[#allocation2 + $0x28] sm:$0xff] %vm4933_vm3, %v4896_v42 }
 0x650   : > { %v4971_v23 = vpop.permute.xlu1 %4970 }
 0x651   : > { %5017 = vst.msk [vmem:[#allocation2 + $0x10] sm:$0xff] %vm5014_vm4, %v4971_v23  ;;  %v5034_v31 = vld [vmem:[#allocation2 + $0x18] sm:$0xff] }
 0x652   : > { %v4908_v57 = vpop.permute.xlu2 %4907 }
 0x658   : > { %v4813_v24 = vpop.permute.xlu1 %4812  ;;  %v5033_v16 = vld [vmem:[#allocation2 + $0x10] sm:$0xff] }
 0x659   : > { %4857 = vst.msk [vmem:[#allocation2 + $0x20] sm:$0xff] %vm4852_vm2, %v4813_v24  ;;  %v5048_v48 = vpack.c.bf16 %v5034_v31, %v5033_v16 }
 0x65a   : > { %v4665_v41 = vpop.f32.mrf.mxu0  ;;  %v4829_v56 = vpop.permute.xlu2 %4828 }
 0x65b   : > { %4865 = vst.msk [vmem:[#allocation2 + $0x60] sm:$0xff] %vm4852_vm2, %v4829_v56  ;;  %6504 = vmatmul.msk.bf16.vlgmr.msra.gmra.mxu1 %vm489_vm0, %v5048_v48  ;;  %4988 = vrot.lane.b32.xlu1 %v4665_v41, %s7104_s30  ;;  %v7077_v48 = vld [vmem:[%s7198_s18 + $0x30] sm:$0xff] }
 0x660   : > { %v4894_v59 = vpop.permute.xlu1 %4893  ;;  %v4975_v6 = vpop.permute.xlu0 %4974 }
 0x661   : > { %4938 = vst.msk [vmem:[#allocation2 + $0x20] sm:$0xff] %vm4933_vm3, %v4894_v59  ;;  %v4639_v15 = vpop.f32.mrf.mxu3 }
 0x662   : > { %5019 = vst.msk [vmem:[#allocation2 + $0x20] sm:$0xff] %vm5014_vm4, %v4975_v6  ;;  %4986 = vrot.lane.b32.xlu0 %v4639_v15, %s7104_s30  ;;  %v9015_v39 = vpop.permute.xlu2 %4911  ;;  %v7078_v15 = vld [vmem:[%s7198_s18 + $0x38] sm:$0xff] }
 0x663   : > { %4909 = vrot.lane.b32.xlu1 %v8940_v58, %s7102_s27 }
 0x668   : > { %v4977_v2 = vpop.permute.xlu1 %4976  ;;  %v4819_v51 = vpop.permute.xlu0 %4818 }
 0x669   : > { %5020 = vst.msk [vmem:[#allocation2 + $0x28] sm:$0xff] %vm5014_vm4, %v4977_v2  ;;  %v5035_v20 = vld [vmem:[#allocation2 + $0x20] sm:$0xff] }
 0x66a   : > { %4860 = vst.msk [vmem:[#allocation2 + $0x38] sm:$0xff] %vm4852_vm2, %v4819_v51  ;;  %4830 = vrot.lane.b32.xlu0 %v8906_v22, %s7103_s28  ;;  %v4805_v19 = vpop.permute.xlu2 %4804 }
 0x66b   : > { %4941 = vst.msk [vmem:[#allocation2 + $0x38] sm:$0xff] %vm4933_vm3, %v8979_v34 }
 0x66c   : > { %4853 = vst.msk [vmem:[#allocation2] sm:$0xff] %vm4852_vm2, %v4805_v19 }
 0x670   : > { %v4898_v63 = vpop.permute.xlu1 %4897  ;;  %v4979_v30 = vpop.permute.xlu0 %4978  ;;  %v5036_v0 = vld [vmem:[#allocation2 + $0x28] sm:$0xff] }
 0x671   : > { %4940 = vst.msk [vmem:[#allocation2 + $0x30] sm:$0xff] %vm4933_vm3, %v4898_v63  ;;  %v5049_v58 = vpack.c.bf16 %v5036_v0, %v5035_v20  ;;  %v7079_v0 = vld [vmem:[%s7198_s18 + $0x40] sm:$0xff] }
 0x672   : > { %5021 = vst.msk [vmem:[#allocation2 + $0x30] sm:$0xff] %vm5014_vm4, %v4979_v30  ;;  %v9028_v27 = vpop.permute.xlu2 %4887 }
 0x673   : > { %6505 = vmatmul.msk.bf16.gmra.mxu1 %vm489_vm0, %v5049_v58 }
 0x678   : > { %v4981_v22 = vpop.permute.xlu1 %4980  ;;  %v4823_v32 = vpop.permute.xlu0 %4822 }
 0x679   : > { %5022 = vst.msk [vmem:[#allocation2 + $0x38] sm:$0xff] %vm5014_vm4, %v4981_v22  ;;  %v5037_v40 = vld [vmem:[#allocation2 + $0x30] sm:$0xff] }
 0x67a   : > { %4862 = vst.msk [vmem:[#allocation2 + $0x48] sm:$0xff] %vm4852_vm2, %v4823_v32  ;;  %v4833_v54 = vpop.permute.xlu2 %4832 }
 0x67b   : > { %4943 = vst.msk [vmem:[#allocation2 + $0x48] sm:$0xff] %vm4933_vm3, %v4904_v50 }
 0x67c   : > { %4867 = vst.msk [vmem:[#allocation2 + $0x70] sm:$0xff] %vm4852_vm2, %v4833_v54 }
 0x680   : > { %v4902_v46 = vpop.permute.xlu1 %4901  ;;  %v5038_v12 = vld [vmem:[#allocation2 + $0x38] sm:$0xff] }
 0x681   : > { %4942 = vst.msk [vmem:[#allocation2 + $0x40] sm:$0xff] %vm4933_vm3, %v4902_v46  ;;  %v5050_v62 = vpack.c.bf16 %v5038_v12, %v5037_v40 }
 0x683   : > { %6506 = vmatmul.msk.bf16.gmra.mxu1 %vm489_vm0, %v5050_v62 }
 0x69e   : > { %v4983_v42 = vpop.permute.xlu0 %4982 }
 0x69f   : > { %5023 = vst.msk [vmem:[#allocation2 + $0x40] sm:$0xff] %vm5014_vm4, %v4983_v42 }
 0x6a5   : > { %v4985_v47 = vpop.permute.xlu1 %4984 }
 0x6a6   : > { %5024 = vst.msk [vmem:[#allocation2 + $0x48] sm:$0xff] %vm5014_vm4, %v4985_v47  ;;  %v4827_v9 = vpop.permute.xlu0 %4826  ;;  %v5039_v44 = vld [vmem:[#allocation2 + $0x40] sm:$0xff] }
 0x6a7   : > { %4864 = vst.msk [vmem:[#allocation2 + $0x58] sm:$0xff] %vm4852_vm2, %v4827_v9  ;;  %v4916_v9 = vpop.permute.xlu2 %4915 }
 0x6a8   : > { %4945 = vst.msk [vmem:[#allocation2 + $0x58] sm:$0xff] %vm4933_vm3, %v4908_v57 }
 0x6ad   : > { %v4906_v1 = vpop.permute.xlu1 %4905  ;;  %v5040_v43 = vld [vmem:[#allocation2 + $0x48] sm:$0xff] }
 0x6ae   : > { %4944 = vst.msk [vmem:[#allocation2 + $0x50] sm:$0xff] %vm4933_vm3, %v4906_v1  ;;  %v5051_v18 = vpack.c.bf16 %v5040_v43, %v5039_v44 }
 0x6b0   : > { %6507 = vmatmul.msk.bf16.gmra.mxu1 %vm489_vm0, %v5051_v18  ;;  %v4691_v53 = vpop.f32.mrf.mxu1 }
 0x6b1   : > { %4990 = vrot.lane.b32.xlu0 %v4691_v53, %s7104_s30 }
 0x6b7   : > { %v4717_v26 = vpop.f32.mrf.mxu2 }
 0x6b8   : > { %4992 = vrot.lane.b32.xlu1 %v4717_v26, %s7104_s30 }
 0x6b9   : > { %4806 = vrot.lane.b32.xlu0 %v8870_v11, %s7103_s28 }
 0x6bc   : > { %v4743_v8 = vpop.f32.mrf.mxu3 }
 0x6c0   : > { %4885 = vrot.lane.b32.xlu1 %v8917_v7, %s7102_s27 }
 0x6c1   : > { %4966 = vrot.lane.b32.xlu0 %v8946_v29, %s7104_s30  ;;  %v9063_v29 = vld [vmem:[%s9952_s4] ss:$0 sm:$0xff] }
 0x6c8   : > { %4968 = vrot.lane.b32.xlu1 %v8952_v21, %s7104_s30 }
 0x6c9   : > { %4834 = vrot.lane.b32.xlu0 %v8894_v5, %s7103_s28  ;;  %v4769_v5 = vpop.f32.mrf.mxu0 }
 0x6cd   : > { %v4989_v36 = vpop.permute.xlu1 %4988 }
 0x6ce   : > { %5026 = vst.msk [vmem:[#allocation2 + $0x58] sm:$0xff] %vm5014_vm4, %v4989_v36 }
 0x6d0   : > { %4913 = vrot.lane.b32.xlu1 %v8931_v49, %s7102_s27 }
 0x6d1   : > { %4994 = vrot.lane.b32.xlu0 %v4743_v8, %s7104_s30 }
 0x6d4   : > { %v4987_v11 = vpop.permute.xlu0 %4986 }
 0x6d5   : > { %5025 = vst.msk [vmem:[#allocation2 + $0x50] sm:$0xff] %vm5014_vm4, %v4987_v11  ;;  %v4910_v7 = vpop.permute.xlu1 %4909  ;;  %v5042_v45 = vld [vmem:[#allocation2 + $0x58] sm:$0xff] }
 0x6d6   : > { %4946 = vst.msk [vmem:[#allocation2 + $0x60] sm:$0xff] %vm4933_vm3, %v4910_v7 }
 0x6d8   : > { %4996 = vrot.lane.b32.xlu1 %v4769_v5, %s7104_s30  ;;  %v5113_v21 = vpop.f32.mrf.mxu1 }
 0x6d9   : > { %v5114_v49 = vadd.f32 %v9063_v29, %v5113_v21 }
 0x6db   : > { %v9069_v25 = vadd.f32 %v7073_v55, %v5114_v49 }
 0x6dc   : > { %v4831_v35 = vpop.permute.xlu0 %4830  ;;  %v5041_v34 = vld [vmem:[#allocation2 + $0x50] sm:$0xff] }
 0x6dd   : > { %4866 = vst.msk [vmem:[#allocation2 + $0x68] sm:$0xff] %vm4852_vm2, %v4831_v35  ;;  %v5170_v60 = vsel %vm489_vm0, %v9069_v25, 0.0  ;;  %v5052_v10 = vpack.c.bf16 %v5042_v45, %v5041_v34 }
 0x6de   : > { %4947 = vst.msk [vmem:[#allocation2 + $0x68] sm:$0xff] %vm4933_vm3, %v9015_v39  ;;  %5171 = vadd.xlane.f32.xlu2 %v5170_v60 }
 0x6df   : > { %6508 = vmatmul.msk.bf16.gmra.mxu1 %vm489_vm0, %v5052_v10 }
 0x6e0   : > { %v5115_v33 = vpop.f32.mrf.mxu1 }
 0x6e1   : > { %v5116_v17 = vadd.f32 %v9063_v29, %v5115_v33 }
 0x6e3   : > { %v9079_v61 = vadd.f32 %v7074_v13, %v5116_v17  ;;  %v7080_v17 = vld [vmem:[%s7198_s18 + $0x48] sm:$0xff] }
 0x6e5   : > { %v5173_v37 = vsel %vm489_vm0, %v9079_v61, 0.0 }
 0x6f0   : > { %v5118_v38 = vpop.f32.mrf.mxu1 }
 0x6f1   : > { %v5119_v4 = vadd.f32 %v9063_v29, %v5118_v38 }
 0x6f3   : > { %v9089_v23 = vadd.f32 %v7076_v3, %v5119_v4 }
 0x6f5   : > { %v5176_v31 = vsel %vm489_vm0, %v9089_v23, 0.0 }
 0x6f8   : > { %v5120_v52 = vpop.f32.mrf.mxu1 }
 0x6f9   : > { %v5121_v50 = vadd.f32 %v9063_v29, %v5120_v52 }
 0x6fb   : > { %v9086_v28 = vadd.f32 %v7075_v14, %v5121_v50  ;;  %5174 = vadd.xlane.f32.xlu0 %v5173_v37  ;;  %v7081_v50 = vld [vmem:[%s7198_s18 + $0x50] sm:$0xff] }
 0x6fd   : > { %v5179_v57 = vsel %vm489_vm0, %v9086_v28, 0.0 }
 0x6fe   : > { %5180 = vadd.xlane.f32.xlu2 %v5179_v57 }
 0x700   : > { %v5123_v24 = vpop.f32.mrf.mxu1 }
 0x701   : > { %v5124_v16 = vadd.f32 %v9063_v29, %v5123_v24 }
 0x702   : > { %5177 = vadd.xlane.f32.xlu1 %v5176_v31 }
 0x703   : > { %v9097_v41 = vadd.f32 %v7077_v48, %v5124_v16 }
 0x705   : > { %v5182_v56 = vsel %vm489_vm0, %v9097_v41, 0.0 }
 0x706   : > { %5183 = vadd.xlane.f32.xlu0 %v5182_v56 }
 0x708   : > { %v5125_v59 = vpop.f32.mrf.mxu1 }
 0x709   : > { %v5126_v6 = vadd.f32 %v9063_v29, %v5125_v59 }
 0x70b   : > { %v9103_v39 = vadd.f32 %v7078_v15, %v5126_v6 }
 0x70d   : > { %v5185_v2 = vsel %vm489_vm0, %v9103_v39, 0.0 }
 0x70e   : > { %5186 = vadd.xlane.f32.xlu1 %v5185_v2 }
 0x723   : > { %v4991_v51 = vpop.permute.xlu0 %4990 }
 0x724   : > { %5027 = vst.msk [vmem:[#allocation2 + $0x60] sm:$0xff] %vm5014_vm4, %v4991_v51 }
 0x72a   : > { %v4993_v19 = vpop.permute.xlu1 %4992 }
 0x72b   : > { %5028 = vst.msk [vmem:[#allocation2 + $0x68] sm:$0xff] %vm5014_vm4, %v4993_v19  ;;  %v4807_v63 = vpop.permute.xlu0 %4806  ;;  %v5043_v54 = vld [vmem:[#allocation2 + $0x60] sm:$0xff] }
 0x72c   : > { %4854 = vst.msk [vmem:[#allocation2 + $0x8] sm:$0xff] %vm4852_vm2, %v4807_v63 }
 0x72d   : > { %4935 = vst.msk [vmem:[#allocation2 + $0x8] sm:$0xff] %vm4933_vm3, %v9028_v27  ;;  %v5128_v30 = vpop.f32.mrf.mxu1  ;;  %v7105_v27 = vmov 32.0  }
 0x72e   : > { %v5129_v20 = vadd.f32 %v9063_v29, %v5128_v30  ;;  %7007 = vrcp.f32 %v7105_v27 }
 0x730   : > { %v9114_v58 = vadd.f32 %v7079_v0, %v5129_v20 }
 0x732   : > { %v4886_v22 = vpop.permute.xlu1 %4885  ;;  %v5188_v32 = vsel %vm489_vm0, %v9114_v58, 0.0  ;;  %v5044_v46 = vld [vmem:[#allocation2 + $0x68] sm:$0xff] }
 0x733   : > { %4934 = vst.msk [vmem:[#allocation2] sm:$0xff] %vm4933_vm3, %v4886_v22  ;;  %5189 = vadd.xlane.f32.xlu1 %v5188_v32  ;;  %v4967_v40 = vpop.permute.xlu0 %4966  ;;  %v5053_v12 = vpack.c.bf16 %v5044_v46, %v5043_v54  ;;  %v7082_v54 = vld [vmem:[%s7198_s18 + $0x58] sm:$0xff] }
 0x734   : > { %5015 = vst.msk [vmem:[#allocation2] sm:$0xff] %vm5014_vm4, %v4967_v40  ;;  %v7008_v47 = vpop.eup %7007 }
 0x735   : > { %6509 = vmatmul.msk.bf16.gmra.mxu1 %vm489_vm0, %v5053_v12  ;;  %v5213_v1 = vmul.f32 32.0, %v7008_v47  ;;  %vm5217_vm5 = vweird.f32 %v7008_v47  ;;  %v5130_v60 = vpop.f32.mrf.mxu1 }
 0x736   : > { %v5131_v33 = vadd.f32 %v9063_v29, %v5130_v60 }
 0x737   : > { %v5214_v36 = vsub.f32 1.0, %v5213_v1  ;;  %v7083_v1 = vld [vmem:[%s7198_s18 + $0x60] sm:$0xff] }
 0x738   : > { %v9140_v13 = vadd.f32 %v7080_v17, %v5131_v33  ;;  %v7086_v17 = vld [vmem:[%s7198_s18 + $0x8] sm:$0xff] }
 0x739   : > { %v5215_v8 = vmul.f32 %v7008_v47, %v5214_v36  ;;  %v7084_v36 = vld [vmem:[%s7198_s18 + $0x68] sm:$0xff] }
 0x73a   : > { %v4969_v62 = vpop.permute.xlu1 %4968 }
 0x73b   : > { %5016 = vst.msk [vmem:[#allocation2 + $0x8] sm:$0xff] %vm5014_vm4, %v4969_v62  ;;  %v4835_v42 = vpop.permute.xlu0 %4834  ;;  %v5031_v43 = vld [vmem:[#allocation2] sm:$0xff]  ;;  %v5216_v7 = vadd.f32 %v7008_v47, %v5215_v8 }
 0x73c   : > { %4868 = vst.msk [vmem:[#allocation2 + $0x78] sm:$0xff] %vm4852_vm2, %v4835_v42 }
 0x73d   : > { %4949 = vst.msk [vmem:[#allocation2 + $0x78] sm:$0xff] %vm4933_vm3, %v4916_v9  ;;  %v9128_v5 = vsel %vm5217_vm5, %v7008_v47, %v5216_v7 }
 0x742   : > { %v4914_v44 = vpop.permute.xlu1 %4913  ;;  %v5032_v18 = vld [vmem:[#allocation2 + $0x8] sm:$0xff] }
 0x743   : > { %4948 = vst.msk [vmem:[#allocation2 + $0x70] sm:$0xff] %vm4933_vm3, %v4914_v44  ;;  %v4995_v53 = vpop.permute.xlu0 %4994  ;;  %v5047_v26 = vpack.c.bf16 %v5032_v18, %v5031_v43 }
 0x744   : > { %5029 = vst.msk [vmem:[#allocation2 + $0x70] sm:$0xff] %vm5014_vm4, %v4995_v53 }
 0x745   : > { %6503 = vmatmul.msk.bf16.vlgmr.msrb.gmra.mxu0 %vm489_vm0, %v5047_v26 }
 0x74a   : > { %v4997_v11 = vpop.permute.xlu1 %4996 }
 0x74b   : > { %5030 = vst.msk [vmem:[#allocation2 + $0x78] sm:$0xff] %vm5014_vm4, %v4997_v11  ;;  %v5045_v55 = vld [vmem:[#allocation2 + $0x70] sm:$0xff] }
 0x751   : > { %v5172_v21 = vpop.xlane.xlu2 %5171 }
 0x752   : > { %v5221_v49 = vmul.f32 %v9128_v5, %v5172_v21  ;;  %v5046_v35 = vld [vmem:[#allocation2 + $0x78] sm:$0xff] }
 0x753   : > { %v5054_v34 = vpack.c.bf16 %v5046_v35, %v5045_v55  ;;  %v7085_v35 = vld [vmem:[%s7198_s18] sm:$0xff] }
 0x754   : > { %v9132_v45 = vsub.f32 %v9069_v25, %v5221_v49  ;;  %v5191_v25 = vsel %vm489_vm0, %v9140_v13, 0.0 }
 0x755   : > { %6510 = vmatmul.msk.bf16.gmra.mxu1 %vm489_vm0, %v5054_v34 }
 0x756   : > { %v5253_v10 = vmul.f32 %v9132_v45, %v9132_v45 }
 0x758   : > { %v5273_v38 = vsel %vm489_vm0, %v5253_v10, 0.0 }
 0x759   : > { %5274 = vadd.xlane.f32.xlu2 %v5273_v38 }
 0x75c   : > { %v5133_v52 = vpop.f32.mrf.mxu1 }
 0x75d   : > { %v5134_v4 = vadd.f32 %v9063_v29, %v5133_v52 }
 0x75f   : > { %v9146_v37 = vadd.f32 %v7081_v50, %v5134_v4 }
 0x761   : > { %5192 = vadd.xlane.f32.xlu2 %v5191_v25  ;;  %v5194_v14 = vsel %vm489_vm0, %v9146_v37, 0.0 }
 0x764   : > { %v5135_v63 = vpop.f32.mrf.mxu1 }
 0x765   : > { %v5136_v0 = vadd.f32 %v9063_v29, %v5135_v63 }
 0x767   : > { %v9180_v46 = vadd.f32 %v7082_v54, %v5136_v0 }
 0x769   : > { %5195 = vadd.xlane.f32.xlu2 %v5194_v14  ;;  %v5197_v27 = vsel %vm489_vm0, %v9180_v46, 0.0 }
 0x76e   : > { %v5175_v3 = vpop.xlane.xlu0 %5174 }
 0x76f   : > { %v5222_v57 = vmul.f32 %v9128_v5, %v5175_v3 }
 0x771   : > { %v9152_v24 = vsub.f32 %v9079_v61, %v5222_v57  ;;  %v5181_v16 = vpop.xlane.xlu2 %5180  ;;  %v7087_v57 = vld [vmem:[%s7198_s18 + $0x70] sm:$0xff] }
 0x772   : > { %v5224_v31 = vmul.f32 %v9128_v5, %v5181_v16 }
 0x773   : > { %v5254_v48 = vmul.f32 %v9152_v24, %v9152_v24 }
 0x774   : > { %v9158_v56 = vsub.f32 %v9086_v28, %v5224_v31 }
 0x775   : > { %v5178_v59 = vpop.xlane.xlu1 %5177  ;;  %v5276_v6 = vsel %vm489_vm0, %v5254_v48, 0.0 }
 0x776   : > { %v5223_v15 = vmul.f32 %v9128_v5, %v5178_v59  ;;  %5277 = vadd.xlane.f32.xlu0 %v5276_v6  ;;  %v5256_v61 = vmul.f32 %v9158_v56, %v9158_v56 }
 0x778   : > { %v9165_v2 = vsub.f32 %v9089_v23, %v5223_v15  ;;  %v5282_v51 = vsel %vm489_vm0, %v5256_v61, 0.0 }
 0x779   : > { %5283 = vadd.xlane.f32.xlu1 %v5282_v51  ;;  %v5184_v19 = vpop.xlane.xlu0 %5183 }
 0x77a   : > { %v5225_v28 = vmul.f32 %v9128_v5, %v5184_v19  ;;  %v5255_v30 = vmul.f32 %v9165_v2, %v9165_v2 }
 0x77c   : > { %v9172_v20 = vsub.f32 %v9097_v41, %v5225_v28  ;;  %v5279_v22 = vsel %vm489_vm0, %v5255_v30, 0.0  ;;  %v7088_v28 = vld [vmem:[%s7198_s18 + $0x78] sm:$0xff] }
 0x77e   : > { %5280 = vadd.xlane.f32.xlu0 %v5279_v22  ;;  %v5257_v23 = vmul.f32 %v9172_v20, %v9172_v20 }
 0x780   : > { %v5285_v32 = vsel %vm489_vm0, %v5257_v23, 0.0  ;;  %v6558_v23 = vld [vmem:[%s9955_s7 + $0x8] sm:$0xff] }
 0x781   : > { %v5187_v40 = vpop.xlane.xlu1 %5186  ;;  %5286 = vadd.xlane.f32.xlu1 %v5285_v32  ;;  %6565 = vmatpush.bf16.msra.mxu2 %v6558_v23 }
 0x782   : > { %v5226_v12 = vmul.f32 %v9128_v5, %v5187_v40  ;;  %5621 = vmatpush.bf16.msra.mxu0 %v6558_v23 }
 0x784   : > { %v9184_v41 = vsub.f32 %v9103_v39, %v5226_v12 }
 0x786   : > { %5198 = vadd.xlane.f32.xlu0 %v5197_v27  ;;  %v5258_v62 = vmul.f32 %v9184_v41, %v9184_v41 }
 0x788   : > { %v5288_v42 = vsel %vm489_vm0, %v5258_v62, 0.0 }
 0x789   : > { %5289 = vadd.xlane.f32.xlu2 %v5288_v42 }
 0x7a6   : > { %v5190_v43 = vpop.xlane.xlu1 %5189 }
 0x7a7   : > { %v5227_v53 = vmul.f32 %v9128_v5, %v5190_v43 }
 0x7a9   : > { %v9203_v11 = vsub.f32 %v9114_v58, %v5227_v53 }
 0x7ab   : > { %v5259_v55 = vmul.f32 %v9203_v11, %v9203_v11 }
 0x7ad   : > { %v5291_v58 = vsel %vm489_vm0, %v5259_v55, 0.0 }
 0x7b2   : > { %v5138_v47 = vpop.f32.mrf.mxu1 }
 0x7b3   : > { %v5139_v9 = vadd.f32 %v9063_v29, %v5138_v47 }
 0x7b5   : > { %v9193_v44 = vadd.f32 %v7083_v1, %v5139_v9 }
 0x7b7   : > { %v5200_v39 = vsel %vm489_vm0, %v9193_v44, 0.0 }
 0x7b8   : > { %5201 = vadd.xlane.f32.xlu0 %v5200_v39 }
 0x7ba   : > { %v5140_v18 = vpop.f32.mrf.mxu1 }
 0x7bb   : > { %v5141_v26 = vadd.f32 %v9063_v29, %v5140_v18 }
 0x7bd   : > { %v9200_v8 = vadd.f32 %v7084_v36, %v5141_v26 }
 0x7bf   : > { %v5203_v7 = vsel %vm489_vm0, %v9200_v8, 0.0 }
 0x7c0   : > { %5204 = vadd.xlane.f32.xlu1 %v5203_v7 }
 0x7c2   : > { %v5108_v21 = vpop.f32.mrf.mxu0 }
 0x7c3   : > { %v5109_v49 = vadd.f32 %v9063_v29, %v5108_v21 }
 0x7c5   : > { %v9211_v34 = vadd.f32 %v7085_v35, %v5109_v49 }
 0x7c7   : > { %v5164_v60 = vsel %vm489_vm0, %v9211_v34, 0.0 }
 0x7c8   : > { %5165 = vadd.xlane.f32.xlu2 %v5164_v60  ;;  %5292 = vadd.xlane.f32.xlu1 %v5291_v58 }
 0x7ca   : > { %v5110_v10 = vpop.f32.mrf.mxu0 }
 0x7cb   : > { %v5111_v33 = vadd.f32 %v9063_v29, %v5110_v10 }
 0x7cc   : > { %v5275_v38 = vpop.xlane.xlu2 %5274 }
 0x7cd   : > { %v9218_v52 = vadd.f32 %v7086_v17, %v5111_v33  ;;  %v5317_v14 = vmul.f32 %v5275_v38, %v9128_v5 }
 0x7cf   : > { %v5167_v4 = vsel %vm489_vm0, %v9218_v52, 0.0  ;;  %v5333_v6 = vadd.f32 1e-05, %v5317_v14 }
 0x7d0   : > { %5168 = vadd.xlane.f32.xlu0 %v5167_v4 }
 0x7d1   : > { %7009 = vrsqrt.f32 %v5333_v6  ;;  %vm5373_vm7 = vweird.f32 %v5333_v6 }
 0x7d2   : > { %v5143_v25 = vpop.f32.mrf.mxu1 }
 0x7d3   : > { %v5144_v50 = vadd.f32 %v9063_v29, %v5143_v25 }
 0x7d4   : > { %v5193_v3 = vpop.xlane.xlu2 %5192 }
 0x7d5   : > { %v9225_v16 = vadd.f32 %v7087_v57, %v5144_v50  ;;  %v5228_v31 = vmul.f32 %v9128_v5, %v5193_v3  ;;  %v9269_v3 = vld [vmem:[%s9953_s5] ss:$0 sm:$0xff] }
 0x7d7   : > { %v9229_v48 = vsub.f32 %v9140_v13, %v5228_v31  ;;  %v5206_v59 = vsel %vm489_vm0, %v9225_v16, 0.0  ;;  %v7010_v32 = vpop.eup %7009 }
 0x7d8   : > { %5207 = vadd.xlane.f32.xlu0 %v5206_v59  ;;  %v5368_v40 = vmul.f32 %v7010_v32, %v5333_v6  ;;  %vm5374_vm6 = vweird.f32 %v7010_v32 }
 0x7d9   : > { %v5260_v15 = vmul.f32 %v9229_v48, %v9229_v48  ;;  %vm5375_vm8 = vmor %vm5373_vm7, %vm5374_vm6 }
 0x7da   : > { %v5145_v61 = vpop.f32.mrf.mxu1  ;;  %v5369_v12 = vmul.f32 %v7010_v32, %v5368_v40 }
 0x7db   : > { %v5146_v51 = vadd.f32 %v9063_v29, %v5145_v61  ;;  %v5294_v19 = vsel %vm489_vm0, %v5260_v15, 0.0 }
 0x7dc   : > { %v5196_v63 = vpop.xlane.xlu2 %5195  ;;  %5295 = vadd.xlane.f32.xlu2 %v5294_v19  ;;  %v5370_v9 = vmul.f32 0.5, %v5369_v12 }
 0x7dd   : > { %v9238_v30 = vadd.f32 %v7088_v28, %v5146_v51  ;;  %v5229_v13 = vmul.f32 %v9128_v5, %v5196_v63 }
 0x7de   : > { %v5371_v43 = vsub.f32 1.5, %v5370_v9 }
 0x7df   : > { %v9242_v0 = vsub.f32 %v9146_v37, %v5229_v13  ;;  %v5209_v22 = vsel %vm489_vm0, %v9238_v30, 0.0  ;;  %v6557_v37 = vld [vmem:[%s9955_s7] sm:$0xff] }
 0x7e0   : > { %5210 = vadd.xlane.f32.xlu1 %v5209_v22  ;;  %6566 = vmatpush.bf16.msra.mxu2 %v6557_v37  ;;  %v5372_v21 = vmul.f32 %v7010_v32, %v5371_v43 }
 0x7e1   : > { %v5261_v29 = vmul.f32 %v9242_v0, %v9242_v0  ;;  %5622 = vmatpush.bf16.msra.mxu0 %v6557_v37 }
 0x7e2   : > { %v5376_v33 = vsel %vm5375_vm8, %v7010_v32, %v5372_v21 }
 0x7e3   : > { %v5297_v54 = vsel %vm489_vm0, %v5261_v29, 0.0  ;;  %v5509_v57 = vmul.f32 %v5376_v33, %v9132_v45  ;;  %v9282_v45 = vld [vmem:[%s9954_s6] ss:$0 sm:$0xff] }
 0x7e4   : > { %5298 = vadd.xlane.f32.xlu2 %v5297_v54 }
 0x7e9   : > { %v5278_v27 = vpop.xlane.xlu0 %5277 }
 0x7ea   : > { %v5318_v62 = vmul.f32 %v5278_v27, %v9128_v5 }
 0x7ec   : > { %v5334_v42 = vadd.f32 1e-05, %v5318_v62  ;;  %v5284_v47 = vpop.xlane.xlu1 %5283 }
 0x7ed   : > { %v5320_v1 = vmul.f32 %v5284_v47, %v9128_v5 }
 0x7ee   : > { %7011 = vrsqrt.f32 %v5334_v42  ;;  %vm5383_vm10 = vweird.f32 %v5334_v42 }
 0x7ef   : > { %v9257_v39 = vadd.f32 1e-05, %v5320_v1 }
 0x7f1   : > { %7013 = vrsqrt.f32 %v9257_v39  ;;  %v5281_v18 = vpop.xlane.xlu0 %5280  ;;  %vm5403_vm1 = vweird.f32 %v9257_v39 }
 0x7f2   : > { %v5319_v53 = vmul.f32 %v5281_v18, %v9128_v5 }
 0x7f4   : > { %v7012_v26 = vpop.eup %7011  ;;  %v5335_v36 = vadd.f32 1e-05, %v5319_v53  ;;  %v5287_v7 = vpop.xlane.xlu1 %5286 }
 0x7f5   : > { %v5378_v49 = vmul.f32 %v7012_v26, %v5334_v42  ;;  %v5321_v55 = vmul.f32 %v5287_v7, %v9128_v5  ;;  %vm5384_vm9 = vweird.f32 %v7012_v26 }
 0x7f6   : > { %7015 = vrsqrt.f32 %v5335_v36  ;;  %vm5385_vm11 = vmor %vm5383_vm10, %vm5384_vm9  ;;  %vm5393_vm13 = vweird.f32 %v5335_v36 }
 0x7f7   : > { %v7014_v35 = vpop.eup %7013  ;;  %v5379_v60 = vmul.f32 %v7012_v26, %v5378_v49  ;;  %v9263_v10 = vadd.f32 1e-05, %v5321_v55 }
 0x7f8   : > { %v5398_v58 = vmul.f32 %v7014_v35, %v9257_v39  ;;  %vm5404_vm14 = vweird.f32 %v7014_v35 }
 0x7f9   : > { %v5380_v38 = vmul.f32 0.5, %v5379_v60  ;;  %v5199_v17 = vpop.xlane.xlu0 %5198  ;;  %7017 = vrsqrt.f32 %v9263_v10  ;;  %vm5405_vm2 = vmor %vm5403_vm1, %vm5404_vm14  ;;  %vm5413_vm7 = vweird.f32 %v9263_v10 }
 0x7fa   : > { %v5399_v4 = vmul.f32 %v7014_v35, %v5398_v58  ;;  %v5230_v25 = vmul.f32 %v9128_v5, %v5199_v17 }
 0x7fb   : > { %v5381_v50 = vsub.f32 1.5, %v5380_v38 }
 0x7fc   : > { %v7016_v14 = vpop.eup %7015  ;;  %v9274_v31 = vsub.f32 %v9180_v46, %v5230_v25  ;;  %v5290_v59 = vpop.xlane.xlu2 %5289  ;;  %v5400_v15 = vmul.f32 0.5, %v5399_v4  ;;  %v5529_v46 = vmul.f32 %v9269_v3, %v5509_v57 }
 0x7fd   : > { %v5382_v6 = vmul.f32 %v7012_v26, %v5381_v50  ;;  %v5388_v61 = vmul.f32 %v7016_v14, %v5335_v36  ;;  %v5322_v51 = vmul.f32 %v5290_v59, %v9128_v5  ;;  %vm5394_vm12 = vweird.f32 %v7016_v14 }
 0x7fe   : > { %v5262_v19 = vmul.f32 %v9274_v31, %v9274_v31  ;;  %v5401_v29 = vsub.f32 1.5, %v5400_v15  ;;  %v9289_v12 = vadd.f32 %v9282_v45, %v5529_v46  ;;  %vm5395_vm15 = vmor %vm5393_vm13, %vm5394_vm12 }
 0x7ff   : > { %v5386_v63 = vsel %vm5385_vm11, %v7012_v26, %v5382_v6  ;;  %v5389_v28 = vmul.f32 %v7016_v14, %v5388_v61  ;;  %v5338_v13 = vadd.f32 1e-05, %v5322_v51  ;;  %v7018_v54 = vpop.eup %7017 }
 0x800   : > { %v5510_v22 = vmul.f32 %v5386_v63, %v9152_v24  ;;  %v5300_v32 = vsel %vm489_vm0, %v5262_v19, 0.0  ;;  %v5402_v62 = vmul.f32 %v7014_v35, %v5401_v29  ;;  %v5408_v42 = vmul.f32 %v7018_v54, %v9263_v10 }
 0x801   : > { %v5390_v23 = vmul.f32 0.5, %v5389_v28  ;;  %7019 = vrsqrt.f32 %v5338_v13  ;;  %5301 = vadd.xlane.f32.xlu0 %v5300_v32  ;;  %vm5414_vm4 = vweird.f32 %v7018_v54  ;;  %vm5423_vm5 = vweird.f32 %v5338_v13 }
 0x802   : > { %v5530_v40 = vmul.f32 %v9269_v3, %v5510_v22  ;;  %v5406_v18 = vsel %vm5405_vm2, %v7014_v35, %v5402_v62  ;;  %v5409_v53 = vmul.f32 %v7018_v54, %v5408_v42  ;;  %vm5415_vm8 = vmor %vm5413_vm7, %vm5414_vm4 }
 0x803   : > { %v5391_v37 = vsub.f32 1.5, %v5390_v23  ;;  %v5512_v7 = vmul.f32 %v5406_v18, %v9158_v56 }
 0x804   : > { %v9292_v27 = vadd.f32 %v9282_v45, %v5530_v40  ;;  %v5410_v49 = vmul.f32 0.5, %v5409_v53 }
 0x805   : > { %v5392_v24 = vmul.f32 %v7016_v14, %v5391_v37  ;;  %v5532_v58 = vmul.f32 %v9269_v3, %v5512_v7 }
 0x806   : > { %v5564_v47 = vpack.c.bf16 %v9292_v27, %v9289_v12  ;;  %v5411_v39 = vsub.f32 1.5, %v5410_v49 }
 0x807   : > { %v7020_v9 = vpop.eup %7019  ;;  %v5396_v1 = vsel %vm5395_vm15, %v7016_v14, %v5392_v24  ;;  %v9307_v35 = vadd.f32 %v9282_v45, %v5532_v58 }
 0x808   : > { %v5418_v43 = vmul.f32 %v7020_v9, %v5338_v13  ;;  %6520 = vmatmul.msk.bf16.vlgmr.msra.gmra.mxu2 %vm489_vm0, %v5564_v47  ;;  %v5511_v26 = vmul.f32 %v5396_v1, %v9165_v2  ;;  %vm5424_vm3 = vweird.f32 %v7020_v9  ;;  %v5412_v2 = vmul.f32 %v7018_v54, %v5411_v39 }
 0x809   : > { %vm5425_vm6 = vmor %vm5423_vm5, %vm5424_vm3 }
 0x80a   : > { %v5419_v36 = vmul.f32 %v7020_v9, %v5418_v43  ;;  %v5531_v55 = vmul.f32 %v9269_v3, %v5511_v26  ;;  %v5416_v4 = vsel %vm5415_vm8, %v7018_v54, %v5412_v2 }
 0x80b   : > { %v5513_v50 = vmul.f32 %v5416_v4, %v9172_v20 }
 0x80c   : > { %v5420_v21 = vmul.f32 0.5, %v5419_v36  ;;  %v9304_v33 = vadd.f32 %v9282_v45, %v5531_v55 }
 0x80d   : > { %v5533_v57 = vmul.f32 %v9269_v3, %v5513_v50 }
 0x80e   : > { %v5421_v60 = vsub.f32 1.5, %v5420_v21  ;;  %v5565_v56 = vpack.c.bf16 %v9307_v35, %v9304_v33 }
 0x80f   : > { %v9321_v6 = vadd.f32 %v9282_v45, %v5533_v57 }
 0x810   : > { %v5422_v38 = vmul.f32 %v7020_v9, %v5421_v60 }
 0x812   : > { %v5426_v17 = vsel %vm5425_vm6, %v7020_v9, %v5422_v38  ;;  %vm5724_vm6 = vcmask 523264  }
 0x813   : > { %v5514_v25 = vmul.f32 %v5426_v17, %v9184_v41 }
 0x815   : > { %v5534_v14 = vmul.f32 %v9269_v3, %v5514_v25 }
 0x817   : > { %v9318_v59 = vadd.f32 %v9282_v45, %v5534_v14 }
 0x818   : > { %6521 = vmatmul.msk.bf16.gmra.mxu2 %vm489_vm0, %v5565_v56 }
 0x819   : > { %v5566_v10 = vpack.c.bf16 %v9318_v59, %v9321_v6 }
 0x828   : > { %6522 = vmatmul.msk.bf16.gmra.mxu2 %vm489_vm0, %v5566_v10 }
 0x82b   : > { %v5202_v15 = vpop.xlane.xlu0 %5201 }
 0x82c   : > { %v5231_v41 = vmul.f32 %v9128_v5, %v5202_v15 }
 0x82e   : > { %v9328_v20 = vsub.f32 %v9193_v44, %v5231_v41 }
 0x830   : > { %v5263_v61 = vmul.f32 %v9328_v20, %v9328_v20 }
 0x832   : > { %v5303_v51 = vsel %vm489_vm0, %v5263_v61, 0.0 }
 0x833   : > { %v5205_v19 = vpop.xlane.xlu1 %5204  ;;  %5304 = vadd.xlane.f32.xlu1 %v5303_v51 }
 0x834   : > { %v5232_v63 = vmul.f32 %v9128_v5, %v5205_v19 }
 0x836   : > { %v9335_v28 = vsub.f32 %v9200_v8, %v5232_v63 }
 0x838   : > { %v5264_v13 = vmul.f32 %v9335_v28, %v9335_v28 }
 0x83a   : > { %v5306_v46 = vsel %vm489_vm0, %v5264_v13, 0.0 }
 0x83b   : > { %v5166_v22 = vpop.xlane.xlu2 %5165  ;;  %5307 = vadd.xlane.f32.xlu2 %v5306_v46  ;;  %v5293_v44 = vpop.xlane.xlu1 %5292 }
 0x83c   : > { %v5219_v29 = vmul.f32 %v9128_v5, %v5166_v22  ;;  %v5323_v23 = vmul.f32 %v5293_v44, %v9128_v5 }
 0x83e   : > { %v9343_v32 = vsub.f32 %v9211_v34, %v5219_v29  ;;  %v5339_v54 = vadd.f32 1e-05, %v5323_v23 }
 0x840   : > { %v5251_v8 = vmul.f32 %v9343_v32, %v9343_v32  ;;  %7021 = vrsqrt.f32 %v5339_v54  ;;  %vm5433_vm10 = vweird.f32 %v5339_v54 }
 0x842   : > { %v5267_v40 = vsel %vm489_vm0, %v5251_v8, 0.0 }
 0x843   : > { %5268 = vadd.xlane.f32.xlu0 %v5267_v40  ;;  %v5169_v37 = vpop.xlane.xlu0 %5168  ;;  %v6562_v40 = vld [vmem:[%s9957_s9 + $0x18] sm:$0xff] }
 0x844   : > { %v5220_v62 = vmul.f32 %v9128_v5, %v5169_v37  ;;  %6567 = vmatpush.bf16.msra.mxu3 %v6562_v40  ;;  %5753 = vmatpush.bf16.msrb.mxu0 %v6562_v40 }
 0x846   : > { %v9350_v24 = vsub.f32 %v9218_v52, %v5220_v62  ;;  %v7022_v42 = vpop.eup %7021  ;;  %v6561_v62 = vld [vmem:[%s9957_s9 + $0x10] sm:$0xff] }
 0x847   : > { %v5428_v9 = vmul.f32 %v7022_v42, %v5339_v54  ;;  %vm5434_vm9 = vweird.f32 %v7022_v42 }
 0x848   : > { %v5252_v47 = vmul.f32 %v9350_v24, %v9350_v24  ;;  %vm5435_vm11 = vmor %vm5433_vm10, %vm5434_vm9  ;;  %6568 = vmatpush.bf16.msra.mxu3 %v6561_v62  ;;  %5754 = vmatpush.bf16.msrb.mxu0 %v6561_v62 }
 0x849   : > { %v5429_v53 = vmul.f32 %v7022_v42, %v5428_v9 }
 0x84a   : > { %v5270_v34 = vsel %vm489_vm0, %v5252_v47, 0.0 }
 0x84b   : > { %5271 = vadd.xlane.f32.xlu1 %v5270_v34  ;;  %v5208_v1 = vpop.xlane.xlu0 %5207  ;;  %v5430_v49 = vmul.f32 0.5, %v5429_v53 }
 0x84c   : > { %v5233_v43 = vmul.f32 %v9128_v5, %v5208_v1  ;;  %v6560_v1 = vld [vmem:[%s9957_s9 + $0x8] sm:$0xff] }
 0x84d   : > { %6569 = vmatpush.bf16.msra.mxu3 %v6560_v1  ;;  %5755 = vmatpush.bf16.msrb.mxu0 %v6560_v1 }
 0x84e   : > { %v9357_v18 = vsub.f32 %v9225_v16, %v5233_v43  ;;  %v5431_v16 = vsub.f32 1.5, %v5430_v49 }
 0x84f   : > { %v5296_v26 = vpop.xlane.xlu2 %5295 }
 0x850   : > { %v5324_v36 = vmul.f32 %v5296_v26, %v9128_v5  ;;  %v5265_v52 = vmul.f32 %v9357_v18, %v9357_v18  ;;  %v5432_v56 = vmul.f32 %v7022_v42, %v5431_v16  ;;  %v9403_v16 = vld [vmem:[%s9956_s8] ss:$0 sm:$0xff] }
 0x852   : > { %v5340_v7 = vadd.f32 1e-05, %v5324_v36  ;;  %v5309_v21 = vsel %vm489_vm0, %v5265_v52, 0.0  ;;  %v5436_v50 = vsel %vm5435_vm11, %v7022_v42, %v5432_v56  ;;  %v6559_v36 = vld [vmem:[%s9957_s9] sm:$0xff] }
 0x853   : > { %v5211_v55 = vpop.xlane.xlu1 %5210  ;;  %5310 = vadd.xlane.f32.xlu2 %v5309_v21  ;;  %v5515_v10 = vmul.f32 %v5436_v50, %v9203_v11  ;;  %6570 = vmatpush.bf16.msra.mxu3 %v6559_v36 }
 0x854   : > { %7023 = vrsqrt.f32 %v5340_v7  ;;  %v5234_v60 = vmul.f32 %v9128_v5, %v5211_v55  ;;  %vm5443_vm13 = vweird.f32 %v5340_v7  ;;  %5756 = vmatpush.bf16.msrb.mxu0 %v6559_v36 }
 0x855   : > { %v5535_v19 = vmul.f32 %v9269_v3, %v5515_v10 }
 0x856   : > { %v9365_v58 = vsub.f32 %v9238_v30, %v5234_v60 }
 0x857   : > { %v5299_v25 = vpop.xlane.xlu2 %5298  ;;  %v9376_v13 = vadd.f32 %v9282_v45, %v5535_v19 }
 0x858   : > { %v5266_v39 = vmul.f32 %v9365_v58, %v9365_v58  ;;  %v5325_v30 = vmul.f32 %v5299_v25, %v9128_v5 }
 0x85a   : > { %v7024_v38 = vpop.eup %7023  ;;  %v5312_v2 = vsel %vm489_vm0, %v5266_v39, 0.0  ;;  %v5341_v41 = vadd.f32 1e-05, %v5325_v30 }
 0x85b   : > { %v5438_v17 = vmul.f32 %v7024_v38, %v5340_v7  ;;  %5313 = vadd.xlane.f32.xlu0 %v5312_v2  ;;  %vm5444_vm12 = vweird.f32 %v7024_v38 }
 0x85c   : > { %vm5445_vm14 = vmor %vm5443_vm13, %vm5444_vm12  ;;  %7025 = vrsqrt.f32 %v5341_v41  ;;  %vm5453_vm1 = vweird.f32 %v5341_v41 }
 0x85d   : > { %v5439_v4 = vmul.f32 %v7024_v38, %v5438_v17 }
 0x85f   : > { %v5440_v14 = vmul.f32 0.5, %v5439_v4 }
 0x861   : > { %v5441_v57 = vsub.f32 1.5, %v5440_v14 }
 0x862   : > { %v7026_v22 = vpop.eup %7025 }
 0x863   : > { %v5442_v15 = vmul.f32 %v7024_v38, %v5441_v57  ;;  %v5448_v44 = vmul.f32 %v7026_v22, %v5341_v41  ;;  %vm5454_vm15 = vweird.f32 %v7026_v22 }
 0x864   : > { %vm5455_vm2 = vmor %vm5453_vm1, %vm5454_vm15 }
 0x865   : > { %v5446_v61 = vsel %vm5445_vm14, %v7024_v38, %v5442_v15  ;;  %v5449_v29 = vmul.f32 %v7026_v22, %v5448_v44 }
 0x866   : > { %v5516_v51 = vmul.f32 %v5446_v61, %v9229_v48 }
 0x867   : > { %v5450_v8 = vmul.f32 0.5, %v5449_v29 }
 0x868   : > { %v5536_v63 = vmul.f32 %v9269_v3, %v5516_v51 }
 0x869   : > { %v5451_v37 = vsub.f32 1.5, %v5450_v8 }
 0x86a   : > { %v9379_v46 = vadd.f32 %v9282_v45, %v5536_v63 }
 0x86b   : > { %v5452_v47 = vmul.f32 %v7026_v22, %v5451_v37 }
 0x86c   : > { %v5567_v11 = vpack.c.bf16 %v9379_v46, %v9376_v13 }
 0x86d   : > { %v5456_v43 = vsel %vm5455_vm2, %v7026_v22, %v5452_v47 }
 0x86e   : > { %6523 = vmatmul.msk.bf16.gmra.mxu2 %vm489_vm0, %v5567_v11  ;;  %v5517_v52 = vmul.f32 %v5456_v43, %v9242_v0 }
 0x870   : > { %v5537_v60 = vmul.f32 %v9269_v3, %v5517_v52 }
 0x872   : > { %v9407_v0 = vadd.f32 %v9282_v45, %v5537_v60 }
 0x874   : > { %v5302_v48 = vpop.xlane.xlu0 %5301 }
 0x875   : > { %v5326_v23 = vmul.f32 %v5302_v48, %v9128_v5 }
 0x877   : > { %v5342_v54 = vadd.f32 1e-05, %v5326_v23 }
 0x879   : > { %7027 = vrsqrt.f32 %v5342_v54  ;;  %vm5463_vm4 = vweird.f32 %v5342_v54 }
 0x87f   : > { %v7028_v42 = vpop.eup %7027 }
 0x880   : > { %v5458_v34 = vmul.f32 %v7028_v42, %v5342_v54  ;;  %vm5464_vm3 = vweird.f32 %v7028_v42 }
 0x881   : > { %vm5465_vm5 = vmor %vm5463_vm4, %vm5464_vm3 }
 0x882   : > { %v5459_v9 = vmul.f32 %v7028_v42, %v5458_v34 }
 0x884   : > { %v5460_v53 = vmul.f32 0.5, %v5459_v9 }
 0x886   : > { %v5461_v26 = vsub.f32 1.5, %v5460_v53 }
 0x888   : > { %v5462_v7 = vmul.f32 %v7028_v42, %v5461_v26 }
 0x88a   : > { %v5466_v21 = vsel %vm5465_vm5, %v7028_v42, %v5462_v7 }
 0x88b   : > { %v5629_v49 = vpop.f32.mrf.mxu2  ;;  %v5518_v55 = vmul.f32 %v5466_v21, %v9274_v31 }
 0x88c   : > { %v5630_v2 = vadd.f32 %v9403_v16, %v5629_v49 }
 0x88d   : > { %v5538_v39 = vmul.f32 %v9269_v3, %v5518_v55 }
 0x88e   : > { %v5666_v4 = vmax.f32 %v5630_v2, 0.0 }
 0x88f   : > { %v9410_v38 = vadd.f32 %v9282_v45, %v5538_v39 }
 0x891   : > { %v5568_v31 = vpack.c.bf16 %v9410_v38, %v9407_v0 }
 0x893   : > { %v5631_v56 = vpop.f32.mrf.mxu2  ;;  %6524 = vmatmul.msk.bf16.gmra.mxu2 %vm489_vm0, %v5568_v31 }
 0x894   : > { %v5632_v17 = vadd.f32 %v9403_v16, %v5631_v56 }
 0x896   : > { %v5667_v25 = vmax.f32 %v5632_v17, 0.0 }
 0x898   : > { %v9417_v50 = vpack.c.bf16 %v5667_v25, %v5666_v4 }
 0x89b   : > { %v5634_v14 = vpop.f32.mrf.mxu2 }
 0x89c   : > { %v5635_v30 = vadd.f32 %v9403_v16, %v5634_v14 }
 0x89e   : > { %v5668_v15 = vmax.f32 %v5635_v30, 0.0 }
 0x8a3   : > { %v5636_v57 = vpop.f32.mrf.mxu2 }
 0x8a4   : > { %v5637_v10 = vadd.f32 %v9403_v16, %v5636_v57 }
 0x8a6   : > { %v5669_v41 = vmax.f32 %v5637_v10, 0.0  ;;  %v5305_v61 = vpop.xlane.xlu1 %5304 }
 0x8a7   : > { %v5327_v51 = vmul.f32 %v5305_v61, %v9128_v5 }
 0x8a8   : > { %v5682_v19 = vpack.c.bf16 %v5669_v41, %v5668_v15 }
 0x8a9   : > { %v5343_v63 = vadd.f32 1e-05, %v5327_v51 }
 0x8aa   : > { %6545 = vmatmul.msk.bf16.vlgmr.msra.gmra.mxu3 %vm5724_vm6, %v5682_v19 }
 0x8ab   : > { %7029 = vrsqrt.f32 %v5343_v63  ;;  %v5639_v11 = vpop.f32.mrf.mxu2  ;;  %vm5473_vm8 = vweird.f32 %v5343_v63 }
 0x8ac   : > { %v5640_v54 = vadd.f32 %v9403_v16, %v5639_v11 }
 0x8ae   : > { %v5308_v22 = vpop.xlane.xlu2 %5307  ;;  %v5670_v42 = vmax.f32 %v5640_v54, 0.0 }
 0x8af   : > { %v5328_v44 = vmul.f32 %v5308_v22, %v9128_v5 }
 0x8b1   : > { %v7030_v29 = vpop.eup %7029  ;;  %v5344_v48 = vadd.f32 1e-05, %v5328_v44 }
 0x8b2   : > { %v5468_v23 = vmul.f32 %v7030_v29, %v5343_v63  ;;  %vm5474_vm7 = vweird.f32 %v7030_v29 }
 0x8b3   : > { %7031 = vrsqrt.f32 %v5344_v48  ;;  %v5641_v8 = vpop.f32.mrf.mxu2  ;;  %vm5475_vm9 = vmor %vm5473_vm8, %vm5474_vm7  ;;  %vm5483_vm11 = vweird.f32 %v5344_v48 }
 0x8b4   : > { %v5469_v40 = vmul.f32 %v7030_v29, %v5468_v23  ;;  %v5642_v37 = vadd.f32 %v9403_v16, %v5641_v8 }
 0x8b6   : > { %v5470_v62 = vmul.f32 0.5, %v5469_v40  ;;  %v5671_v47 = vmax.f32 %v5642_v37, 0.0  ;;  %v5269_v34 = vpop.xlane.xlu0 %5268 }
 0x8b7   : > { %v5315_v9 = vmul.f32 %v5269_v34, %v9128_v5 }
 0x8b8   : > { %v5471_v1 = vsub.f32 1.5, %v5470_v62  ;;  %v5683_v43 = vpack.c.bf16 %v5671_v47, %v5670_v42 }
 0x8b9   : > { %v7032_v53 = vpop.eup %7031  ;;  %v5331_v26 = vadd.f32 1e-05, %v5315_v9 }
 0x8ba   : > { %v5472_v36 = vmul.f32 %v7030_v29, %v5471_v1  ;;  %v5478_v52 = vmul.f32 %v7032_v53, %v5344_v48  ;;  %6546 = vmatmul.msk.bf16.gmra.mxu3 %vm5724_vm6, %v5683_v43  ;;  %vm5484_vm10 = vweird.f32 %v7032_v53 }
 0x8bb   : > { %7033 = vrsqrt.f32 %v5331_v26  ;;  %vm5485_vm12 = vmor %vm5483_vm11, %vm5484_vm10  ;;  %vm5353_vm14 = vweird.f32 %v5331_v26 }
 0x8bc   : > { %v5479_v7 = vmul.f32 %v7032_v53, %v5478_v52  ;;  %v5476_v21 = vsel %vm5475_vm9, %v7030_v29, %v5472_v36 }
 0x8bd   : > { %v5519_v31 = vmul.f32 %v5476_v21, %v9328_v20 }
 0x8be   : > { %v5480_v49 = vmul.f32 0.5, %v5479_v7  ;;  %v5272_v55 = vpop.xlane.xlu1 %5271 }
 0x8bf   : > { %v5316_v60 = vmul.f32 %v5272_v55, %v9128_v5  ;;  %v5539_v57 = vmul.f32 %v9269_v3, %v5519_v31 }
 0x8c0   : > { %v5481_v39 = vsub.f32 1.5, %v5480_v49 }
 0x8c1   : > { %v7034_v2 = vpop.eup %7033  ;;  %v5332_v56 = vadd.f32 1e-05, %v5316_v60  ;;  %v9435_v63 = vadd.f32 %v9282_v45, %v5539_v57 }
 0x8c2   : > { %v5482_v17 = vmul.f32 %v7032_v53, %v5481_v39  ;;  %v5348_v4 = vmul.f32 %v7034_v2, %v5331_v26  ;;  %vm5354_vm13 = vweird.f32 %v7034_v2 }
 0x8c3   : > { %7035 = vrsqrt.f32 %v5332_v56  ;;  %vm5355_vm15 = vmor %vm5353_vm14, %vm5354_vm13  ;;  %vm5363_vm2 = vweird.f32 %v5332_v56 }
 0x8c4   : > { %v5486_v25 = vsel %vm5485_vm12, %v7032_v53, %v5482_v17  ;;  %v5349_v14 = vmul.f32 %v7034_v2, %v5348_v4 }
 0x8c5   : > { %v5520_v30 = vmul.f32 %v5486_v25, %v9335_v28 }
 0x8c6   : > { %v5350_v10 = vmul.f32 0.5, %v5349_v14  ;;  %v5311_v15 = vpop.xlane.xlu2 %5310 }
 0x8c7   : > { %v5329_v41 = vmul.f32 %v5311_v15, %v9128_v5  ;;  %v5540_v61 = vmul.f32 %v9269_v3, %v5520_v30 }
 0x8c8   : > { %v5351_v51 = vsub.f32 1.5, %v5350_v10 }
 0x8c9   : > { %v7036_v20 = vpop.eup %7035  ;;  %v5345_v19 = vadd.f32 1e-05, %v5329_v41  ;;  %v9438_v11 = vadd.f32 %v9282_v45, %v5540_v61 }
 0x8ca   : > { %v5352_v22 = vmul.f32 %v7034_v2, %v5351_v51  ;;  %v5358_v28 = vmul.f32 %v7036_v20, %v5332_v56  ;;  %vm5364_vm1 = vweird.f32 %v7036_v20 }
 0x8cb   : > { %7037 = vrsqrt.f32 %v5345_v19  ;;  %v5569_v44 = vpack.c.bf16 %v9438_v11, %v9435_v63  ;;  %vm5365_vm3 = vmor %vm5363_vm2, %vm5364_vm1  ;;  %vm5493_vm5 = vweird.f32 %v5345_v19 }
 0x8cc   : > { %v5359_v29 = vmul.f32 %v7036_v20, %v5358_v28  ;;  %v5356_v48 = vsel %vm5355_vm15, %v7034_v2, %v5352_v22 }
 0x8cd   : > { %6525 = vmatmul.msk.bf16.gmra.mxu2 %vm489_vm0, %v5569_v44  ;;  %v5507_v62 = vmul.f32 %v5356_v48, %v9343_v32 }
 0x8ce   : > { %v5360_v23 = vmul.f32 0.5, %v5359_v29  ;;  %v5314_v54 = vpop.xlane.xlu0 %5313 }
 0x8cf   : > { %v5330_v8 = vmul.f32 %v5314_v54, %v9128_v5  ;;  %v5527_v43 = vmul.f32 %v9269_v3, %v5507_v62 }
 0x8d0   : > { %v5361_v40 = vsub.f32 1.5, %v5360_v23 }
 0x8d1   : > { %v7038_v37 = vpop.eup %7037  ;;  %v5346_v42 = vadd.f32 1e-05, %v5330_v8  ;;  %v9449_v21 = vadd.f32 %v9282_v45, %v5527_v43 }
 0x8d2   : > { %v5362_v47 = vmul.f32 %v7036_v20, %v5361_v40  ;;  %v5488_v34 = vmul.f32 %v7038_v37, %v5345_v19  ;;  %vm5494_vm4 = vweird.f32 %v7038_v37 }
 0x8d3   : > { %7039 = vrsqrt.f32 %v5346_v42  ;;  %vm5495_vm7 = vmor %vm5493_vm5, %vm5494_vm4  ;;  %vm5503_vm9 = vweird.f32 %v5346_v42 }
 0x8d4   : > { %v5366_v9 = vsel %vm5365_vm3, %v7036_v20, %v5362_v47  ;;  %v5489_v1 = vmul.f32 %v7038_v37, %v5488_v34 }
 0x8d5   : > { %v5508_v53 = vmul.f32 %v5366_v9, %v9350_v24 }
 0x8d6   : > { %v5490_v26 = vmul.f32 0.5, %v5489_v1 }
 0x8d7   : > { %v5528_v36 = vmul.f32 %v9269_v3, %v5508_v53 }
 0x8d8   : > { %v5491_v52 = vsub.f32 1.5, %v5490_v26 }
 0x8d9   : > { %v7040_v7 = vpop.eup %7039  ;;  %v9452_v32 = vadd.f32 %v9282_v45, %v5528_v36 }
 0x8da   : > { %v5492_v49 = vmul.f32 %v7038_v37, %v5491_v52  ;;  %v5498_v55 = vmul.f32 %v7040_v7, %v5346_v42  ;;  %vm5504_vm8 = vweird.f32 %v7040_v7 }
 0x8db   : > { %v5563_v60 = vpack.c.bf16 %v9452_v32, %v9449_v21  ;;  %vm5505_vm10 = vmor %vm5503_vm9, %vm5504_vm8 }
 0x8dc   : > { %v5499_v39 = vmul.f32 %v7040_v7, %v5498_v55  ;;  %v5496_v24 = vsel %vm5495_vm7, %v7038_v37, %v5492_v49 }
 0x8dd   : > { %6519 = vmatmul.msk.bf16.vlgmr.msra.gmra.mxu0 %vm489_vm0, %v5563_v60  ;;  %v5521_v56 = vmul.f32 %v5496_v24, %v9357_v18 }
 0x8de   : > { %v5500_v2 = vmul.f32 0.5, %v5499_v39 }
 0x8df   : > { %v5541_v14 = vmul.f32 %v9269_v3, %v5521_v56 }
 0x8e0   : > { %v5501_v31 = vsub.f32 1.5, %v5500_v2 }
 0x8e1   : > { %v9462_v57 = vadd.f32 %v9282_v45, %v5541_v14 }
 0x8e2   : > { %v5502_v17 = vmul.f32 %v7040_v7, %v5501_v31 }
 0x8e4   : > { %v5506_v4 = vsel %vm5505_vm10, %v7040_v7, %v5502_v17 }
 0x8e5   : > { %v5522_v25 = vmul.f32 %v5506_v4, %v9365_v58 }
 0x8e7   : > { %v5542_v30 = vmul.f32 %v9269_v3, %v5522_v25  ;;  %v9490_v25 = vld [vmem:[%s9958_s10] ss:$0 sm:$0xff] }
 0x8e9   : > { %v9465_v10 = vadd.f32 %v9282_v45, %v5542_v30 }
 0x8eb   : > { %v5570_v15 = vpack.c.bf16 %v9465_v10, %v9462_v57 }
 0x8ed   : > { %6526 = vmatmul.msk.bf16.gmra.mxu2 %vm489_vm0, %v5570_v15 }
 0x8f1   : > { %v5644_v18 = vpop.f32.mrf.mxu2 }
 0x8f2   : > { %v5645_v41 = vadd.f32 %v9403_v16, %v5644_v18 }
 0x8f4   : > { %v5672_v51 = vmax.f32 %v5645_v41, 0.0 }
 0x8f9   : > { %v5646_v61 = vpop.f32.mrf.mxu2 }
 0x8fa   : > { %v5647_v58 = vadd.f32 %v9403_v16, %v5646_v61 }
 0x8fc   : > { %v5673_v20 = vmax.f32 %v5647_v58, 0.0 }
 0x8fe   : > { %v5684_v3 = vpack.c.bf16 %v5673_v20, %v5672_v51 }
 0x900   : > { %6547 = vmatmul.msk.bf16.gmra.mxu3 %vm5724_vm6, %v5684_v3 }
 0x916   : > { %v5649_v19 = vpop.f32.mrf.mxu2 }
 0x917   : > { %v5650_v45 = vadd.f32 %v9403_v16, %v5649_v19 }
 0x919   : > { %v5674_v44 = vmax.f32 %v5650_v45, 0.0 }
 0x91e   : > { %v5651_v22 = vpop.f32.mrf.mxu2 }
 0x91f   : > { %v5652_v28 = vadd.f32 %v9403_v16, %v5651_v22 }
 0x921   : > { %v5675_v29 = vmax.f32 %v5652_v28, 0.0 }
 0x923   : > { %v5685_v48 = vpack.c.bf16 %v5675_v29, %v5674_v44 }
 0x925   : > { %6548 = vmatmul.msk.bf16.gmra.mxu3 %vm5724_vm6, %v5685_v48 }
 0x92d   : > { %v5768_v24 = vpop.f32.mrf.mxu3 }
 0x92e   : > { %v5769_v58 = vadd.f32 %v9490_v25, %v5768_v24 }
 0x930   : > { %v9506_v3 = vadd.f32 %v5769_v58, %v9304_v33 }
 0x932   : > { %v5826_v44 = vsel %vm489_vm0, %v9506_v3, 0.0 }
 0x935   : > { %v5770_v2 = vpop.f32.mrf.mxu3 }
 0x936   : > { %v5771_v22 = vadd.f32 %v9490_v25, %v5770_v2 }
 0x938   : > { %v9519_v33 = vadd.f32 %v5771_v22, %v9307_v35 }
 0x93d   : > { %v5773_v31 = vpop.f32.mrf.mxu3 }
 0x945   : > { %v5775_v56 = vpop.f32.mrf.mxu3 }
 0x950   : > { %v5654_v23 = vpop.f32.mrf.mxu2 }
 0x951   : > { %v5655_v54 = vadd.f32 %v9403_v16, %v5654_v23 }
 0x953   : > { %v5676_v62 = vmax.f32 %v5655_v54, 0.0 }
 0x958   : > { %v5656_v8 = vpop.f32.mrf.mxu2 }
 0x959   : > { %v5657_v40 = vadd.f32 %v9403_v16, %v5656_v8  ;;  %v5829_v8 = vsel %vm489_vm0, %v9519_v33, 0.0 }
 0x95a   : > { %v5624_v37 = vpop.f32.mrf.mxu0 }
 0x95b   : > { %v5677_v42 = vmax.f32 %v5657_v40, 0.0  ;;  %v5625_v34 = vadd.f32 %v9403_v16, %v5624_v37 }
 0x95d   : > { %v5686_v47 = vpack.c.bf16 %v5677_v42, %v5676_v62  ;;  %v5664_v43 = vmax.f32 %v5625_v34, 0.0 }
 0x95f   : > { %6549 = vmatmul.msk.bf16.gmra.mxu3 %vm5724_vm6, %v5686_v47 }
 0x962   : > { %v5626_v9 = vpop.f32.mrf.mxu0 }
 0x963   : > { %v5627_v1 = vadd.f32 %v9403_v16, %v5626_v9 }
 0x965   : > { %v5665_v53 = vmax.f32 %v5627_v1, 0.0 }
 0x967   : > { %v5680_v26 = vpack.c.bf16 %v5665_v53, %v5664_v43 }
 0x969   : > { %6543 = vmatmul.msk.bf16.vlgmr.msrb.gmra.mxu0 %vm5724_vm6, %v5680_v26 }
 0x970   : > { %v5659_v36 = vpop.f32.mrf.mxu2 }
 0x971   : > { %v5660_v52 = vadd.f32 %v9403_v16, %v5659_v36 }
 0x973   : > { %v5678_v55 = vmax.f32 %v5660_v52, 0.0 }
 0x978   : > { %v5661_v7 = vpop.f32.mrf.mxu2 }
 0x979   : > { %v5662_v49 = vadd.f32 %v9403_v16, %v5661_v7  ;;  %6544 = vmatmul.msk.bf16.gmra.mxu0 %vm5724_vm6, %v9417_v50 }
 0x97b   : > { %v5679_v60 = vmax.f32 %v5662_v49, 0.0 }
 0x97d   : > { %v5687_v39 = vpack.c.bf16 %v5679_v60, %v5678_v55 }
 0x97f   : > { %6550 = vmatmul.msk.bf16.gmra.mxu3 %vm5724_vm6, %v5687_v39 }
 0x983   : > { %v5778_v17 = vpop.f32.mrf.mxu3 }
 0x984   : > { %v5779_v40 = vadd.f32 %v9490_v25, %v5778_v17 }
 0x98b   : > { %v5780_v4 = vpop.f32.mrf.mxu3 }
 0x9a8   : > { %v5783_v30 = vpop.f32.mrf.mxu3 }
 0x9a9   : > { %v5784_v37 = vadd.f32 %v9490_v25, %v5783_v30 }
 0x9ab   : > { %v9541_v42 = vadd.f32 %v5784_v37, %v9407_v0 }
 0x9ad   : > { %v5844_v53 = vsel %vm489_vm0, %v9541_v42, 0.0 }
 0x9b0   : > { %v5785_v20 = vpop.f32.mrf.mxu3 }
 0x9b1   : > { %v5786_v9 = vadd.f32 %v9490_v25, %v5785_v20 }
 0x9e2   : > { %v5788_v29 = vpop.f32.mrf.mxu3 }
 0x9e3   : > { %v5789_v60 = vadd.f32 %v9490_v25, %v5788_v29 }
 0x9e6   : > { %v5758_v16 = vpop.f32.mrf.mxu0 }
 0x9e7   : > { %v5759_v14 = vadd.f32 %v9490_v25, %v5758_v16 }
 0x9e9   : > { %v9494_v50 = vadd.f32 %v5759_v14, %v9449_v21 }
 0x9ea   : > { %v5790_v47 = vpop.f32.mrf.mxu3 }
 0x9eb   : > { %v5814_v15 = vsel %vm489_vm0, %v9494_v50, 0.0  ;;  %v5791_v1 = vadd.f32 %v9490_v25, %v5790_v47 }
 0x9ec   : > { %5815 = vadd.xlane.f32.xlu1 %v5814_v15 }
 0x9ed   : > { %v9559_v26 = vadd.f32 %v5791_v1, %v9438_v11 }
 0x9ee   : > { %v5760_v18 = vpop.f32.mrf.mxu0 }
 0x9ef   : > { %v5761_v41 = vadd.f32 %v9490_v25, %v5760_v18  ;;  %v5853_v55 = vsel %vm489_vm0, %v9559_v26, 0.0 }
 0x9f1   : > { %v9500_v61 = vadd.f32 %v5761_v41, %v9452_v32  ;;  %v5776_v32 = vadd.f32 %v9490_v25, %v5775_v56 }
 0x9f3   : > { %v5817_v51 = vsel %vm489_vm0, %v9500_v61, 0.0 }
 0x9f4   : > { %5818 = vadd.xlane.f32.xlu2 %v5817_v51 }
 0x9f6   : > { %v5763_v21 = vpop.f32.mrf.mxu0 }
 0x9f7   : > { %v5764_v19 = vadd.f32 %v9490_v25, %v5763_v21 }
 0x9f9   : > { %v9510_v45 = vadd.f32 %v5764_v19, %v9289_v12  ;;  %v9522_v12 = vadd.f32 %v5776_v32, %v9318_v59  ;;  %v5774_v59 = vadd.f32 %v9490_v25, %v5773_v31 }
 0x9fb   : > { %v5820_v28 = vsel %vm489_vm0, %v9510_v45, 0.0  ;;  %v5835_v35 = vsel %vm489_vm0, %v9522_v12, 0.0  ;;  %v9544_v34 = vadd.f32 %v5774_v59, %v9321_v6  ;;  %v9556_v6 = vadd.f32 %v5786_v9, %v9410_v38 }
 0x9fc   : > { %5821 = vadd.xlane.f32.xlu0 %v5820_v28  ;;  %5827 = vadd.xlane.f32.xlu2 %v5826_v44 }
 0x9fd   : > { %v5832_v0 = vsel %vm489_vm0, %v9544_v34, 0.0  ;;  %v5847_v49 = vsel %vm489_vm0, %v9556_v6, 0.0 }
 0x9fe   : > { %v5765_v48 = vpop.f32.mrf.mxu0 }
 0x9ff   : > { %v5766_v23 = vadd.f32 %v9490_v25, %v5765_v48 }
 0xa01   : > { %v9526_v54 = vadd.f32 %v5766_v23, %v9292_v27  ;;  %v9538_v27 = vadd.f32 %v5779_v40, %v9376_v13  ;;  %v5781_v13 = vadd.f32 %v9490_v25, %v5780_v4 }
 0xa02   : > { %v5793_v36 = vpop.f32.mrf.mxu3 }
 0xa03   : > { %v5823_v62 = vsel %vm489_vm0, %v9526_v54, 0.0  ;;  %v5838_v43 = vsel %vm489_vm0, %v9538_v27, 0.0  ;;  %v9562_v52 = vadd.f32 %v5781_v13, %v9379_v46  ;;  %v5794_v7 = vadd.f32 %v9490_v25, %v5793_v36 }
 0xa04   : > { %5830 = vadd.xlane.f32.xlu0 %v5829_v8  ;;  %5836 = vadd.xlane.f32.xlu2 %v5835_v35  ;;  %v9576_v46 = vadd.f32 %v5789_v60, %v9435_v63 }
 0xa05   : > { %5824 = vadd.xlane.f32.xlu1 %v5823_v62  ;;  %v5841_v38 = vsel %vm489_vm0, %v9562_v52, 0.0  ;;  %v9573_v11 = vadd.f32 %v5794_v7, %v9462_v57 }
 0xa06   : > { %v5850_v31 = vsel %vm489_vm0, %v9576_v46, 0.0 }
 0xa07   : > { %v5856_v24 = vsel %vm489_vm0, %v9573_v11, 0.0 }
 0xa0a   : > { %v5795_v39 = vpop.f32.mrf.mxu3 }
 0xa0b   : > { %v5796_v2 = vadd.f32 %v9490_v25, %v5795_v39 }
 0xa0c   : > { %5839 = vadd.xlane.f32.xlu0 %v5838_v43  ;;  %5845 = vadd.xlane.f32.xlu2 %v5844_v53 }
 0xa0d   : > { %5833 = vadd.xlane.f32.xlu1 %v5832_v0  ;;  %v9584_v56 = vadd.f32 %v5796_v2, %v9465_v10 }
 0xa0f   : > { %v5859_v57 = vsel %vm489_vm0, %v9584_v56, 0.0 }
 0xa14   : > { %5848 = vadd.xlane.f32.xlu0 %v5847_v49  ;;  %5854 = vadd.xlane.f32.xlu2 %v5853_v55 }
 0xa15   : > { %5842 = vadd.xlane.f32.xlu1 %v5841_v38 }
 0xa1c   : > { %5857 = vadd.xlane.f32.xlu0 %v5856_v24 }
 0xa1d   : > { %5851 = vadd.xlane.f32.xlu1 %v5850_v31 }
 0xa25   : > { %5860 = vadd.xlane.f32.xlu1 %v5859_v57 }
 0xa5f   : > { %v5816_v63 = vpop.xlane.xlu1 %5815 }
 0xa60   : > { %v5862_v17 = vmul.f32 %v5816_v63, %v9128_v5 }
 0xa62   : > { %v9590_v4 = vsub.f32 %v9494_v50, %v5862_v17 }
 0xa64   : > { %v5894_v25 = vmul.f32 %v9590_v4, %v9590_v4 }
 0xa66   : > { %v5910_v16 = vsel %vm489_vm0, %v5894_v25, 0.0 }
 0xa67   : > { %v5819_v14 = vpop.xlane.xlu2 %5818  ;;  %5911 = vadd.xlane.f32.xlu2 %v5910_v16 }
 0xa68   : > { %v5863_v10 = vmul.f32 %v5819_v14, %v9128_v5 }
 0xa6a   : > { %v9597_v30 = vsub.f32 %v9500_v61, %v5863_v10 }
 0xa6c   : > { %v5895_v15 = vmul.f32 %v9597_v30, %v9597_v30 }
 0xa6e   : > { %v5913_v18 = vsel %vm489_vm0, %v5895_v15, 0.0 }
 0xa6f   : > { %v5828_v41 = vpop.xlane.xlu2 %5827  ;;  %5914 = vadd.xlane.f32.xlu0 %v5913_v18  ;;  %v5822_v50 = vpop.xlane.xlu0 %5821 }
 0xa70   : > { %v5866_v58 = vmul.f32 %v5828_v41, %v9128_v5  ;;  %v5864_v51 = vmul.f32 %v5822_v50, %v9128_v5 }
 0xa72   : > { %v9605_v20 = vsub.f32 %v9506_v3, %v5866_v58  ;;  %v9608_v21 = vsub.f32 %v9510_v45, %v5864_v51 }
 0xa74   : > { %v5898_v61 = vmul.f32 %v9605_v20, %v9605_v20  ;;  %v5896_v19 = vmul.f32 %v9608_v21, %v9608_v21 }
 0xa76   : > { %v5922_v22 = vsel %vm489_vm0, %v5898_v61, 0.0  ;;  %v5916_v32 = vsel %vm489_vm0, %v5896_v19, 0.0 }
 0xa77   : > { %v5837_v28 = vpop.xlane.xlu2 %5836  ;;  %5923 = vadd.xlane.f32.xlu0 %v5922_v22  ;;  %5917 = vadd.xlane.f32.xlu1 %v5916_v32  ;;  %v5831_v44 = vpop.xlane.xlu0 %5830 }
 0xa78   : > { %v5869_v3 = vmul.f32 %v5837_v28, %v9128_v5  ;;  %v5825_v29 = vpop.xlane.xlu1 %5824  ;;  %v5867_v45 = vmul.f32 %v5831_v44, %v9128_v5 }
 0xa79   : > { %v5865_v48 = vmul.f32 %v5825_v29, %v9128_v5 }
 0xa7a   : > { %v9620_v23 = vsub.f32 %v9522_v12, %v5869_v3  ;;  %v9623_v8 = vsub.f32 %v9519_v33, %v5867_v45 }
 0xa7b   : > { %v9626_v40 = vsub.f32 %v9526_v54, %v5865_v48 }
 0xa7c   : > { %v5901_v37 = vmul.f32 %v9620_v23, %v9620_v23  ;;  %v5899_v35 = vmul.f32 %v9623_v8, %v9623_v8 }
 0xa7d   : > { %v5897_v62 = vmul.f32 %v9626_v40, %v9626_v40 }
 0xa7e   : > { %v5931_v59 = vsel %vm489_vm0, %v5901_v37, 0.0  ;;  %v5925_v12 = vsel %vm489_vm0, %v5899_v35, 0.0 }
 0xa7f   : > { %v5846_v47 = vpop.xlane.xlu2 %5845  ;;  %v5919_v33 = vsel %vm489_vm0, %v5897_v62, 0.0  ;;  %5932 = vadd.xlane.f32.xlu0 %v5931_v59  ;;  %5926 = vadd.xlane.f32.xlu1 %v5925_v12  ;;  %v5840_v54 = vpop.xlane.xlu0 %5839 }
 0xa80   : > { %v5872_v9 = vmul.f32 %v5846_v47, %v9128_v5  ;;  %5920 = vadd.xlane.f32.xlu2 %v5919_v33  ;;  %v5834_v1 = vpop.xlane.xlu1 %5833  ;;  %v5870_v43 = vmul.f32 %v5840_v54, %v9128_v5 }
 0xa81   : > { %v5868_v53 = vmul.f32 %v5834_v1, %v9128_v5 }
 0xa82   : > { %v9641_v13 = vsub.f32 %v9541_v42, %v5872_v9  ;;  %v9644_v0 = vsub.f32 %v9538_v27, %v5870_v43 }
 0xa83   : > { %v9647_v36 = vsub.f32 %v9544_v34, %v5868_v53 }
 0xa84   : > { %v5904_v7 = vmul.f32 %v9641_v13, %v9641_v13  ;;  %v5902_v49 = vmul.f32 %v9644_v0, %v9644_v0 }
 0xa85   : > { %v5900_v55 = vmul.f32 %v9647_v36, %v9647_v36 }
 0xa86   : > { %v5940_v60 = vsel %vm489_vm0, %v5904_v7, 0.0  ;;  %v5934_v42 = vsel %vm489_vm0, %v5902_v49, 0.0 }
 0xa87   : > { %v5855_v38 = vpop.xlane.xlu2 %5854  ;;  %v5928_v27 = vsel %vm489_vm0, %v5900_v55, 0.0  ;;  %5941 = vadd.xlane.f32.xlu0 %v5940_v60  ;;  %5935 = vadd.xlane.f32.xlu1 %v5934_v42  ;;  %v5849_v34 = vpop.xlane.xlu0 %5848  ;;  %v9711_v60 = vld [vmem:[%s9959_s11] ss:$0 sm:$0xff] }
 0xa88   : > { %v5875_v39 = vmul.f32 %v5855_v38, %v9128_v5  ;;  %5929 = vadd.xlane.f32.xlu2 %v5928_v27  ;;  %v5843_v24 = vpop.xlane.xlu1 %5842  ;;  %v5873_v2 = vmul.f32 %v5849_v34, %v9128_v5  ;;  %v9718_v27 = vld [vmem:[%s9960_s12] ss:$0 sm:$0xff] }
 0xa89   : > { %v5871_v31 = vmul.f32 %v5843_v24, %v9128_v5 }
 0xa8a   : > { %v9662_v57 = vsub.f32 %v9559_v26, %v5875_v39  ;;  %v9665_v63 = vsub.f32 %v9556_v6, %v5873_v2 }
 0xa8b   : > { %v9668_v17 = vsub.f32 %v9562_v52, %v5871_v31 }
 0xa8c   : > { %v5907_v25 = vmul.f32 %v9662_v57, %v9662_v57  ;;  %v5905_v16 = vmul.f32 %v9665_v63, %v9665_v63 }
 0xa8d   : > { %v5903_v14 = vmul.f32 %v9668_v17, %v9668_v17 }
 0xa8e   : > { %v5949_v10 = vsel %vm489_vm0, %v5907_v25, 0.0  ;;  %v5943_v26 = vsel %vm489_vm0, %v5905_v16, 0.0 }
 0xa8f   : > { %v5937_v15 = vsel %vm489_vm0, %v5903_v14, 0.0  ;;  %5950 = vadd.xlane.f32.xlu0 %v5949_v10  ;;  %5944 = vadd.xlane.f32.xlu1 %v5943_v26  ;;  %v5858_v6 = vpop.xlane.xlu0 %5857 }
 0xa90   : > { %5938 = vadd.xlane.f32.xlu2 %v5937_v15  ;;  %v5852_v52 = vpop.xlane.xlu1 %5851  ;;  %v5876_v18 = vmul.f32 %v5858_v6, %v9128_v5 }
 0xa91   : > { %v5874_v41 = vmul.f32 %v5852_v52, %v9128_v5 }
 0xa92   : > { %v9682_v50 = vsub.f32 %v9573_v11, %v5876_v18 }
 0xa93   : > { %v9685_v58 = vsub.f32 %v9576_v46, %v5874_v41 }
 0xa94   : > { %v5908_v51 = vmul.f32 %v9682_v50, %v9682_v50 }
 0xa95   : > { %v5906_v61 = vmul.f32 %v9685_v58, %v9685_v58 }
 0xa96   : > { %v5952_v19 = vsel %vm489_vm0, %v5908_v51, 0.0 }
 0xa97   : > { %v5946_v22 = vsel %vm489_vm0, %v5906_v61, 0.0  ;;  %5953 = vadd.xlane.f32.xlu1 %v5952_v19 }
 0xa98   : > { %5947 = vadd.xlane.f32.xlu2 %v5946_v22  ;;  %v5861_v32 = vpop.xlane.xlu1 %5860 }
 0xa99   : > { %v5877_v28 = vmul.f32 %v5861_v32, %v9128_v5 }
 0xa9b   : > { %v9695_v11 = vsub.f32 %v9584_v56, %v5877_v28 }
 0xa9d   : > { %v5909_v46 = vmul.f32 %v9695_v11, %v9695_v11 }
 0xa9f   : > { %v5955_v44 = vsel %vm489_vm0, %v5909_v46, 0.0 }
 0xaa0   : > { %5956 = vadd.xlane.f32.xlu2 %v5955_v44 }
 0xada   : > { %v5912_v3 = vpop.xlane.xlu2 %5911 }
 0xadb   : > { %v5958_v29 = vmul.f32 %v5912_v3, %v9128_v5 }
 0xadd   : > { %v5974_v45 = vadd.f32 1e-05, %v5958_v29 }
 0xadf   : > { %7041 = vrsqrt.f32 %v5974_v45  ;;  %vm5996_vm11 = vweird.f32 %v5974_v45 }
 0xae2   : > { %v5915_v48 = vpop.xlane.xlu0 %5914 }
 0xae3   : > { %v5959_v37 = vmul.f32 %v5915_v48, %v9128_v5 }
 0xae5   : > { %v7042_v35 = vpop.eup %7041  ;;  %v5975_v62 = vadd.f32 1e-05, %v5959_v37 }
 0xae6   : > { %v5991_v59 = vmul.f32 %v7042_v35, %v5974_v45  ;;  %vm5997_vm6 = vweird.f32 %v7042_v35 }
 0xae7   : > { %7043 = vrsqrt.f32 %v5975_v62  ;;  %vm5998_vm12 = vmor %vm5996_vm11, %vm5997_vm6  ;;  %vm6006_vm14 = vweird.f32 %v5975_v62 }
 0xae8   : > { %v5992_v56 = vmul.f32 %v7042_v35, %v5991_v59 }
 0xaea   : > { %v5993_v12 = vmul.f32 0.5, %v5992_v56  ;;  %v5918_v47 = vpop.xlane.xlu1 %5917  ;;  %v5924_v33 = vpop.xlane.xlu0 %5923 }
 0xaeb   : > { %v5960_v54 = vmul.f32 %v5918_v47, %v9128_v5  ;;  %v5962_v9 = vmul.f32 %v5924_v33, %v9128_v5 }
 0xaec   : > { %v5994_v1 = vsub.f32 1.5, %v5993_v12 }
 0xaed   : > { %v7044_v43 = vpop.eup %7043  ;;  %v9704_v53 = vadd.f32 1e-05, %v5960_v54  ;;  %v9706_v7 = vadd.f32 1e-05, %v5962_v9 }
 0xaee   : > { %v5995_v49 = vmul.f32 %v7042_v35, %v5994_v1  ;;  %v6001_v55 = vmul.f32 %v7044_v43, %v5975_v62  ;;  %vm6007_vm13 = vweird.f32 %v7044_v43 }
 0xaef   : > { %7045 = vrsqrt.f32 %v9704_v53  ;;  %vm6008_vm15 = vmor %vm6006_vm14, %vm6007_vm13  ;;  %vm6016_vm1 = vweird.f32 %v9704_v53  ;;  %vm6036_vm3 = vweird.f32 %v9706_v7 }
 0xaf0   : > { %v5999_v42 = vsel %vm5998_vm12, %v7042_v35, %v5995_v49  ;;  %v6002_v38 = vmul.f32 %v7044_v43, %v6001_v55  ;;  %7047 = vrsqrt.f32 %v9706_v7 }
 0xaf1   : > { %v6150_v34 = vmul.f32 %v5999_v42, %v9590_v4 }
 0xaf2   : > { %v6003_v39 = vmul.f32 0.5, %v6002_v38  ;;  %v5927_v24 = vpop.xlane.xlu1 %5926  ;;  %v5933_v2 = vpop.xlane.xlu0 %5932 }
 0xaf3   : > { %v6170_v31 = vmul.f32 %v9711_v60, %v6150_v34  ;;  %v5921_v25 = vpop.xlane.xlu2 %5920  ;;  %v5963_v16 = vmul.f32 %v5927_v24, %v9128_v5  ;;  %v5965_v14 = vmul.f32 %v5933_v2, %v9128_v5 }
 0xaf4   : > { %v6004_v10 = vsub.f32 1.5, %v6003_v39  ;;  %v5961_v4 = vmul.f32 %v5921_v25, %v9128_v5 }
 0xaf5   : > { %v7046_v26 = vpop.eup %7045  ;;  %v6190_v15 = vadd.f32 %v9718_v27, %v6170_v31  ;;  %v9733_v6 = vadd.f32 1e-05, %v5963_v16  ;;  %v9735_v52 = vadd.f32 1e-05, %v5965_v14 }
 0xaf6   : > { %v7048_v18 = vpop.eup %7047  ;;  %v6005_v41 = vmul.f32 %v7044_v43, %v6004_v10  ;;  %v6011_v51 = vmul.f32 %v7046_v26, %v9704_v53  ;;  %v9738_v61 = vadd.f32 1e-05, %v5961_v4  ;;  %vm6017_vm2 = vweird.f32 %v7046_v26 }
 0xaf7   : > { %6206 = vst.msk [vmem:[%s9729_s20] sm:$0xff] %vm489_vm0, %v6190_v15  ;;  %v6031_v19 = vmul.f32 %v7048_v18, %v9706_v7  ;;  %7049 = vrsqrt.f32 %v9733_v6  ;;  %vm6037_vm4 = vweird.f32 %v7048_v18  ;;  %vm6046_vm5 = vweird.f32 %v9733_v6  ;;  %vm6018_vm7 = vmor %vm6016_vm1, %vm6017_vm2 }
 0xaf8   : > { %v6009_v22 = vsel %vm6008_vm15, %v7044_v43, %v6005_v41  ;;  %v6012_v32 = vmul.f32 %v7046_v26, %v6011_v51  ;;  %7051 = vrsqrt.f32 %v9738_v61  ;;  %vm6038_vm8 = vmor %vm6036_vm3, %vm6037_vm4  ;;  %vm6026_vm9 = vweird.f32 %v9738_v61 }
 0xaf9   : > { %v6151_v28 = vmul.f32 %v6009_v22, %v9597_v30  ;;  %v6032_v46 = vmul.f32 %v7048_v18, %v6031_v19  ;;  %7053 = vrsqrt.f32 %v9735_v52  ;;  %vm6066_vm13 = vweird.f32 %v9735_v52 }
 0xafa   : > { %v6013_v44 = vmul.f32 0.5, %v6012_v32  ;;  %v5936_v3 = vpop.xlane.xlu1 %5935  ;;  %v5942_v29 = vpop.xlane.xlu0 %5941 }
 0xafb   : > { %v6171_v45 = vmul.f32 %v9711_v60, %v6151_v28  ;;  %v6033_v48 = vmul.f32 0.5, %v6032_v46  ;;  %v5930_v37 = vpop.xlane.xlu2 %5929  ;;  %v5966_v35 = vmul.f32 %v5936_v3, %v9128_v5  ;;  %v5968_v62 = vmul.f32 %v5942_v29, %v9128_v5 }
 0xafc   : > { %v6014_v59 = vsub.f32 1.5, %v6013_v44  ;;  %v5964_v30 = vmul.f32 %v5930_v37, %v9128_v5 }
 0xafd   : > { %v9753_v56 = vpop.eup %7049  ;;  %v6191_v12 = vadd.f32 %v9718_v27, %v6171_v45  ;;  %v6034_v47 = vsub.f32 1.5, %v6033_v48  ;;  %v9756_v33 = vadd.f32 1e-05, %v5966_v35  ;;  %v9775_v38 = vadd.f32 1e-05, %v5968_v62 }
 0xafe   : > { %v9758_v54 = vpop.eup %7051  ;;  %v6015_v9 = vmul.f32 %v7046_v26, %v6014_v59  ;;  %v6041_v1 = vmul.f32 %v9753_v56, %v9733_v6  ;;  %v9763_v43 = vadd.f32 1e-05, %v5964_v30  ;;  %vm6047_vm10 = vweird.f32 %v9753_v56 }
 0xaff   : > { %v9765_v49 = vpop.eup %7053  ;;  %6207 = vst.msk [vmem:[%s9729_s20 + $0x8] sm:$0xff] %vm489_vm0, %v6191_v12  ;;  %v6035_v55 = vmul.f32 %v7048_v18, %v6034_v47  ;;  %v6021_v42 = vmul.f32 %v9758_v54, %v9738_v61  ;;  %7055 = vrsqrt.f32 %v9756_v33  ;;  %vm6027_vm6 = vweird.f32 %v9758_v54  ;;  %vm6048_vm12 = vmor %vm6046_vm5, %vm6047_vm10 }
 0xb00   : > { %v6019_v34 = vsel %vm6018_vm7, %v7046_v26, %v6015_v9  ;;  %v6042_v39 = vmul.f32 %v9753_v56, %v6041_v1  ;;  %v6061_v53 = vmul.f32 %v9765_v49, %v9735_v52  ;;  %7057 = vrsqrt.f32 %v9763_v43  ;;  %vm6028_vm15 = vmor %vm6026_vm9, %vm6027_vm6 }
 0xb01   : > { %v6152_v24 = vmul.f32 %v6019_v34, %v9608_v21  ;;  %v6039_v2 = vsel %vm6038_vm8, %v7048_v18, %v6035_v55  ;;  %v6022_v31 = vmul.f32 %v9758_v54, %v6021_v42  ;;  %7059 = vrsqrt.f32 %v9775_v38 }
 0xb02   : > { %v6154_v25 = vmul.f32 %v6039_v2, %v9605_v20  ;;  %v6043_v16 = vmul.f32 0.5, %v6042_v39  ;;  %v6062_v7 = vmul.f32 %v9765_v49, %v6061_v53  ;;  %v5945_v14 = vpop.xlane.xlu1 %5944  ;;  %vm6067_vm11 = vweird.f32 %v9765_v49 }
 0xb03   : > { %v6172_v10 = vmul.f32 %v9711_v60, %v6152_v24  ;;  %v6023_v4 = vmul.f32 0.5, %v6022_v31  ;;  %v5939_v21 = vpop.xlane.xlu2 %5938  ;;  %v5969_v22 = vmul.f32 %v5945_v14, %v9128_v5  ;;  %vm6076_vm14 = vweird.f32 %v9756_v33  ;;  %vm6068_vm2 = vmor %vm6066_vm13, %vm6067_vm11 }
 0xb04   : > { %v6174_v26 = vmul.f32 %v9711_v60, %v6154_v25  ;;  %v6044_v15 = vsub.f32 1.5, %v6043_v16  ;;  %v6063_v18 = vmul.f32 0.5, %v6062_v7  ;;  %v5967_v19 = vmul.f32 %v5939_v21, %v9128_v5 }
 0xb05   : > { %v9795_v20 = vpop.eup %7055  ;;  %v6192_v41 = vadd.f32 %v9718_v27, %v6172_v10  ;;  %v6024_v51 = vsub.f32 1.5, %v6023_v4  ;;  %vm6056_vm1 = vweird.f32 %v9763_v43  ;;  %v9828_v52 = vadd.f32 1e-05, %v5969_v22 }
 0xb06   : > { %v6194_v32 = vadd.f32 %v9718_v27, %v6174_v26  ;;  %v6045_v28 = vmul.f32 %v9753_v56, %v6044_v15  ;;  %v6064_v46 = vsub.f32 1.5, %v6063_v18  ;;  %v6071_v44 = vmul.f32 %v9795_v20, %v9756_v33  ;;  %v9804_v3 = vpop.eup %7057 }
 0xb07   : > { %6208 = vst.msk [vmem:[%s9729_s20 + $0x10] sm:$0xff] %vm489_vm0, %v6192_v41  ;;  %v6025_v29 = vmul.f32 %v9758_v54, %v6024_v51  ;;  %v9815_v45 = vadd.f32 1e-05, %v5967_v19  ;;  %v6051_v6 = vmul.f32 %v9804_v3, %v9763_v43  ;;  %v7060_v35 = vpop.eup %7059  ;;  %vm6096_vm3 = vweird.f32 %v9775_v38 }
 0xb08   : > { %6210 = vst.msk [vmem:[%s9729_s20 + $0x20] sm:$0xff] %vm489_vm0, %v6194_v32  ;;  %v6049_v48 = vsel %vm6048_vm12, %v9753_v56, %v6045_v28  ;;  %v6065_v37 = vmul.f32 %v9765_v49, %v6064_v46  ;;  %v6072_v61 = vmul.f32 %v9795_v20, %v6071_v44  ;;  %v6091_v47 = vmul.f32 %v7060_v35, %v9775_v38 }
 0xb09   : > { %v6029_v62 = vsel %vm6028_vm15, %v9758_v54, %v6025_v29  ;;  %v6155_v59 = vmul.f32 %v6049_v48, %v9623_v8  ;;  %7061 = vrsqrt.f32 %v9815_v45  ;;  %v6052_v12 = vmul.f32 %v9804_v3, %v6051_v6 }
 0xb0a   : > { %v6153_v30 = vmul.f32 %v6029_v62, %v9626_v40  ;;  %v6069_v56 = vsel %vm6068_vm2, %v9765_v49, %v6065_v37  ;;  %v6073_v8 = vmul.f32 0.5, %v6072_v61  ;;  %vm6077_vm4 = vweird.f32 %v9795_v20  ;;  %v5951_v49 = vpop.xlane.xlu0 %5950  ;;  %v5954_v31 = vpop.xlane.xlu1 %5953 }
 0xb0b   : > { %v6175_v9 = vmul.f32 %v9711_v60, %v6155_v59  ;;  %v6157_v54 = vmul.f32 %v6069_v56, %v9620_v23  ;;  %v5948_v1 = vpop.xlane.xlu2 %5947  ;;  %v6053_v42 = vmul.f32 0.5, %v6052_v12  ;;  %v6092_v40 = vmul.f32 %v7060_v35, %v6091_v47  ;;  %vm6078_vm7 = vmor %vm6076_vm14, %vm6077_vm4 }
 0xb0c   : > { %v6173_v55 = vmul.f32 %v9711_v60, %v6153_v30  ;;  %v6074_v53 = vsub.f32 1.5, %v6073_v8  ;;  %7063 = vrsqrt.f32 %v9828_v52  ;;  %vm6057_vm5 = vweird.f32 %v9804_v3 }
 0xb0d   : > { %v6195_v34 = vadd.f32 %v9718_v27, %v6175_v9  ;;  %v6177_v39 = vmul.f32 %v9711_v60, %v6157_v54  ;;  %v6054_v24 = vsub.f32 1.5, %v6053_v42  ;;  %v6093_v2 = vmul.f32 0.5, %v6092_v40  ;;  %vm6058_vm9 = vmor %vm6056_vm1, %vm6057_vm5 }
 0xb0e   : > { %v6193_v23 = vadd.f32 %v9718_v27, %v6173_v55  ;;  %v6075_v7 = vmul.f32 %v9795_v20, %v6074_v53  ;;  %v5971_v14 = vmul.f32 %v5951_v49, %v9128_v5  ;;  %v5970_v10 = vmul.f32 %v5948_v1, %v9128_v5 }
 0xb0f   : > { %v7062_v25 = vpop.eup %7061  ;;  %6211 = vst.msk [vmem:[%s9729_s20 + $0x28] sm:$0xff] %vm489_vm0, %v6195_v34  ;;  %v6197_v16 = vadd.f32 %v9718_v27, %v6177_v39  ;;  %v6055_v4 = vmul.f32 %v9804_v3, %v6054_v24  ;;  %v6094_v21 = vsub.f32 1.5, %v6093_v2  ;;  %vm6097_vm8 = vweird.f32 %v7060_v35 }
 0xb10   : > { %6209 = vst.msk [vmem:[%s9729_s20 + $0x18] sm:$0xff] %vm489_vm0, %v6193_v23  ;;  %v6081_v26 = vmul.f32 %v7062_v25, %v9815_v45  ;;  %v6079_v15 = vsel %vm6078_vm7, %v9795_v20, %v6075_v7  ;;  %v9871_v18 = vadd.f32 1e-05, %v5971_v14  ;;  %v9873_v41 = vadd.f32 1e-05, %v5970_v10  ;;  %vm6098_vm10 = vmor %vm6096_vm3, %vm6097_vm8 }
 0xb11   : > { %6213 = vst.msk [vmem:[%s9729_s20 + $0x38] sm:$0xff] %vm489_vm0, %v6197_v16  ;;  %v5972_v33 = vmul.f32 %v5954_v31, %v9128_v5  ;;  %v6059_v51 = vsel %vm6058_vm9, %v9804_v3, %v6055_v4  ;;  %v6158_v19 = vmul.f32 %v6079_v15, %v9644_v0  ;;  %v6095_v22 = vmul.f32 %v7060_v35, %v6094_v21 }
 0xb12   : > { %v6082_v32 = vmul.f32 %v7062_v25, %v6081_v26  ;;  %v7064_v28 = vpop.eup %7063  ;;  %v6156_v46 = vmul.f32 %v6059_v51, %v9647_v36  ;;  %7065 = vrsqrt.f32 %v9871_v18  ;;  %vm6087_vm6 = vweird.f32 %v7062_v25 }
 0xb13   : > { %v6178_v43 = vmul.f32 %v9711_v60, %v6158_v19  ;;  %v6099_v20 = vsel %vm6098_vm10, %v7060_v35, %v6095_v22  ;;  %v6101_v29 = vmul.f32 %v7064_v28, %v9828_v52  ;;  %v5957_v3 = vpop.xlane.xlu2 %5956  ;;  %7067 = vrsqrt.f32 %v9873_v41 }
 0xb14   : > { %v6083_v44 = vmul.f32 0.5, %v6082_v32  ;;  %v6176_v0 = vmul.f32 %v9711_v60, %v6156_v46  ;;  %v6160_v48 = vmul.f32 %v6099_v20, %v9641_v13  ;;  %v9888_v6 = vadd.f32 1e-05, %v5972_v33 }
 0xb15   : > { %v6198_v36 = vadd.f32 %v9718_v27, %v6178_v43  ;;  %v6102_v37 = vmul.f32 %v7064_v28, %v6101_v29  ;;  %v5973_v59 = vmul.f32 %v5957_v3, %v9128_v5  ;;  %vm6086_vm11 = vweird.f32 %v9815_v45 }
 0xb16   : > { %v6084_v38 = vsub.f32 1.5, %v6083_v44  ;;  %v6196_v35 = vadd.f32 %v9718_v27, %v6176_v0  ;;  %v6180_v62 = vmul.f32 %v9711_v60, %v6160_v48  ;;  %7069 = vrsqrt.f32 %v9888_v6  ;;  %vm6088_vm12 = vmor %vm6086_vm11, %vm6087_vm6 }
 0xb17   : > { %6214 = vst.msk [vmem:[%s9729_s20 + $0x40] sm:$0xff] %vm489_vm0, %v6198_v36  ;;  %v6103_v61 = vmul.f32 0.5, %v6102_v37  ;;  %v9901_v12 = vadd.f32 1e-05, %v5973_v59  ;;  %vm6107_vm13 = vweird.f32 %v7064_v28  ;;  %vm6106_vm14 = vweird.f32 %v9828_v52 }
 0xb18   : > { %v6085_v13 = vmul.f32 %v7062_v25, %v6084_v38  ;;  %v7066_v30 = vpop.eup %7065  ;;  %6212 = vst.msk [vmem:[%s9729_s20 + $0x30] sm:$0xff] %vm489_vm0, %v6196_v35  ;;  %v6200_v56 = vadd.f32 %v9718_v27, %v6180_v62  ;;  %vm6108_vm15 = vmor %vm6106_vm14, %vm6107_vm13  ;;  %vm6126_vm2 = vweird.f32 %v9871_v18  ;;  %vm6116_vm5 = vweird.f32 %v9873_v41 }
 0xb19   : > { %v6104_v5 = vsub.f32 1.5, %v6103_v61  ;;  %v6121_v9 = vmul.f32 %v7066_v30, %v9871_v18  ;;  %v7068_v54 = vpop.eup %7067  ;;  %7071 = vrsqrt.f32 %v9901_v12  ;;  %vm6127_vm1 = vweird.f32 %v7066_v30 }
 0xb1a   : > { %v6089_v47 = vsel %vm6088_vm12, %v7062_v25, %v6085_v13  ;;  %6216 = vst.msk [vmem:[%s9729_s20 + $0x50] sm:$0xff] %vm489_vm0, %v6200_v56  ;;  %v6111_v55 = vmul.f32 %v7068_v54, %v9873_v41  ;;  %vm6117_vm3 = vweird.f32 %v7068_v54  ;;  %vm6128_vm4 = vmor %vm6126_vm2, %vm6127_vm1  ;;  %vm6136_vm9 = vweird.f32 %v9888_v6 }
 0xb1b   : > { %v6159_v45 = vmul.f32 %v6089_v47, %v9668_v17  ;;  %v6105_v8 = vmul.f32 %v7064_v28, %v6104_v5  ;;  %v6122_v1 = vmul.f32 %v7066_v30, %v6121_v9  ;;  %vm6118_vm7 = vmor %vm6116_vm5, %vm6117_vm3  ;;  %vm6146_vm11 = vweird.f32 %v9901_v12 }
 0xb1c   : > { %v7070_v40 = vpop.eup %7069  ;;  %v6112_v39 = vmul.f32 %v7068_v54, %v6111_v55 }
 0xb1d   : > { %v6179_v42 = vmul.f32 %v9711_v60, %v6159_v45  ;;  %v6109_v49 = vsel %vm6108_vm15, %v7064_v28, %v6105_v8  ;;  %v6123_v34 = vmul.f32 0.5, %v6122_v1  ;;  %v6131_v23 = vmul.f32 %v7070_v40, %v9888_v6 }
 0xb1e   : > { %v6161_v17 = vmul.f32 %v6109_v49, %v9665_v63  ;;  %v6113_v52 = vmul.f32 0.5, %v6112_v39  ;;  %vm6137_vm8 = vweird.f32 %v7070_v40 }
 0xb1f   : > { %v6199_v53 = vadd.f32 %v9718_v27, %v6179_v42  ;;  %v6124_v24 = vsub.f32 1.5, %v6123_v34  ;;  %v7072_v2 = vpop.eup %7071  ;;  %v6132_v25 = vmul.f32 %v7070_v40, %v6131_v23  ;;  %vm6138_vm10 = vmor %vm6136_vm9, %vm6137_vm8 }
 0xb20   : > { %v6181_v31 = vmul.f32 %v9711_v60, %v6161_v17  ;;  %v6114_v7 = vsub.f32 1.5, %v6113_v52  ;;  %v6141_v14 = vmul.f32 %v7072_v2, %v9901_v12  ;;  %vm6147_vm6 = vweird.f32 %v7072_v2 }
 0xb21   : > { %6215 = vst.msk [vmem:[%s9729_s20 + $0x48] sm:$0xff] %vm489_vm0, %v6199_v53  ;;  %v6125_v16 = vmul.f32 %v7066_v30, %v6124_v24  ;;  %v6133_v10 = vmul.f32 0.5, %v6132_v25  ;;  %vm6148_vm12 = vmor %vm6146_vm11, %vm6147_vm6 }
 0xb22   : > { %v6201_v63 = vadd.f32 %v9718_v27, %v6181_v31  ;;  %v6115_v21 = vmul.f32 %v7068_v54, %v6114_v7  ;;  %v6142_v26 = vmul.f32 %v7072_v2, %v6141_v14 }
 0xb23   : > { %v6129_v4 = vsel %vm6128_vm4, %v7066_v30, %v6125_v16  ;;  %v6134_v18 = vsub.f32 1.5, %v6133_v10 }
 0xb24   : > { %6217 = vst.msk [vmem:[%s9729_s20 + $0x58] sm:$0xff] %vm489_vm0, %v6201_v63  ;;  %v6163_v15 = vmul.f32 %v6129_v4, %v9662_v57  ;;  %v6119_v33 = vsel %vm6118_vm7, %v7068_v54, %v6115_v21  ;;  %v6143_v51 = vmul.f32 0.5, %v6142_v26 }
 0xb25   : > { %v6162_v22 = vmul.f32 %v6119_v33, %v9685_v58  ;;  %v6135_v32 = vmul.f32 %v7070_v40, %v6134_v18 }
 0xb26   : > { %v6183_v19 = vmul.f32 %v9711_v60, %v6163_v15  ;;  %v6144_v41 = vsub.f32 1.5, %v6143_v51 }
 0xb27   : > { %v6182_v28 = vmul.f32 %v9711_v60, %v6162_v22  ;;  %v6139_v46 = vsel %vm6138_vm10, %v7070_v40, %v6135_v32 }
 0xb28   : > { %v6203_v57 = vadd.f32 %v9718_v27, %v6183_v19  ;;  %v6164_v43 = vmul.f32 %v6139_v46, %v9682_v50  ;;  %v6145_v20 = vmul.f32 %v7072_v2, %v6144_v41 }
 0xb29   : > { %v6202_v58 = vadd.f32 %v9718_v27, %v6182_v28 }
 0xb2a   : > { %6219 = vst.msk [vmem:[%s9729_s20 + $0x68] sm:$0xff] %vm489_vm0, %v6203_v57  ;;  %v6184_v44 = vmul.f32 %v9711_v60, %v6164_v43  ;;  %v6149_v29 = vsel %vm6148_vm12, %v7072_v2, %v6145_v20 }
 0xb2b   : > { %6218 = vst.msk [vmem:[%s9729_s20 + $0x60] sm:$0xff] %vm489_vm0, %v6202_v58  ;;  %v6165_v3 = vmul.f32 %v6149_v29, %v9695_v11 }
 0xb2c   : > { %v6204_v0 = vadd.f32 %v9718_v27, %v6184_v44 }
 0xb2d   : > { %v6185_v48 = vmul.f32 %v9711_v60, %v6165_v3 }
 0xb2e   : > { %6220 = vst.msk [vmem:[%s9729_s20 + $0x70] sm:$0xff] %vm489_vm0, %v6204_v0 }
 0xb2f   : > { %v6205_v50 = vadd.f32 %v9718_v27, %v6185_v48 }
 0xb31   : > { %6221 = vst.msk [vmem:[%s9729_s20 + $0x78] sm:$0xff] %vm489_vm0, %v6205_v50 }
 0xb32 PF: > { %s23_s25 = sadd.s32 1, %s7095_s25  }
 0xb33   : > { %p20_p4 = scmp.ge.s32.totalorder %s23_s25, 4  }
 0xb35   :  { %22 = sbr.rel (!%p20_p4) target bundleno = 1 (0x1), region = 102 }

</bundles_post_ra>
